<compile_context>
chip_gen: v6e
topology: v6e:2x2x1
jax: 0.10.0
libtpu: 0.0.40
codegen_flags: <defaults>
</compile_context>

<pallas_src>
import functools
import math

import jax
import jax.numpy as jnp
from jax.experimental import pallas as pl
from jax.experimental.pallas import tpu as pltpu


# ----------------------------------------------------------------------------
# Small synthetic GPT-2 config (keeps shapes tiny but structurally faithful)
# ----------------------------------------------------------------------------
CFG = dict(
    n_layer=2,
    n_head=4,
    n_embd=32,
    n_positions=16,
    vocab_size=64,
    latent_size=16,
)
LN_EPS = 1e-5
NEG_BIG = -1e4      # HF GPT-2 uses -1e4 (not -inf) for causally masked scores


# ----------------------------------------------------------------------------
# In-kernel helpers
# ----------------------------------------------------------------------------
def _layernorm(x, g, b):
    mu = jnp.mean(x, axis=-1, keepdims=True)
    xc = x - mu
    var = jnp.mean(xc * xc, axis=-1, keepdims=True)
    return xc * jax.lax.rsqrt(var + LN_EPS) * g + b


def _gelu_new(y):
    return 0.5 * y * (1.0 + jnp.tanh(
        math.sqrt(2.0 / math.pi) * (y + 0.044715 * y * y * y)))


def _mm(x, w_bf16):
    """MXU matmul: bf16 operands, f32 accumulation."""
    return jnp.dot(x.astype(jnp.bfloat16), w_bf16,
                   preferred_element_type=jnp.float32)


# ----------------------------------------------------------------------------
# The single fused kernel
# ----------------------------------------------------------------------------
def _gpt2_fused_kernel(
        emb_ref, h0_ref, bpast_ref, bnew_ref,
        tm_w_ref, tm_b_ref,
        ln_ref, cattn_w_ref, cattn_b_ref,
        cproj_w_ref, cproj_b_ref,
        cfc_w_ref, cfc_b_ref, mlp_w_ref, mlp_b_ref,
        lnf_ref, wte_t_ref,
        o_ref,
        *, n_layer, n_head, batch, seq, head_dim, n_embd):
    B, T, H, L, hd, C = batch, seq, n_head, n_layer, head_dim, n_embd
    scale = 1.0 / math.sqrt(hd)

    # ---- ALL past K/V in one matmul: (B, Z) x (Z, L*2*C) -> (B, L*2*C) ----
    # Output feature order is (layer, kv, head, d), exactly the reshape the
    # PyTorch wrapper applies to transform_matrix(embeddings).
    past = _mm(emb_ref[...], tm_w_ref[...]) + tm_b_ref[...]          # f32

    # Hoisted per-batch additive attention biases (causal + mask, precomputed
    # in the wrapper) — the inner loop only does a single add per (b, h).
    bias_new = [bnew_ref[pl.ds(b * T, T), :] for b in range(B)]      # (T, T)
    bias_past = [bpast_ref[pl.ds(b * T, T), :] for b in range(B)]    # (T, 1)

    x = h0_ref[...]                                                  # (B*T, C) f32

    for l in range(L):
        lnp = ln_ref[l, :, :]                                        # (4, C)

        # ------------------ attention ------------------
        h1 = _layernorm(x, lnp[0:1, :], lnp[1:2, :])

        # Packed QKV: one (B*T, C) x (C, 3C) matmul.
        qkv = _mm(h1, cattn_w_ref[l, :, :]) + cattn_b_ref[l, :, :]   # (B*T, 3C) f32
        q = qkv[:, 0:C] * scale                # fold 1/sqrt(hd) once per layer
        k16 = qkv[:, C:2 * C].astype(jnp.bfloat16)
        v16 = qkv[:, 2 * C:3 * C].astype(jnp.bfloat16)

        rows = []
        for b in range(B):
            qb = q[b * T:(b + 1) * T, :]                             # (T, C)
            kb = k16[b * T:(b + 1) * T, :]
            vb = v16[b * T:(b + 1) * T, :]
            heads = []
            for hh in range(H):
                qh = qb[:, hh * hd:(hh + 1) * hd]                    # (T, hd) f32
                kh = kb[:, hh * hd:(hh + 1) * hd]                    # (T, hd) bf16
                vh = vb[:, hh * hd:(hh + 1) * hd]

                off_k = (l * 2 * H + hh) * hd
                off_v = ((l * 2 + 1) * H + hh) * hd
                pk = past[b:b + 1, off_k:off_k + hd]                 # (1, hd)
                pv = past[b:b + 1, off_v:off_v + hd]

                # scores vs the T new keys and the 1 past key
                s_new = jax.lax.dot_general(
                    qh.astype(jnp.bfloat16), kh,
                    (((1,), (1,)), ((), ())),
                    preferred_element_type=jnp.float32) + bias_new[b]      # (T, T)
                s_past = (jnp.sum(qh * pk, axis=-1, keepdims=True)
                          + bias_past[b])                                  # (T, 1)

                # softmax over [past | new] without materializing a concat
                m = jnp.maximum(jnp.max(s_new, axis=-1, keepdims=True), s_past)
                e_new = jnp.exp(s_new - m)
                e_past = jnp.exp(s_past - m)
                inv = pl.reciprocal(
                    jnp.sum(e_new, axis=-1, keepdims=True) + e_past,
                    approx=True)
                heads.append((_mm(e_new, vh) + e_past * pv) * inv)         # (T, hd)

            rows.append(jnp.concatenate(heads, axis=1))                    # (T, C)

        attn = jnp.concatenate(rows, axis=0)                               # (B*T, C)
        # One fused c_proj matmul (K = C, accumulation inside the MXU path).
        x = x + _mm(attn, cproj_w_ref[l, :, :]) + cproj_b_ref[l, :, :]

        # ------------------ MLP ------------------
        h2 = _layernorm(x, lnp[2:3, :], lnp[3:4, :])
        mfc = _gelu_new(_mm(h2, cfc_w_ref[l, :, :]) + cfc_b_ref[l, :, :])  # (B*T, 4C)
        x = x + _mm(mfc, mlp_w_ref[l, :, :]) + mlp_b_ref[l, :, :]

    # -------- final LN + tied lm_head (pre-transposed, lane-padded wte) -----
    lnf = lnf_ref[...]
    hf = _layernorm(x, lnf[0:1, :], lnf[1:2, :])
    o_ref[...] = _mm(hf, wte_t_ref[...])                                   # (B*T, Vpad)


# ----------------------------------------------------------------------------
# Wrapper: parameter re-layout (done once per traced call) + pallas_call
# ----------------------------------------------------------------------------
def _prep_kernel_params(params):
    cfg = CFG
    L, C, V = cfg["n_layer"], cfg["n_embd"], cfg["vocab_size"]
    bf16 = jnp.bfloat16
    blocks = params["blocks"]
    stack = lambda name: jnp.stack([blk[name] for blk in blocks], axis=0)

    # pack LN params: (L, 4, C) = [ln1_g, ln1_b, ln2_g, ln2_b]
    ln = jnp.stack([jnp.stack([blk["ln_1_g"], blk["ln_1_b"],
                               blk["ln_2_g"], blk["ln_2_b"]], axis=0)
                    for blk in blocks], axis=0)

    # lm_head: pre-transpose wte and zero-pad vocab to a lane-dense multiple of 128
    v_pad = max(128, ((V + 127) // 128) * 128)
    wte_t = jnp.zeros((C, v_pad), bf16).at[:, :V].set(
        params["wte"].T.astype(bf16))

    return dict(
        tm_w=params["tm_w"].astype(bf16),                    # (Z, L*2*C)
        tm_b=params["tm_b"].reshape(1, -1),                  # (1, L*2*C)
        ln=ln,                                               # (L, 4, C)
        cattn_w=stack("c_attn_w").astype(bf16),              # (L, C, 3C)
        cattn_b=stack("c_attn_b").reshape(L, 1, 3 * C),
        cproj_w=stack("c_proj_w").astype(bf16),              # (L, C, C)
        cproj_b=stack("c_proj_b").reshape(L, 1, C),
        cfc_w=stack("c_fc_w").astype(bf16),                  # (L, C, 4C)
        cfc_b=stack("c_fc_b").reshape(L, 1, 4 * C),
        mlp_w=stack("mlp_proj_w").astype(bf16),              # (L, 4C, C)
        mlp_b=stack("mlp_proj_b").reshape(L, 1, C),
        lnf=jnp.stack([params["ln_f_g"], params["ln_f_b"]], axis=0),  # (2, C)
        wte_t=wte_t,                                         # (C, v_pad)
        v_pad=v_pad,
    )


def gpt2_wrapper_forward(params, embeddings, decoder_input_ids,
                         decoder_attention_mask):
    """Reproduces GPT2_WRAPPER.forward -> decoder_lm_logits (B, T, vocab)."""
    cfg = CFG
    B = embeddings.shape[0]
    L, H, C, V = cfg["n_layer"], cfg["n_head"], cfg["n_embd"], cfg["vocab_size"]
    hd = C // H
    T = decoder_input_ids.shape[1]
    past_len = 1

    # Token + position embedding lookup.
    # TODO(synk): embedding-table gather not expressed in Pallas; done with jnp.take.
    pos_ids = jnp.arange(past_len, past_len + T)
    h0 = (jnp.take(params["wte"], decoder_input_ids, axis=0)
          + jnp.take(params["wpe"], pos_ids, axis=0)[None])             # (B, T, C)
    h0 = h0.reshape(B * T, C).astype(jnp.float32)

    # Additive biases over [past | new] keys, hoisted out of the kernel loops:
    #   bias_new = causal bias + attention-mask bias for the T new keys (B*T, T)
    #   bias_past = attention-mask bias for the single past key         (B*T, 1)
    amask = (1.0 - decoder_attention_mask.astype(jnp.float32)) * -10000.0
    row = jnp.arange(T)[:, None]
    col = jnp.arange(T)[None, :]
    causal_bias = jnp.where(col <= row, 0.0, NEG_BIG)                   # (T, T)
    bias_new = (causal_bias[None] + amask[:, None, past_len:]).reshape(B * T, T)
    bias_past = jnp.broadcast_to(
        amask[:, :past_len][:, None, :], (B, T, past_len)).reshape(B * T, past_len)

    kp = _prep_kernel_params(params)
    v_pad = kp["v_pad"]

    kernel = functools.partial(_gpt2_fused_kernel, n_layer=L, n_head=H,
                               batch=B, seq=T, head_dim=hd, n_embd=C)
    inputs = (embeddings.astype(jnp.float32), h0, bias_past, bias_new,
              kp["tm_w"], kp["tm_b"], kp["ln"],
              kp["cattn_w"], kp["cattn_b"], kp["cproj_w"], kp["cproj_b"],
              kp["cfc_w"], kp["cfc_b"], kp["mlp_w"], kp["mlp_b"],
              kp["lnf"], kp["wte_t"])

    logits = pl.pallas_call(
        kernel,
        out_shape=jax.ShapeDtypeStruct((B * T, v_pad), jnp.float32),
        in_specs=[pl.BlockSpec(memory_space=pltpu.MemorySpace.VMEM)] * len(inputs),
        out_specs=pl.BlockSpec(memory_space=pltpu.MemorySpace.VMEM),
    )(*inputs)
    return logits[:, :V].reshape(B, T, V)


# ----------------------------------------------------------------------------
# Deterministic parameter initialization
# ----------------------------------------------------------------------------
def init_params(key):
    cfg = CFG
    L, C, V, P, Z = (cfg["n_layer"], cfg["n_embd"], cfg["vocab_size"],
                     cfg["n_positions"], cfg["latent_size"])
    keys = iter(jax.random.split(key, 64))

    def w(shape, scale=0.02):
        return (scale * jax.random.normal(next(keys), shape)).astype(jnp.float32)

    blocks = []
    for _ in range(L):
        blocks.append(dict(
            ln_1_g=jnp.ones((C,), jnp.float32), ln_1_b=jnp.zeros((C,), jnp.float32),
            c_attn_w=w((C, 3 * C)), c_attn_b=jnp.zeros((3 * C,), jnp.float32),
            c_proj_w=w((C, C)), c_proj_b=jnp.zeros((C,), jnp.float32),
            ln_2_g=jnp.ones((C,), jnp.float32), ln_2_b=jnp.zeros((C,), jnp.float32),
            c_fc_w=w((C, 4 * C)), c_fc_b=jnp.zeros((4 * C,), jnp.float32),
            mlp_proj_w=w((4 * C, C)), mlp_proj_b=jnp.zeros((C,), jnp.float32),
        ))
    return dict(
        tm_w=w((Z, L * C * 2)),          # transform_matrix, output order (l, kv, h, d)
        tm_b=jnp.zeros((L * C * 2,), jnp.float32),
        wte=w((V, C)),
        wpe=w((P, C), scale=0.01),
        ln_f_g=jnp.ones((C,), jnp.float32),
        ln_f_b=jnp.zeros((C,), jnp.float32),
        blocks=blocks,
    )


# ----------------------------------------------------------------------------
if __name__ == "__main__":
    key = jax.random.PRNGKey(0)
    k_par, k_emb, k_ids = jax.random.split(key, 3)

    B, T = 2, 8
    params = init_params(k_par)

    embeddings = jax.random.normal(k_emb, (B, CFG["latent_size"]), jnp.float32)
    decoder_input_ids = jax.random.randint(k_ids, (B, T), 0, CFG["vocab_size"],
                                           dtype=jnp.int32)
    # mask covers [past(=1) | T new tokens]; mask out the last token of batch 1
    decoder_attention_mask = jnp.ones((B, 1 + T), jnp.float32)
    decoder_attention_mask = decoder_attention_mask.at[1, -1].set(0.0)

    fwd = jax.jit(gpt2_wrapper_forward)
    logits = fwd(params, embeddings, decoder_input_ids, decoder_attention_mask)
    logits = jax.block_until_ready(logits)

    assert logits.shape == (B, T, CFG["vocab_size"])
    assert bool(jnp.all(jnp.isfinite(logits)))
    print("KERNEL_OK")
</pallas_src>

<mosaic_0001>
module attributes {stable_mosaic.version = 11 : i64} {
  func.func @_gpt2_fused_kernel(%arg0: memref<2x16xf32, #tpu.memory_space<vmem>>, %arg1: memref<16x32xf32, #tpu.memory_space<vmem>>, %arg2: memref<16x1xf32, #tpu.memory_space<vmem>>, %arg3: memref<16x8xf32, #tpu.memory_space<vmem>>, %arg4: memref<16x128xbf16, #tpu.memory_space<vmem>>, %arg5: memref<1x128xf32, #tpu.memory_space<vmem>>, %arg6: memref<2x4x32xf32, #tpu.memory_space<vmem>>, %arg7: memref<2x32x96xbf16, #tpu.memory_space<vmem>>, %arg8: memref<2x1x96xf32, #tpu.memory_space<vmem>>, %arg9: memref<2x32x32xbf16, #tpu.memory_space<vmem>>, %arg10: memref<2x1x32xf32, #tpu.memory_space<vmem>>, %arg11: memref<2x32x128xbf16, #tpu.memory_space<vmem>>, %arg12: memref<2x1x128xf32, #tpu.memory_space<vmem>>, %arg13: memref<2x128x32xbf16, #tpu.memory_space<vmem>>, %arg14: memref<2x1x32xf32, #tpu.memory_space<vmem>>, %arg15: memref<2x32xf32, #tpu.memory_space<vmem>>, %arg16: memref<32x128xbf16, #tpu.memory_space<vmem>>, %arg17: memref<16x128xf32, #tpu.memory_space<vmem>>) attributes {dimension_semantics = [], scalar_prefetch = 0 : i64, scratch_operands = 0 : i64, tpu.core_type = #tpu.core_type<tc>} {
    %c0 = arith.constant 0 : index
    %c0_0 = arith.constant 0 : index
    %0 = vector.load %arg0[%c0, %c0_0] : memref<2x16xf32, #tpu.memory_space<vmem>>, vector<2x16xf32>
    %c0_1 = arith.constant 0 : index
    %c0_2 = arith.constant 0 : index
    %1 = vector.load %arg4[%c0_1, %c0_2] : memref<16x128xbf16, #tpu.memory_space<vmem>>, vector<16x128xbf16>
    %2 = arith.truncf %0 : vector<2x16xf32> to vector<2x16xbf16>
    %cst = arith.constant dense<0.000000e+00> : vector<2x128xf32>
    %3 = tpu.matmul %2, %1, %cst {dimension_numbers = #tpu.dot_dimension_numbers<[1], [0], [0], [1], [0, 0, 1, 1], [], []>} : vector<2x16xbf16>, vector<16x128xbf16>, vector<2x128xf32> -> vector<2x128xf32>
    %c0_3 = arith.constant 0 : index
    %c0_4 = arith.constant 0 : index
    %4 = vector.load %arg5[%c0_3, %c0_4] : memref<1x128xf32, #tpu.memory_space<vmem>>, vector<1x128xf32>
    %5 = vector.broadcast %4 : vector<1x128xf32> to vector<2x128xf32>
    %6 = arith.addf %3, %5 : vector<2x128xf32>
    %c0_5 = arith.constant 0 : index
    %c0_6 = arith.constant 0 : index
    %7 = vector.load %arg3[%c0_5, %c0_6] : memref<16x8xf32, #tpu.memory_space<vmem>>, vector<8x8xf32>
    %c8 = arith.constant 8 : index
    %c0_7 = arith.constant 0 : index
    %8 = vector.load %arg3[%c8, %c0_7] : memref<16x8xf32, #tpu.memory_space<vmem>>, vector<8x8xf32>
    %c0_8 = arith.constant 0 : index
    %c0_9 = arith.constant 0 : index
    %9 = vector.load %arg2[%c0_8, %c0_9] : memref<16x1xf32, #tpu.memory_space<vmem>>, vector<8x1xf32>
    %c8_10 = arith.constant 8 : index
    %c0_11 = arith.constant 0 : index
    %10 = vector.load %arg2[%c8_10, %c0_11] : memref<16x1xf32, #tpu.memory_space<vmem>>, vector<8x1xf32>
    %c0_12 = arith.constant 0 : index
    %c0_13 = arith.constant 0 : index
    %11 = vector.load %arg1[%c0_12, %c0_13] : memref<16x32xf32, #tpu.memory_space<vmem>>, vector<16x32xf32>
    %c0_14 = arith.constant 0 : index
    %c0_15 = arith.constant 0 : index
    %c0_16 = arith.constant 0 : index
    %12 = vector.load %arg6[%c0_14, %c0_15, %c0_16] : memref<2x4x32xf32, #tpu.memory_space<vmem>>, vector<1x4x32xf32>
    %13 = vector.shape_cast %12 : vector<1x4x32xf32> to vector<4x32xf32>
    %14 = vector.extract_strided_slice %13 {offsets = [0, 0], sizes = [1, 32], strides = [1, 1]} : vector<4x32xf32> to vector<1x32xf32>
    %15 = vector.extract_strided_slice %13 {offsets = [1, 0], sizes = [1, 32], strides = [1, 1]} : vector<4x32xf32> to vector<1x32xf32>
    %cst_17 = arith.constant dense<0.000000e+00> : vector<16xf32>
    %16 = vector.multi_reduction <add>, %11, %cst_17 [1] : vector<16x32xf32> to vector<16xf32>
    %17 = vector.shape_cast %16 : vector<16xf32> to vector<16x1xf32>
    %cst_18 = arith.constant 3.200000e+01 : f32
    %18 = vector.broadcast %cst_18 : f32 to vector<16x1xf32>
    %19 = arith.divf %17, %18 : vector<16x1xf32>
    %20 = vector.broadcast %19 : vector<16x1xf32> to vector<16x32xf32>
    %21 = arith.subf %11, %20 : vector<16x32xf32>
    %22 = arith.mulf %21, %21 : vector<16x32xf32>
    %cst_19 = arith.constant dense<0.000000e+00> : vector<16xf32>
    %23 = vector.multi_reduction <add>, %22, %cst_19 [1] : vector<16x32xf32> to vector<16xf32>
    %24 = vector.shape_cast %23 : vector<16xf32> to vector<16x1xf32>
    %cst_20 = arith.constant 3.200000e+01 : f32
    %25 = vector.broadcast %cst_20 : f32 to vector<16x1xf32>
    %26 = arith.divf %24, %25 : vector<16x1xf32>
    %cst_21 = arith.constant 9.99999974E-6 : f32
    %27 = vector.broadcast %cst_21 : f32 to vector<16x1xf32>
    %28 = arith.addf %26, %27 : vector<16x1xf32>
    %29 = math.rsqrt %28 : vector<16x1xf32>
    %30 = vector.broadcast %29 : vector<16x1xf32> to vector<16x32xf32>
    %31 = arith.mulf %21, %30 : vector<16x32xf32>
    %32 = vector.broadcast %14 : vector<1x32xf32> to vector<16x32xf32>
    %33 = arith.mulf %31, %32 : vector<16x32xf32>
    %34 = vector.broadcast %15 : vector<1x32xf32> to vector<16x32xf32>
    %35 = arith.addf %33, %34 : vector<16x32xf32>
    %c0_22 = arith.constant 0 : index
    %c0_23 = arith.constant 0 : index
    %c0_24 = arith.constant 0 : index
    %36 = vector.load %arg7[%c0_22, %c0_23, %c0_24] : memref<2x32x96xbf16, #tpu.memory_space<vmem>>, vector<1x32x96xbf16>
    %37 = vector.shape_cast %36 : vector<1x32x96xbf16> to vector<32x96xbf16>
    %38 = arith.truncf %35 : vector<16x32xf32> to vector<16x32xbf16>
    %cst_25 = arith.constant dense<0.000000e+00> : vector<16x96xf32>
    %39 = tpu.matmul %38, %37, %cst_25 {dimension_numbers = #tpu.dot_dimension_numbers<[1], [0], [0], [1], [0, 0, 1, 1], [], []>} : vector<16x32xbf16>, vector<32x96xbf16>, vector<16x96xf32> -> vector<16x96xf32>
    %c0_26 = arith.constant 0 : index
    %c0_27 = arith.constant 0 : index
    %c0_28 = arith.constant 0 : index
    %40 = vector.load %arg8[%c0_26, %c0_27, %c0_28] : memref<2x1x96xf32, #tpu.memory_space<vmem>>, vector<1x1x96xf32>
    %41 = vector.shape_cast %40 : vector<1x1x96xf32> to vector<1x96xf32>
    %42 = vector.broadcast %41 : vector<1x96xf32> to vector<16x96xf32>
    %43 = arith.addf %39, %42 : vector<16x96xf32>
    %44 = vector.extract_strided_slice %43 {offsets = [0, 0], sizes = [16, 32], strides = [1, 1]} : vector<16x96xf32> to vector<16x32xf32>
    %cst_29 = arith.constant 0.353553385 : f32
    %45 = vector.broadcast %cst_29 : f32 to vector<16x32xf32>
    %46 = arith.mulf %44, %45 : vector<16x32xf32>
    %47 = vector.extract_strided_slice %43 {offsets = [0, 32], sizes = [16, 32], strides = [1, 1]} : vector<16x96xf32> to vector<16x32xf32>
    %48 = arith.truncf %47 : vector<16x32xf32> to vector<16x32xbf16>
    %49 = vector.extract_strided_slice %43 {offsets = [0, 64], sizes = [16, 32], strides = [1, 1]} : vector<16x96xf32> to vector<16x32xf32>
    %50 = arith.truncf %49 : vector<16x32xf32> to vector<16x32xbf16>
    %51 = vector.extract_strided_slice %46 {offsets = [0, 0], sizes = [8, 32], strides = [1, 1]} : vector<16x32xf32> to vector<8x32xf32>
    %52 = vector.extract_strided_slice %48 {offsets = [0, 0], sizes = [8, 32], strides = [1, 1]} : vector<16x32xbf16> to vector<8x32xbf16>
    %53 = vector.extract_strided_slice %50 {offsets = [0, 0], sizes = [8, 32], strides = [1, 1]} : vector<16x32xbf16> to vector<8x32xbf16>
    %54 = vector.extract_strided_slice %51 {offsets = [0, 0], sizes = [8, 8], strides = [1, 1]} : vector<8x32xf32> to vector<8x8xf32>
    %55 = vector.extract_strided_slice %52 {offsets = [0, 0], sizes = [8, 8], strides = [1, 1]} : vector<8x32xbf16> to vector<8x8xbf16>
    %56 = vector.extract_strided_slice %53 {offsets = [0, 0], sizes = [8, 8], strides = [1, 1]} : vector<8x32xbf16> to vector<8x8xbf16>
    %57 = vector.extract_strided_slice %6 {offsets = [0, 0], sizes = [1, 8], strides = [1, 1]} : vector<2x128xf32> to vector<1x8xf32>
    %58 = vector.extract_strided_slice %6 {offsets = [0, 32], sizes = [1, 8], strides = [1, 1]} : vector<2x128xf32> to vector<1x8xf32>
    %59 = arith.truncf %54 : vector<8x8xf32> to vector<8x8xbf16>
    %cst_30 = arith.constant dense<0.000000e+00> : vector<8x8xf32>
    %60 = tpu.matmul %59, %55, %cst_30 {dimension_numbers = #tpu.dot_dimension_numbers<[1], [1], [0], [0], [0, 0, 1, 0], [], []>} : vector<8x8xbf16>, vector<8x8xbf16>, vector<8x8xf32> -> vector<8x8xf32>
    %61 = arith.addf %60, %7 : vector<8x8xf32>
    %62 = vector.broadcast %57 : vector<1x8xf32> to vector<8x8xf32>
    %63 = arith.mulf %54, %62 : vector<8x8xf32>
    %cst_31 = arith.constant dense<0.000000e+00> : vector<8xf32>
    %64 = vector.multi_reduction <add>, %63, %cst_31 [1] : vector<8x8xf32> to vector<8xf32>
    %65 = vector.shape_cast %64 : vector<8xf32> to vector<8x1xf32>
    %66 = arith.addf %65, %9 : vector<8x1xf32>
    %cst_32 = arith.constant dense<0xFF800000> : vector<8xf32>
    %67 = vector.multi_reduction <maximumf>, %61, %cst_32 [1] : vector<8x8xf32> to vector<8xf32>
    %68 = vector.shape_cast %67 : vector<8xf32> to vector<8x1xf32>
    %69 = arith.maximumf %68, %66 : vector<8x1xf32>
    %70 = vector.broadcast %69 : vector<8x1xf32> to vector<8x8xf32>
    %71 = arith.subf %61, %70 : vector<8x8xf32>
    %72 = math.exp %71 : vector<8x8xf32>
    %73 = arith.subf %66, %69 : vector<8x1xf32>
    %74 = math.exp %73 : vector<8x1xf32>
    %cst_33 = arith.constant dense<0.000000e+00> : vector<8xf32>
    %75 = vector.multi_reduction <add>, %72, %cst_33 [1] : vector<8x8xf32> to vector<8xf32>
    %76 = vector.shape_cast %75 : vector<8xf32> to vector<8x1xf32>
    %77 = arith.addf %76, %74 : vector<8x1xf32>
    %78 = tpu.reciprocal %77 {approx = true} : vector<8x1xf32> -> vector<8x1xf32>
    %79 = arith.truncf %72 : vector<8x8xf32> to vector<8x8xbf16>
    %cst_34 = arith.constant dense<0.000000e+00> : vector<8x8xf32>
    %80 = tpu.matmul %79, %56, %cst_34 {dimension_numbers = #tpu.dot_dimension_numbers<[1], [0], [0], [1], [0, 0, 1, 1], [], []>} : vector<8x8xbf16>, vector<8x8xbf16>, vector<8x8xf32> -> vector<8x8xf32>
    %81 = vector.broadcast %74 : vector<8x1xf32> to vector<8x8xf32>
    %82 = vector.broadcast %58 : vector<1x8xf32> to vector<8x8xf32>
    %83 = arith.mulf %81, %82 : vector<8x8xf32>
    %84 = arith.addf %80, %83 : vector<8x8xf32>
    %85 = vector.broadcast %78 : vector<8x1xf32> to vector<8x8xf32>
    %86 = arith.mulf %84, %85 : vector<8x8xf32>
    %87 = vector.extract_strided_slice %51 {offsets = [0, 8], sizes = [8, 8], strides = [1, 1]} : vector<8x32xf32> to vector<8x8xf32>
    %88 = vector.extract_strided_slice %52 {offsets = [0, 8], sizes = [8, 8], strides = [1, 1]} : vector<8x32xbf16> to vector<8x8xbf16>
    %89 = vector.extract_strided_slice %53 {offsets = [0, 8], sizes = [8, 8], strides = [1, 1]} : vector<8x32xbf16> to vector<8x8xbf16>
    %90 = vector.extract_strided_slice %6 {offsets = [0, 8], sizes = [1, 8], strides = [1, 1]} : vector<2x128xf32> to vector<1x8xf32>
    %91 = vector.extract_strided_slice %6 {offsets = [0, 40], sizes = [1, 8], strides = [1, 1]} : vector<2x128xf32> to vector<1x8xf32>
    %92 = arith.truncf %87 : vector<8x8xf32> to vector<8x8xbf16>
    %cst_35 = arith.constant dense<0.000000e+00> : vector<8x8xf32>
    %93 = tpu.matmul %92, %88, %cst_35 {dimension_numbers = #tpu.dot_dimension_numbers<[1], [1], [0], [0], [0, 0, 1, 0], [], []>} : vector<8x8xbf16>, vector<8x8xbf16>, vector<8x8xf32> -> vector<8x8xf32>
    %94 = arith.addf %93, %7 : vector<8x8xf32>
    %95 = vector.broadcast %90 : vector<1x8xf32> to vector<8x8xf32>
    %96 = arith.mulf %87, %95 : vector<8x8xf32>
    %cst_36 = arith.constant dense<0.000000e+00> : vector<8xf32>
    %97 = vector.multi_reduction <add>, %96, %cst_36 [1] : vector<8x8xf32> to vector<8xf32>
    %98 = vector.shape_cast %97 : vector<8xf32> to vector<8x1xf32>
    %99 = arith.addf %98, %9 : vector<8x1xf32>
    %cst_37 = arith.constant dense<0xFF800000> : vector<8xf32>
    %100 = vector.multi_reduction <maximumf>, %94, %cst_37 [1] : vector<8x8xf32> to vector<8xf32>
    %101 = vector.shape_cast %100 : vector<8xf32> to vector<8x1xf32>
    %102 = arith.maximumf %101, %99 : vector<8x1xf32>
    %103 = vector.broadcast %102 : vector<8x1xf32> to vector<8x8xf32>
    %104 = arith.subf %94, %103 : vector<8x8xf32>
    %105 = math.exp %104 : vector<8x8xf32>
    %106 = arith.subf %99, %102 : vector<8x1xf32>
    %107 = math.exp %106 : vector<8x1xf32>
    %cst_38 = arith.constant dense<0.000000e+00> : vector<8xf32>
    %108 = vector.multi_reduction <add>, %105, %cst_38 [1] : vector<8x8xf32> to vector<8xf32>
    %109 = vector.shape_cast %108 : vector<8xf32> to vector<8x1xf32>
    %110 = arith.addf %109, %107 : vector<8x1xf32>
    %111 = tpu.reciprocal %110 {approx = true} : vector<8x1xf32> -> vector<8x1xf32>
    %112 = arith.truncf %105 : vector<8x8xf32> to vector<8x8xbf16>
    %cst_39 = arith.constant dense<0.000000e+00> : vector<8x8xf32>
    %113 = tpu.matmul %112, %89, %cst_39 {dimension_numbers = #tpu.dot_dimension_numbers<[1], [0], [0], [1], [0, 0, 1, 1], [], []>} : vector<8x8xbf16>, vector<8x8xbf16>, vector<8x8xf32> -> vector<8x8xf32>
    %114 = vector.broadcast %107 : vector<8x1xf32> to vector<8x8xf32>
    %115 = vector.broadcast %91 : vector<1x8xf32> to vector<8x8xf32>
    %116 = arith.mulf %114, %115 : vector<8x8xf32>
    %117 = arith.addf %113, %116 : vector<8x8xf32>
    %118 = vector.broadcast %111 : vector<8x1xf32> to vector<8x8xf32>
    %119 = arith.mulf %117, %118 : vector<8x8xf32>
    %120 = vector.extract_strided_slice %51 {offsets = [0, 16], sizes = [8, 8], strides = [1, 1]} : vector<8x32xf32> to vector<8x8xf32>
    %121 = vector.extract_strided_slice %52 {offsets = [0, 16], sizes = [8, 8], strides = [1, 1]} : vector<8x32xbf16> to vector<8x8xbf16>
    %122 = vector.extract_strided_slice %53 {offsets = [0, 16], sizes = [8, 8], strides = [1, 1]} : vector<8x32xbf16> to vector<8x8xbf16>
    %123 = vector.extract_strided_slice %6 {offsets = [0, 16], sizes = [1, 8], strides = [1, 1]} : vector<2x128xf32> to vector<1x8xf32>
    %124 = vector.extract_strided_slice %6 {offsets = [0, 48], sizes = [1, 8], strides = [1, 1]} : vector<2x128xf32> to vector<1x8xf32>
    %125 = arith.truncf %120 : vector<8x8xf32> to vector<8x8xbf16>
    %cst_40 = arith.constant dense<0.000000e+00> : vector<8x8xf32>
    %126 = tpu.matmul %125, %121, %cst_40 {dimension_numbers = #tpu.dot_dimension_numbers<[1], [1], [0], [0], [0, 0, 1, 0], [], []>} : vector<8x8xbf16>, vector<8x8xbf16>, vector<8x8xf32> -> vector<8x8xf32>
    %127 = arith.addf %126, %7 : vector<8x8xf32>
    %128 = vector.broadcast %123 : vector<1x8xf32> to vector<8x8xf32>
    %129 = arith.mulf %120, %128 : vector<8x8xf32>
    %cst_41 = arith.constant dense<0.000000e+00> : vector<8xf32>
    %130 = vector.multi_reduction <add>, %129, %cst_41 [1] : vector<8x8xf32> to vector<8xf32>
    %131 = vector.shape_cast %130 : vector<8xf32> to vector<8x1xf32>
    %132 = arith.addf %131, %9 : vector<8x1xf32>
    %cst_42 = arith.constant dense<0xFF800000> : vector<8xf32>
    %133 = vector.multi_reduction <maximumf>, %127, %cst_42 [1] : vector<8x8xf32> to vector<8xf32>
    %134 = vector.shape_cast %133 : vector<8xf32> to vector<8x1xf32>
    %135 = arith.maximumf %134, %132 : vector<8x1xf32>
    %136 = vector.broadcast %135 : vector<8x1xf32> to vector<8x8xf32>
    %137 = arith.subf %127, %136 : vector<8x8xf32>
    %138 = math.exp %137 : vector<8x8xf32>
    %139 = arith.subf %132, %135 : vector<8x1xf32>
    %140 = math.exp %139 : vector<8x1xf32>
    %cst_43 = arith.constant dense<0.000000e+00> : vector<8xf32>
    %141 = vector.multi_reduction <add>, %138, %cst_43 [1] : vector<8x8xf32> to vector<8xf32>
    %142 = vector.shape_cast %141 : vector<8xf32> to vector<8x1xf32>
    %143 = arith.addf %142, %140 : vector<8x1xf32>
    %144 = tpu.reciprocal %143 {approx = true} : vector<8x1xf32> -> vector<8x1xf32>
    %145 = arith.truncf %138 : vector<8x8xf32> to vector<8x8xbf16>
    %cst_44 = arith.constant dense<0.000000e+00> : vector<8x8xf32>
    %146 = tpu.matmul %145, %122, %cst_44 {dimension_numbers = #tpu.dot_dimension_numbers<[1], [0], [0], [1], [0, 0, 1, 1], [], []>} : vector<8x8xbf16>, vector<8x8xbf16>, vector<8x8xf32> -> vector<8x8xf32>
    %147 = vector.broadcast %140 : vector<8x1xf32> to vector<8x8xf32>
    %148 = vector.broadcast %124 : vector<1x8xf32> to vector<8x8xf32>
    %149 = arith.mulf %147, %148 : vector<8x8xf32>
    %150 = arith.addf %146, %149 : vector<8x8xf32>
    %151 = vector.broadcast %144 : vector<8x1xf32> to vector<8x8xf32>
    %152 = arith.mulf %150, %151 : vector<8x8xf32>
    %153 = vector.extract_strided_slice %51 {offsets = [0, 24], sizes = [8, 8], strides = [1, 1]} : vector<8x32xf32> to vector<8x8xf32>
    %154 = vector.extract_strided_slice %52 {offsets = [0, 24], sizes = [8, 8], strides = [1, 1]} : vector<8x32xbf16> to vector<8x8xbf16>
    %155 = vector.extract_strided_slice %53 {offsets = [0, 24], sizes = [8, 8], strides = [1, 1]} : vector<8x32xbf16> to vector<8x8xbf16>
    %156 = vector.extract_strided_slice %6 {offsets = [0, 24], sizes = [1, 8], strides = [1, 1]} : vector<2x128xf32> to vector<1x8xf32>
    %157 = vector.extract_strided_slice %6 {offsets = [0, 56], sizes = [1, 8], strides = [1, 1]} : vector<2x128xf32> to vector<1x8xf32>
    %158 = arith.truncf %153 : vector<8x8xf32> to vector<8x8xbf16>
    %cst_45 = arith.constant dense<0.000000e+00> : vector<8x8xf32>
    %159 = tpu.matmul %158, %154, %cst_45 {dimension_numbers = #tpu.dot_dimension_numbers<[1], [1], [0], [0], [0, 0, 1, 0], [], []>} : vector<8x8xbf16>, vector<8x8xbf16>, vector<8x8xf32> -> vector<8x8xf32>
    %160 = arith.addf %159, %7 : vector<8x8xf32>
    %161 = vector.broadcast %156 : vector<1x8xf32> to vector<8x8xf32>
    %162 = arith.mulf %153, %161 : vector<8x8xf32>
    %cst_46 = arith.constant dense<0.000000e+00> : vector<8xf32>
    %163 = vector.multi_reduction <add>, %162, %cst_46 [1] : vector<8x8xf32> to vector<8xf32>
    %164 = vector.shape_cast %163 : vector<8xf32> to vector<8x1xf32>
    %165 = arith.addf %164, %9 : vector<8x1xf32>
    %cst_47 = arith.constant dense<0xFF800000> : vector<8xf32>
    %166 = vector.multi_reduction <maximumf>, %160, %cst_47 [1] : vector<8x8xf32> to vector<8xf32>
    %167 = vector.shape_cast %166 : vector<8xf32> to vector<8x1xf32>
    %168 = arith.maximumf %167, %165 : vector<8x1xf32>
    %169 = vector.broadcast %168 : vector<8x1xf32> to vector<8x8xf32>
    %170 = arith.subf %160, %169 : vector<8x8xf32>
    %171 = math.exp %170 : vector<8x8xf32>
    %172 = arith.subf %165, %168 : vector<8x1xf32>
    %173 = math.exp %172 : vector<8x1xf32>
    %cst_48 = arith.constant dense<0.000000e+00> : vector<8xf32>
    %174 = vector.multi_reduction <add>, %171, %cst_48 [1] : vector<8x8xf32> to vector<8xf32>
    %175 = vector.shape_cast %174 : vector<8xf32> to vector<8x1xf32>
    %176 = arith.addf %175, %173 : vector<8x1xf32>
    %177 = tpu.reciprocal %176 {approx = true} : vector<8x1xf32> -> vector<8x1xf32>
    %178 = arith.truncf %171 : vector<8x8xf32> to vector<8x8xbf16>
    %cst_49 = arith.constant dense<0.000000e+00> : vector<8x8xf32>
    %179 = tpu.matmul %178, %155, %cst_49 {dimension_numbers = #tpu.dot_dimension_numbers<[1], [0], [0], [1], [0, 0, 1, 1], [], []>} : vector<8x8xbf16>, vector<8x8xbf16>, vector<8x8xf32> -> vector<8x8xf32>
    %180 = vector.broadcast %173 : vector<8x1xf32> to vector<8x8xf32>
    %181 = vector.broadcast %157 : vector<1x8xf32> to vector<8x8xf32>
    %182 = arith.mulf %180, %181 : vector<8x8xf32>
    %183 = arith.addf %179, %182 : vector<8x8xf32>
    %184 = vector.broadcast %177 : vector<8x1xf32> to vector<8x8xf32>
    %185 = arith.mulf %183, %184 : vector<8x8xf32>
    %186 = tpu.concatenate %86, %119, %152, %185 in 1 : vector<8x8xf32>, vector<8x8xf32>, vector<8x8xf32>, vector<8x8xf32> -> vector<8x32xf32>
    %187 = vector.extract_strided_slice %46 {offsets = [8, 0], sizes = [8, 32], strides = [1, 1]} : vector<16x32xf32> to vector<8x32xf32>
    %188 = vector.extract_strided_slice %48 {offsets = [8, 0], sizes = [8, 32], strides = [1, 1]} : vector<16x32xbf16> to vector<8x32xbf16>
    %189 = vector.extract_strided_slice %50 {offsets = [8, 0], sizes = [8, 32], strides = [1, 1]} : vector<16x32xbf16> to vector<8x32xbf16>
    %190 = vector.extract_strided_slice %187 {offsets = [0, 0], sizes = [8, 8], strides = [1, 1]} : vector<8x32xf32> to vector<8x8xf32>
    %191 = vector.extract_strided_slice %188 {offsets = [0, 0], sizes = [8, 8], strides = [1, 1]} : vector<8x32xbf16> to vector<8x8xbf16>
    %192 = vector.extract_strided_slice %189 {offsets = [0, 0], sizes = [8, 8], strides = [1, 1]} : vector<8x32xbf16> to vector<8x8xbf16>
    %193 = vector.extract_strided_slice %6 {offsets = [1, 0], sizes = [1, 8], strides = [1, 1]} : vector<2x128xf32> to vector<1x8xf32>
    %194 = vector.extract_strided_slice %6 {offsets = [1, 32], sizes = [1, 8], strides = [1, 1]} : vector<2x128xf32> to vector<1x8xf32>
    %195 = arith.truncf %190 : vector<8x8xf32> to vector<8x8xbf16>
    %cst_50 = arith.constant dense<0.000000e+00> : vector<8x8xf32>
    %196 = tpu.matmul %195, %191, %cst_50 {dimension_numbers = #tpu.dot_dimension_numbers<[1], [1], [0], [0], [0, 0, 1, 0], [], []>} : vector<8x8xbf16>, vector<8x8xbf16>, vector<8x8xf32> -> vector<8x8xf32>
    %197 = arith.addf %196, %8 : vector<8x8xf32>
    %198 = vector.broadcast %193 : vector<1x8xf32> to vector<8x8xf32>
    %199 = arith.mulf %190, %198 : vector<8x8xf32>
    %cst_51 = arith.constant dense<0.000000e+00> : vector<8xf32>
    %200 = vector.multi_reduction <add>, %199, %cst_51 [1] : vector<8x8xf32> to vector<8xf32>
    %201 = vector.shape_cast %200 : vector<8xf32> to vector<8x1xf32>
    %202 = arith.addf %201, %10 : vector<8x1xf32>
    %cst_52 = arith.constant dense<0xFF800000> : vector<8xf32>
    %203 = vector.multi_reduction <maximumf>, %197, %cst_52 [1] : vector<8x8xf32> to vector<8xf32>
    %204 = vector.shape_cast %203 : vector<8xf32> to vector<8x1xf32>
    %205 = arith.maximumf %204, %202 : vector<8x1xf32>
    %206 = vector.broadcast %205 : vector<8x1xf32> to vector<8x8xf32>
    %207 = arith.subf %197, %206 : vector<8x8xf32>
    %208 = math.exp %207 : vector<8x8xf32>
    %209 = arith.subf %202, %205 : vector<8x1xf32>
    %210 = math.exp %209 : vector<8x1xf32>
    %cst_53 = arith.constant dense<0.000000e+00> : vector<8xf32>
    %211 = vector.multi_reduction <add>, %208, %cst_53 [1] : vector<8x8xf32> to vector<8xf32>
    %212 = vector.shape_cast %211 : vector<8xf32> to vector<8x1xf32>
    %213 = arith.addf %212, %210 : vector<8x1xf32>
    %214 = tpu.reciprocal %213 {approx = true} : vector<8x1xf32> -> vector<8x1xf32>
    %215 = arith.truncf %208 : vector<8x8xf32> to vector<8x8xbf16>
    %cst_54 = arith.constant dense<0.000000e+00> : vector<8x8xf32>
    %216 = tpu.matmul %215, %192, %cst_54 {dimension_numbers = #tpu.dot_dimension_numbers<[1], [0], [0], [1], [0, 0, 1, 1], [], []>} : vector<8x8xbf16>, vector<8x8xbf16>, vector<8x8xf32> -> vector<8x8xf32>
    %217 = vector.broadcast %210 : vector<8x1xf32> to vector<8x8xf32>
    %218 = vector.broadcast %194 : vector<1x8xf32> to vector<8x8xf32>
    %219 = arith.mulf %217, %218 : vector<8x8xf32>
    %220 = arith.addf %216, %219 : vector<8x8xf32>
    %221 = vector.broadcast %214 : vector<8x1xf32> to vector<8x8xf32>
    %222 = arith.mulf %220, %221 : vector<8x8xf32>
    %223 = vector.extract_strided_slice %187 {offsets = [0, 8], sizes = [8, 8], strides = [1, 1]} : vector<8x32xf32> to vector<8x8xf32>
    %224 = vector.extract_strided_slice %188 {offsets = [0, 8], sizes = [8, 8], strides = [1, 1]} : vector<8x32xbf16> to vector<8x8xbf16>
    %225 = vector.extract_strided_slice %189 {offsets = [0, 8], sizes = [8, 8], strides = [1, 1]} : vector<8x32xbf16> to vector<8x8xbf16>
    %226 = vector.extract_strided_slice %6 {offsets = [1, 8], sizes = [1, 8], strides = [1, 1]} : vector<2x128xf32> to vector<1x8xf32>
    %227 = vector.extract_strided_slice %6 {offsets = [1, 40], sizes = [1, 8], strides = [1, 1]} : vector<2x128xf32> to vector<1x8xf32>
    %228 = arith.truncf %223 : vector<8x8xf32> to vector<8x8xbf16>
    %cst_55 = arith.constant dense<0.000000e+00> : vector<8x8xf32>
    %229 = tpu.matmul %228, %224, %cst_55 {dimension_numbers = #tpu.dot_dimension_numbers<[1], [1], [0], [0], [0, 0, 1, 0], [], []>} : vector<8x8xbf16>, vector<8x8xbf16>, vector<8x8xf32> -> vector<8x8xf32>
    %230 = arith.addf %229, %8 : vector<8x8xf32>
    %231 = vector.broadcast %226 : vector<1x8xf32> to vector<8x8xf32>
    %232 = arith.mulf %223, %231 : vector<8x8xf32>
    %cst_56 = arith.constant dense<0.000000e+00> : vector<8xf32>
    %233 = vector.multi_reduction <add>, %232, %cst_56 [1] : vector<8x8xf32> to vector<8xf32>
    %234 = vector.shape_cast %233 : vector<8xf32> to vector<8x1xf32>
    %235 = arith.addf %234, %10 : vector<8x1xf32>
    %cst_57 = arith.constant dense<0xFF800000> : vector<8xf32>
    %236 = vector.multi_reduction <maximumf>, %230, %cst_57 [1] : vector<8x8xf32> to vector<8xf32>
    %237 = vector.shape_cast %236 : vector<8xf32> to vector<8x1xf32>
    %238 = arith.maximumf %237, %235 : vector<8x1xf32>
    %239 = vector.broadcast %238 : vector<8x1xf32> to vector<8x8xf32>
    %240 = arith.subf %230, %239 : vector<8x8xf32>
    %241 = math.exp %240 : vector<8x8xf32>
    %242 = arith.subf %235, %238 : vector<8x1xf32>
    %243 = math.exp %242 : vector<8x1xf32>
    %cst_58 = arith.constant dense<0.000000e+00> : vector<8xf32>
    %244 = vector.multi_reduction <add>, %241, %cst_58 [1] : vector<8x8xf32> to vector<8xf32>
    %245 = vector.shape_cast %244 : vector<8xf32> to vector<8x1xf32>
    %246 = arith.addf %245, %243 : vector<8x1xf32>
    %247 = tpu.reciprocal %246 {approx = true} : vector<8x1xf32> -> vector<8x1xf32>
    %248 = arith.truncf %241 : vector<8x8xf32> to vector<8x8xbf16>
    %cst_59 = arith.constant dense<0.000000e+00> : vector<8x8xf32>
    %249 = tpu.matmul %248, %225, %cst_59 {dimension_numbers = #tpu.dot_dimension_numbers<[1], [0], [0], [1], [0, 0, 1, 1], [], []>} : vector<8x8xbf16>, vector<8x8xbf16>, vector<8x8xf32> -> vector<8x8xf32>
    %250 = vector.broadcast %243 : vector<8x1xf32> to vector<8x8xf32>
    %251 = vector.broadcast %227 : vector<1x8xf32> to vector<8x8xf32>
    %252 = arith.mulf %250, %251 : vector<8x8xf32>
    %253 = arith.addf %249, %252 : vector<8x8xf32>
    %254 = vector.broadcast %247 : vector<8x1xf32> to vector<8x8xf32>
    %255 = arith.mulf %253, %254 : vector<8x8xf32>
    %256 = vector.extract_strided_slice %187 {offsets = [0, 16], sizes = [8, 8], strides = [1, 1]} : vector<8x32xf32> to vector<8x8xf32>
    %257 = vector.extract_strided_slice %188 {offsets = [0, 16], sizes = [8, 8], strides = [1, 1]} : vector<8x32xbf16> to vector<8x8xbf16>
    %258 = vector.extract_strided_slice %189 {offsets = [0, 16], sizes = [8, 8], strides = [1, 1]} : vector<8x32xbf16> to vector<8x8xbf16>
    %259 = vector.extract_strided_slice %6 {offsets = [1, 16], sizes = [1, 8], strides = [1, 1]} : vector<2x128xf32> to vector<1x8xf32>
    %260 = vector.extract_strided_slice %6 {offsets = [1, 48], sizes = [1, 8], strides = [1, 1]} : vector<2x128xf32> to vector<1x8xf32>
    %261 = arith.truncf %256 : vector<8x8xf32> to vector<8x8xbf16>
    %cst_60 = arith.constant dense<0.000000e+00> : vector<8x8xf32>
    %262 = tpu.matmul %261, %257, %cst_60 {dimension_numbers = #tpu.dot_dimension_numbers<[1], [1], [0], [0], [0, 0, 1, 0], [], []>} : vector<8x8xbf16>, vector<8x8xbf16>, vector<8x8xf32> -> vector<8x8xf32>
    %263 = arith.addf %262, %8 : vector<8x8xf32>
    %264 = vector.broadcast %259 : vector<1x8xf32> to vector<8x8xf32>
    %265 = arith.mulf %256, %264 : vector<8x8xf32>
    %cst_61 = arith.constant dense<0.000000e+00> : vector<8xf32>
    %266 = vector.multi_reduction <add>, %265, %cst_61 [1] : vector<8x8xf32> to vector<8xf32>
    %267 = vector.shape_cast %266 : vector<8xf32> to vector<8x1xf32>
    %268 = arith.addf %267, %10 : vector<8x1xf32>
    %cst_62 = arith.constant dense<0xFF800000> : vector<8xf32>
    %269 = vector.multi_reduction <maximumf>, %263, %cst_62 [1] : vector<8x8xf32> to vector<8xf32>
    %270 = vector.shape_cast %269 : vector<8xf32> to vector<8x1xf32>
    %271 = arith.maximumf %270, %268 : vector<8x1xf32>
    %272 = vector.broadcast %271 : vector<8x1xf32> to vector<8x8xf32>
    %273 = arith.subf %263, %272 : vector<8x8xf32>
    %274 = math.exp %273 : vector<8x8xf32>
    %275 = arith.subf %268, %271 : vector<8x1xf32>
    %276 = math.exp %275 : vector<8x1xf32>
    %cst_63 = arith.constant dense<0.000000e+00> : vector<8xf32>
    %277 = vector.multi_reduction <add>, %274, %cst_63 [1] : vector<8x8xf32> to vector<8xf32>
    %278 = vector.shape_cast %277 : vector<8xf32> to vector<8x1xf32>
    %279 = arith.addf %278, %276 : vector<8x1xf32>
    %280 = tpu.reciprocal %279 {approx = true} : vector<8x1xf32> -> vector<8x1xf32>
    %281 = arith.truncf %274 : vector<8x8xf32> to vector<8x8xbf16>
    %cst_64 = arith.constant dense<0.000000e+00> : vector<8x8xf32>
    %282 = tpu.matmul %281, %258, %cst_64 {dimension_numbers = #tpu.dot_dimension_numbers<[1], [0], [0], [1], [0, 0, 1, 1], [], []>} : vector<8x8xbf16>, vector<8x8xbf16>, vector<8x8xf32> -> vector<8x8xf32>
    %283 = vector.broadcast %276 : vector<8x1xf32> to vector<8x8xf32>
    %284 = vector.broadcast %260 : vector<1x8xf32> to vector<8x8xf32>
    %285 = arith.mulf %283, %284 : vector<8x8xf32>
    %286 = arith.addf %282, %285 : vector<8x8xf32>
    %287 = vector.broadcast %280 : vector<8x1xf32> to vector<8x8xf32>
    %288 = arith.mulf %286, %287 : vector<8x8xf32>
    %289 = vector.extract_strided_slice %187 {offsets = [0, 24], sizes = [8, 8], strides = [1, 1]} : vector<8x32xf32> to vector<8x8xf32>
    %290 = vector.extract_strided_slice %188 {offsets = [0, 24], sizes = [8, 8], strides = [1, 1]} : vector<8x32xbf16> to vector<8x8xbf16>
    %291 = vector.extract_strided_slice %189 {offsets = [0, 24], sizes = [8, 8], strides = [1, 1]} : vector<8x32xbf16> to vector<8x8xbf16>
    %292 = vector.extract_strided_slice %6 {offsets = [1, 24], sizes = [1, 8], strides = [1, 1]} : vector<2x128xf32> to vector<1x8xf32>
    %293 = vector.extract_strided_slice %6 {offsets = [1, 56], sizes = [1, 8], strides = [1, 1]} : vector<2x128xf32> to vector<1x8xf32>
    %294 = arith.truncf %289 : vector<8x8xf32> to vector<8x8xbf16>
    %cst_65 = arith.constant dense<0.000000e+00> : vector<8x8xf32>
    %295 = tpu.matmul %294, %290, %cst_65 {dimension_numbers = #tpu.dot_dimension_numbers<[1], [1], [0], [0], [0, 0, 1, 0], [], []>} : vector<8x8xbf16>, vector<8x8xbf16>, vector<8x8xf32> -> vector<8x8xf32>
    %296 = arith.addf %295, %8 : vector<8x8xf32>
    %297 = vector.broadcast %292 : vector<1x8xf32> to vector<8x8xf32>
    %298 = arith.mulf %289, %297 : vector<8x8xf32>
    %cst_66 = arith.constant dense<0.000000e+00> : vector<8xf32>
    %299 = vector.multi_reduction <add>, %298, %cst_66 [1] : vector<8x8xf32> to vector<8xf32>
    %300 = vector.shape_cast %299 : vector<8xf32> to vector<8x1xf32>
    %301 = arith.addf %300, %10 : vector<8x1xf32>
    %cst_67 = arith.constant dense<0xFF800000> : vector<8xf32>
    %302 = vector.multi_reduction <maximumf>, %296, %cst_67 [1] : vector<8x8xf32> to vector<8xf32>
    %303 = vector.shape_cast %302 : vector<8xf32> to vector<8x1xf32>
    %304 = arith.maximumf %303, %301 : vector<8x1xf32>
    %305 = vector.broadcast %304 : vector<8x1xf32> to vector<8x8xf32>
    %306 = arith.subf %296, %305 : vector<8x8xf32>
    %307 = math.exp %306 : vector<8x8xf32>
    %308 = arith.subf %301, %304 : vector<8x1xf32>
    %309 = math.exp %308 : vector<8x1xf32>
    %cst_68 = arith.constant dense<0.000000e+00> : vector<8xf32>
    %310 = vector.multi_reduction <add>, %307, %cst_68 [1] : vector<8x8xf32> to vector<8xf32>
    %311 = vector.shape_cast %310 : vector<8xf32> to vector<8x1xf32>
    %312 = arith.addf %311, %309 : vector<8x1xf32>
    %313 = tpu.reciprocal %312 {approx = true} : vector<8x1xf32> -> vector<8x1xf32>
    %314 = arith.truncf %307 : vector<8x8xf32> to vector<8x8xbf16>
    %cst_69 = arith.constant dense<0.000000e+00> : vector<8x8xf32>
    %315 = tpu.matmul %314, %291, %cst_69 {dimension_numbers = #tpu.dot_dimension_numbers<[1], [0], [0], [1], [0, 0, 1, 1], [], []>} : vector<8x8xbf16>, vector<8x8xbf16>, vector<8x8xf32> -> vector<8x8xf32>
    %316 = vector.broadcast %309 : vector<8x1xf32> to vector<8x8xf32>
    %317 = vector.broadcast %293 : vector<1x8xf32> to vector<8x8xf32>
    %318 = arith.mulf %316, %317 : vector<8x8xf32>
    %319 = arith.addf %315, %318 : vector<8x8xf32>
    %320 = vector.broadcast %313 : vector<8x1xf32> to vector<8x8xf32>
    %321 = arith.mulf %319, %320 : vector<8x8xf32>
    %322 = tpu.concatenate %222, %255, %288, %321 in 1 : vector<8x8xf32>, vector<8x8xf32>, vector<8x8xf32>, vector<8x8xf32> -> vector<8x32xf32>
    %323 = tpu.concatenate %186, %322 in 0 : vector<8x32xf32>, vector<8x32xf32> -> vector<16x32xf32>
    %c0_70 = arith.constant 0 : index
    %c0_71 = arith.constant 0 : index
    %c0_72 = arith.constant 0 : index
    %324 = vector.load %arg9[%c0_70, %c0_71, %c0_72] : memref<2x32x32xbf16, #tpu.memory_space<vmem>>, vector<1x32x32xbf16>
    %325 = vector.shape_cast %324 : vector<1x32x32xbf16> to vector<32x32xbf16>
    %326 = arith.truncf %323 : vector<16x32xf32> to vector<16x32xbf16>
    %cst_73 = arith.constant dense<0.000000e+00> : vector<16x32xf32>
    %327 = tpu.matmul %326, %325, %cst_73 {dimension_numbers = #tpu.dot_dimension_numbers<[1], [0], [0], [1], [0, 0, 1, 1], [], []>} : vector<16x32xbf16>, vector<32x32xbf16>, vector<16x32xf32> -> vector<16x32xf32>
    %328 = arith.addf %11, %327 : vector<16x32xf32>
    %c0_74 = arith.constant 0 : index
    %c0_75 = arith.constant 0 : index
    %c0_76 = arith.constant 0 : index
    %329 = vector.load %arg10[%c0_74, %c0_75, %c0_76] : memref<2x1x32xf32, #tpu.memory_space<vmem>>, vector<1x1x32xf32>
    %330 = vector.shape_cast %329 : vector<1x1x32xf32> to vector<1x32xf32>
    %331 = vector.broadcast %330 : vector<1x32xf32> to vector<16x32xf32>
    %332 = arith.addf %328, %331 : vector<16x32xf32>
    %333 = vector.extract_strided_slice %13 {offsets = [2, 0], sizes = [1, 32], strides = [1, 1]} : vector<4x32xf32> to vector<1x32xf32>
    %334 = vector.extract_strided_slice %13 {offsets = [3, 0], sizes = [1, 32], strides = [1, 1]} : vector<4x32xf32> to vector<1x32xf32>
    %cst_77 = arith.constant dense<0.000000e+00> : vector<16xf32>
    %335 = vector.multi_reduction <add>, %332, %cst_77 [1] : vector<16x32xf32> to vector<16xf32>
    %336 = vector.shape_cast %335 : vector<16xf32> to vector<16x1xf32>
    %cst_78 = arith.constant 3.200000e+01 : f32
    %337 = vector.broadcast %cst_78 : f32 to vector<16x1xf32>
    %338 = arith.divf %336, %337 : vector<16x1xf32>
    %339 = vector.broadcast %338 : vector<16x1xf32> to vector<16x32xf32>
    %340 = arith.subf %332, %339 : vector<16x32xf32>
    %341 = arith.mulf %340, %340 : vector<16x32xf32>
    %cst_79 = arith.constant dense<0.000000e+00> : vector<16xf32>
    %342 = vector.multi_reduction <add>, %341, %cst_79 [1] : vector<16x32xf32> to vector<16xf32>
    %343 = vector.shape_cast %342 : vector<16xf32> to vector<16x1xf32>
    %cst_80 = arith.constant 3.200000e+01 : f32
    %344 = vector.broadcast %cst_80 : f32 to vector<16x1xf32>
    %345 = arith.divf %343, %344 : vector<16x1xf32>
    %cst_81 = arith.constant 9.99999974E-6 : f32
    %346 = vector.broadcast %cst_81 : f32 to vector<16x1xf32>
    %347 = arith.addf %345, %346 : vector<16x1xf32>
    %348 = math.rsqrt %347 : vector<16x1xf32>
    %349 = vector.broadcast %348 : vector<16x1xf32> to vector<16x32xf32>
    %350 = arith.mulf %340, %349 : vector<16x32xf32>
    %351 = vector.broadcast %333 : vector<1x32xf32> to vector<16x32xf32>
    %352 = arith.mulf %350, %351 : vector<16x32xf32>
    %353 = vector.broadcast %334 : vector<1x32xf32> to vector<16x32xf32>
    %354 = arith.addf %352, %353 : vector<16x32xf32>
    %c0_82 = arith.constant 0 : index
    %c0_83 = arith.constant 0 : index
    %c0_84 = arith.constant 0 : index
    %355 = vector.load %arg11[%c0_82, %c0_83, %c0_84] : memref<2x32x128xbf16, #tpu.memory_space<vmem>>, vector<1x32x128xbf16>
    %356 = vector.shape_cast %355 : vector<1x32x128xbf16> to vector<32x128xbf16>
    %357 = arith.truncf %354 : vector<16x32xf32> to vector<16x32xbf16>
    %cst_85 = arith.constant dense<0.000000e+00> : vector<16x128xf32>
    %358 = tpu.matmul %357, %356, %cst_85 {dimension_numbers = #tpu.dot_dimension_numbers<[1], [0], [0], [1], [0, 0, 1, 1], [], []>} : vector<16x32xbf16>, vector<32x128xbf16>, vector<16x128xf32> -> vector<16x128xf32>
    %c0_86 = arith.constant 0 : index
    %c0_87 = arith.constant 0 : index
    %c0_88 = arith.constant 0 : index
    %359 = vector.load %arg12[%c0_86, %c0_87, %c0_88] : memref<2x1x128xf32, #tpu.memory_space<vmem>>, vector<1x1x128xf32>
    %360 = vector.shape_cast %359 : vector<1x1x128xf32> to vector<1x128xf32>
    %361 = vector.broadcast %360 : vector<1x128xf32> to vector<16x128xf32>
    %362 = arith.addf %358, %361 : vector<16x128xf32>
    %cst_89 = arith.constant 5.000000e-01 : f32
    %363 = vector.broadcast %cst_89 : f32 to vector<16x128xf32>
    %364 = arith.mulf %363, %362 : vector<16x128xf32>
    %cst_90 = arith.constant 4.471500e-02 : f32
    %365 = vector.broadcast %cst_90 : f32 to vector<16x128xf32>
    %366 = arith.mulf %365, %362 : vector<16x128xf32>
    %367 = arith.mulf %366, %362 : vector<16x128xf32>
    %368 = arith.mulf %367, %362 : vector<16x128xf32>
    %369 = arith.addf %362, %368 : vector<16x128xf32>
    %cst_91 = arith.constant 0.797884583 : f32
    %370 = vector.broadcast %cst_91 : f32 to vector<16x128xf32>
    %371 = arith.mulf %370, %369 : vector<16x128xf32>
    %372 = math.tanh %371 : vector<16x128xf32>
    %cst_92 = arith.constant 1.000000e+00 : f32
    %373 = vector.broadcast %cst_92 : f32 to vector<16x128xf32>
    %374 = arith.addf %373, %372 : vector<16x128xf32>
    %375 = arith.mulf %364, %374 : vector<16x128xf32>
    %c0_93 = arith.constant 0 : index
    %c0_94 = arith.constant 0 : index
    %c0_95 = arith.constant 0 : index
    %376 = vector.load %arg13[%c0_93, %c0_94, %c0_95] : memref<2x128x32xbf16, #tpu.memory_space<vmem>>, vector<1x128x32xbf16>
    %377 = vector.shape_cast %376 : vector<1x128x32xbf16> to vector<128x32xbf16>
    %378 = arith.truncf %375 : vector<16x128xf32> to vector<16x128xbf16>
    %cst_96 = arith.constant dense<0.000000e+00> : vector<16x32xf32>
    %379 = tpu.matmul %378, %377, %cst_96 {dimension_numbers = #tpu.dot_dimension_numbers<[1], [0], [0], [1], [0, 0, 1, 1], [], []>} : vector<16x128xbf16>, vector<128x32xbf16>, vector<16x32xf32> -> vector<16x32xf32>
    %380 = arith.addf %332, %379 : vector<16x32xf32>
    %c0_97 = arith.constant 0 : index
    %c0_98 = arith.constant 0 : index
    %c0_99 = arith.constant 0 : index
    %381 = vector.load %arg14[%c0_97, %c0_98, %c0_99] : memref<2x1x32xf32, #tpu.memory_space<vmem>>, vector<1x1x32xf32>
    %382 = vector.shape_cast %381 : vector<1x1x32xf32> to vector<1x32xf32>
    %383 = vector.broadcast %382 : vector<1x32xf32> to vector<16x32xf32>
    %384 = arith.addf %380, %383 : vector<16x32xf32>
    %c1 = arith.constant 1 : index
    %c0_100 = arith.constant 0 : index
    %c0_101 = arith.constant 0 : index
    %385 = vector.load %arg6[%c1, %c0_100, %c0_101] : memref<2x4x32xf32, #tpu.memory_space<vmem>>, vector<1x4x32xf32>
    %386 = vector.shape_cast %385 : vector<1x4x32xf32> to vector<4x32xf32>
    %387 = vector.extract_strided_slice %386 {offsets = [0, 0], sizes = [1, 32], strides = [1, 1]} : vector<4x32xf32> to vector<1x32xf32>
    %388 = vector.extract_strided_slice %386 {offsets = [1, 0], sizes = [1, 32], strides = [1, 1]} : vector<4x32xf32> to vector<1x32xf32>
    %cst_102 = arith.constant dense<0.000000e+00> : vector<16xf32>
    %389 = vector.multi_reduction <add>, %384, %cst_102 [1] : vector<16x32xf32> to vector<16xf32>
    %390 = vector.shape_cast %389 : vector<16xf32> to vector<16x1xf32>
    %cst_103 = arith.constant 3.200000e+01 : f32
    %391 = vector.broadcast %cst_103 : f32 to vector<16x1xf32>
    %392 = arith.divf %390, %391 : vector<16x1xf32>
    %393 = vector.broadcast %392 : vector<16x1xf32> to vector<16x32xf32>
    %394 = arith.subf %384, %393 : vector<16x32xf32>
    %395 = arith.mulf %394, %394 : vector<16x32xf32>
    %cst_104 = arith.constant dense<0.000000e+00> : vector<16xf32>
    %396 = vector.multi_reduction <add>, %395, %cst_104 [1] : vector<16x32xf32> to vector<16xf32>
    %397 = vector.shape_cast %396 : vector<16xf32> to vector<16x1xf32>
    %cst_105 = arith.constant 3.200000e+01 : f32
    %398 = vector.broadcast %cst_105 : f32 to vector<16x1xf32>
    %399 = arith.divf %397, %398 : vector<16x1xf32>
    %cst_106 = arith.constant 9.99999974E-6 : f32
    %400 = vector.broadcast %cst_106 : f32 to vector<16x1xf32>
    %401 = arith.addf %399, %400 : vector<16x1xf32>
    %402 = math.rsqrt %401 : vector<16x1xf32>
    %403 = vector.broadcast %402 : vector<16x1xf32> to vector<16x32xf32>
    %404 = arith.mulf %394, %403 : vector<16x32xf32>
    %405 = vector.broadcast %387 : vector<1x32xf32> to vector<16x32xf32>
    %406 = arith.mulf %404, %405 : vector<16x32xf32>
    %407 = vector.broadcast %388 : vector<1x32xf32> to vector<16x32xf32>
    %408 = arith.addf %406, %407 : vector<16x32xf32>
    %c1_107 = arith.constant 1 : index
    %c0_108 = arith.constant 0 : index
    %c0_109 = arith.constant 0 : index
    %409 = vector.load %arg7[%c1_107, %c0_108, %c0_109] : memref<2x32x96xbf16, #tpu.memory_space<vmem>>, vector<1x32x96xbf16>
    %410 = vector.shape_cast %409 : vector<1x32x96xbf16> to vector<32x96xbf16>
    %411 = arith.truncf %408 : vector<16x32xf32> to vector<16x32xbf16>
    %cst_110 = arith.constant dense<0.000000e+00> : vector<16x96xf32>
    %412 = tpu.matmul %411, %410, %cst_110 {dimension_numbers = #tpu.dot_dimension_numbers<[1], [0], [0], [1], [0, 0, 1, 1], [], []>} : vector<16x32xbf16>, vector<32x96xbf16>, vector<16x96xf32> -> vector<16x96xf32>
    %c1_111 = arith.constant 1 : index
    %c0_112 = arith.constant 0 : index
    %c0_113 = arith.constant 0 : index
    %413 = vector.load %arg8[%c1_111, %c0_112, %c0_113] : memref<2x1x96xf32, #tpu.memory_space<vmem>>, vector<1x1x96xf32>
    %414 = vector.shape_cast %413 : vector<1x1x96xf32> to vector<1x96xf32>
    %415 = vector.broadcast %414 : vector<1x96xf32> to vector<16x96xf32>
    %416 = arith.addf %412, %415 : vector<16x96xf32>
    %417 = vector.extract_strided_slice %416 {offsets = [0, 0], sizes = [16, 32], strides = [1, 1]} : vector<16x96xf32> to vector<16x32xf32>
    %cst_114 = arith.constant 0.353553385 : f32
    %418 = vector.broadcast %cst_114 : f32 to vector<16x32xf32>
    %419 = arith.mulf %417, %418 : vector<16x32xf32>
    %420 = vector.extract_strided_slice %416 {offsets = [0, 32], sizes = [16, 32], strides = [1, 1]} : vector<16x96xf32> to vector<16x32xf32>
    %421 = arith.truncf %420 : vector<16x32xf32> to vector<16x32xbf16>
    %422 = vector.extract_strided_slice %416 {offsets = [0, 64], sizes = [16, 32], strides = [1, 1]} : vector<16x96xf32> to vector<16x32xf32>
    %423 = arith.truncf %422 : vector<16x32xf32> to vector<16x32xbf16>
    %424 = vector.extract_strided_slice %419 {offsets = [0, 0], sizes = [8, 32], strides = [1, 1]} : vector<16x32xf32> to vector<8x32xf32>
    %425 = vector.extract_strided_slice %421 {offsets = [0, 0], sizes = [8, 32], strides = [1, 1]} : vector<16x32xbf16> to vector<8x32xbf16>
    %426 = vector.extract_strided_slice %423 {offsets = [0, 0], sizes = [8, 32], strides = [1, 1]} : vector<16x32xbf16> to vector<8x32xbf16>
    %427 = vector.extract_strided_slice %424 {offsets = [0, 0], sizes = [8, 8], strides = [1, 1]} : vector<8x32xf32> to vector<8x8xf32>
    %428 = vector.extract_strided_slice %425 {offsets = [0, 0], sizes = [8, 8], strides = [1, 1]} : vector<8x32xbf16> to vector<8x8xbf16>
    %429 = vector.extract_strided_slice %426 {offsets = [0, 0], sizes = [8, 8], strides = [1, 1]} : vector<8x32xbf16> to vector<8x8xbf16>
    %430 = vector.extract_strided_slice %6 {offsets = [0, 64], sizes = [1, 8], strides = [1, 1]} : vector<2x128xf32> to vector<1x8xf32>
    %431 = vector.extract_strided_slice %6 {offsets = [0, 96], sizes = [1, 8], strides = [1, 1]} : vector<2x128xf32> to vector<1x8xf32>
    %432 = arith.truncf %427 : vector<8x8xf32> to vector<8x8xbf16>
    %cst_115 = arith.constant dense<0.000000e+00> : vector<8x8xf32>
    %433 = tpu.matmul %432, %428, %cst_115 {dimension_numbers = #tpu.dot_dimension_numbers<[1], [1], [0], [0], [0, 0, 1, 0], [], []>} : vector<8x8xbf16>, vector<8x8xbf16>, vector<8x8xf32> -> vector<8x8xf32>
    %434 = arith.addf %433, %7 : vector<8x8xf32>
    %435 = vector.broadcast %430 : vector<1x8xf32> to vector<8x8xf32>
    %436 = arith.mulf %427, %435 : vector<8x8xf32>
    %cst_116 = arith.constant dense<0.000000e+00> : vector<8xf32>
    %437 = vector.multi_reduction <add>, %436, %cst_116 [1] : vector<8x8xf32> to vector<8xf32>
    %438 = vector.shape_cast %437 : vector<8xf32> to vector<8x1xf32>
    %439 = arith.addf %438, %9 : vector<8x1xf32>
    %cst_117 = arith.constant dense<0xFF800000> : vector<8xf32>
    %440 = vector.multi_reduction <maximumf>, %434, %cst_117 [1] : vector<8x8xf32> to vector<8xf32>
    %441 = vector.shape_cast %440 : vector<8xf32> to vector<8x1xf32>
    %442 = arith.maximumf %441, %439 : vector<8x1xf32>
    %443 = vector.broadcast %442 : vector<8x1xf32> to vector<8x8xf32>
    %444 = arith.subf %434, %443 : vector<8x8xf32>
    %445 = math.exp %444 : vector<8x8xf32>
    %446 = arith.subf %439, %442 : vector<8x1xf32>
    %447 = math.exp %446 : vector<8x1xf32>
    %cst_118 = arith.constant dense<0.000000e+00> : vector<8xf32>
    %448 = vector.multi_reduction <add>, %445, %cst_118 [1] : vector<8x8xf32> to vector<8xf32>
    %449 = vector.shape_cast %448 : vector<8xf32> to vector<8x1xf32>
    %450 = arith.addf %449, %447 : vector<8x1xf32>
    %451 = tpu.reciprocal %450 {approx = true} : vector<8x1xf32> -> vector<8x1xf32>
    %452 = arith.truncf %445 : vector<8x8xf32> to vector<8x8xbf16>
    %cst_119 = arith.constant dense<0.000000e+00> : vector<8x8xf32>
    %453 = tpu.matmul %452, %429, %cst_119 {dimension_numbers = #tpu.dot_dimension_numbers<[1], [0], [0], [1], [0, 0, 1, 1], [], []>} : vector<8x8xbf16>, vector<8x8xbf16>, vector<8x8xf32> -> vector<8x8xf32>
    %454 = vector.broadcast %447 : vector<8x1xf32> to vector<8x8xf32>
    %455 = vector.broadcast %431 : vector<1x8xf32> to vector<8x8xf32>
    %456 = arith.mulf %454, %455 : vector<8x8xf32>
    %457 = arith.addf %453, %456 : vector<8x8xf32>
    %458 = vector.broadcast %451 : vector<8x1xf32> to vector<8x8xf32>
    %459 = arith.mulf %457, %458 : vector<8x8xf32>
    %460 = vector.extract_strided_slice %424 {offsets = [0, 8], sizes = [8, 8], strides = [1, 1]} : vector<8x32xf32> to vector<8x8xf32>
    %461 = vector.extract_strided_slice %425 {offsets = [0, 8], sizes = [8, 8], strides = [1, 1]} : vector<8x32xbf16> to vector<8x8xbf16>
    %462 = vector.extract_strided_slice %426 {offsets = [0, 8], sizes = [8, 8], strides = [1, 1]} : vector<8x32xbf16> to vector<8x8xbf16>
    %463 = vector.extract_strided_slice %6 {offsets = [0, 72], sizes = [1, 8], strides = [1, 1]} : vector<2x128xf32> to vector<1x8xf32>
    %464 = vector.extract_strided_slice %6 {offsets = [0, 104], sizes = [1, 8], strides = [1, 1]} : vector<2x128xf32> to vector<1x8xf32>
    %465 = arith.truncf %460 : vector<8x8xf32> to vector<8x8xbf16>
    %cst_120 = arith.constant dense<0.000000e+00> : vector<8x8xf32>
    %466 = tpu.matmul %465, %461, %cst_120 {dimension_numbers = #tpu.dot_dimension_numbers<[1], [1], [0], [0], [0, 0, 1, 0], [], []>} : vector<8x8xbf16>, vector<8x8xbf16>, vector<8x8xf32> -> vector<8x8xf32>
    %467 = arith.addf %466, %7 : vector<8x8xf32>
    %468 = vector.broadcast %463 : vector<1x8xf32> to vector<8x8xf32>
    %469 = arith.mulf %460, %468 : vector<8x8xf32>
    %cst_121 = arith.constant dense<0.000000e+00> : vector<8xf32>
    %470 = vector.multi_reduction <add>, %469, %cst_121 [1] : vector<8x8xf32> to vector<8xf32>
    %471 = vector.shape_cast %470 : vector<8xf32> to vector<8x1xf32>
    %472 = arith.addf %471, %9 : vector<8x1xf32>
    %cst_122 = arith.constant dense<0xFF800000> : vector<8xf32>
    %473 = vector.multi_reduction <maximumf>, %467, %cst_122 [1] : vector<8x8xf32> to vector<8xf32>
    %474 = vector.shape_cast %473 : vector<8xf32> to vector<8x1xf32>
    %475 = arith.maximumf %474, %472 : vector<8x1xf32>
    %476 = vector.broadcast %475 : vector<8x1xf32> to vector<8x8xf32>
    %477 = arith.subf %467, %476 : vector<8x8xf32>
    %478 = math.exp %477 : vector<8x8xf32>
    %479 = arith.subf %472, %475 : vector<8x1xf32>
    %480 = math.exp %479 : vector<8x1xf32>
    %cst_123 = arith.constant dense<0.000000e+00> : vector<8xf32>
    %481 = vector.multi_reduction <add>, %478, %cst_123 [1] : vector<8x8xf32> to vector<8xf32>
    %482 = vector.shape_cast %481 : vector<8xf32> to vector<8x1xf32>
    %483 = arith.addf %482, %480 : vector<8x1xf32>
    %484 = tpu.reciprocal %483 {approx = true} : vector<8x1xf32> -> vector<8x1xf32>
    %485 = arith.truncf %478 : vector<8x8xf32> to vector<8x8xbf16>
    %cst_124 = arith.constant dense<0.000000e+00> : vector<8x8xf32>
    %486 = tpu.matmul %485, %462, %cst_124 {dimension_numbers = #tpu.dot_dimension_numbers<[1], [0], [0], [1], [0, 0, 1, 1], [], []>} : vector<8x8xbf16>, vector<8x8xbf16>, vector<8x8xf32> -> vector<8x8xf32>
    %487 = vector.broadcast %480 : vector<8x1xf32> to vector<8x8xf32>
    %488 = vector.broadcast %464 : vector<1x8xf32> to vector<8x8xf32>
    %489 = arith.mulf %487, %488 : vector<8x8xf32>
    %490 = arith.addf %486, %489 : vector<8x8xf32>
    %491 = vector.broadcast %484 : vector<8x1xf32> to vector<8x8xf32>
    %492 = arith.mulf %490, %491 : vector<8x8xf32>
    %493 = vector.extract_strided_slice %424 {offsets = [0, 16], sizes = [8, 8], strides = [1, 1]} : vector<8x32xf32> to vector<8x8xf32>
    %494 = vector.extract_strided_slice %425 {offsets = [0, 16], sizes = [8, 8], strides = [1, 1]} : vector<8x32xbf16> to vector<8x8xbf16>
    %495 = vector.extract_strided_slice %426 {offsets = [0, 16], sizes = [8, 8], strides = [1, 1]} : vector<8x32xbf16> to vector<8x8xbf16>
    %496 = vector.extract_strided_slice %6 {offsets = [0, 80], sizes = [1, 8], strides = [1, 1]} : vector<2x128xf32> to vector<1x8xf32>
    %497 = vector.extract_strided_slice %6 {offsets = [0, 112], sizes = [1, 8], strides = [1, 1]} : vector<2x128xf32> to vector<1x8xf32>
    %498 = arith.truncf %493 : vector<8x8xf32> to vector<8x8xbf16>
    %cst_125 = arith.constant dense<0.000000e+00> : vector<8x8xf32>
    %499 = tpu.matmul %498, %494, %cst_125 {dimension_numbers = #tpu.dot_dimension_numbers<[1], [1], [0], [0], [0, 0, 1, 0], [], []>} : vector<8x8xbf16>, vector<8x8xbf16>, vector<8x8xf32> -> vector<8x8xf32>
    %500 = arith.addf %499, %7 : vector<8x8xf32>
    %501 = vector.broadcast %496 : vector<1x8xf32> to vector<8x8xf32>
    %502 = arith.mulf %493, %501 : vector<8x8xf32>
    %cst_126 = arith.constant dense<0.000000e+00> : vector<8xf32>
    %503 = vector.multi_reduction <add>, %502, %cst_126 [1] : vector<8x8xf32> to vector<8xf32>
    %504 = vector.shape_cast %503 : vector<8xf32> to vector<8x1xf32>
    %505 = arith.addf %504, %9 : vector<8x1xf32>
    %cst_127 = arith.constant dense<0xFF800000> : vector<8xf32>
    %506 = vector.multi_reduction <maximumf>, %500, %cst_127 [1] : vector<8x8xf32> to vector<8xf32>
    %507 = vector.shape_cast %506 : vector<8xf32> to vector<8x1xf32>
    %508 = arith.maximumf %507, %505 : vector<8x1xf32>
    %509 = vector.broadcast %508 : vector<8x1xf32> to vector<8x8xf32>
    %510 = arith.subf %500, %509 : vector<8x8xf32>
    %511 = math.exp %510 : vector<8x8xf32>
    %512 = arith.subf %505, %508 : vector<8x1xf32>
    %513 = math.exp %512 : vector<8x1xf32>
    %cst_128 = arith.constant dense<0.000000e+00> : vector<8xf32>
    %514 = vector.multi_reduction <add>, %511, %cst_128 [1] : vector<8x8xf32> to vector<8xf32>
    %515 = vector.shape_cast %514 : vector<8xf32> to vector<8x1xf32>
    %516 = arith.addf %515, %513 : vector<8x1xf32>
    %517 = tpu.reciprocal %516 {approx = true} : vector<8x1xf32> -> vector<8x1xf32>
    %518 = arith.truncf %511 : vector<8x8xf32> to vector<8x8xbf16>
    %cst_129 = arith.constant dense<0.000000e+00> : vector<8x8xf32>
    %519 = tpu.matmul %518, %495, %cst_129 {dimension_numbers = #tpu.dot_dimension_numbers<[1], [0], [0], [1], [0, 0, 1, 1], [], []>} : vector<8x8xbf16>, vector<8x8xbf16>, vector<8x8xf32> -> vector<8x8xf32>
    %520 = vector.broadcast %513 : vector<8x1xf32> to vector<8x8xf32>
    %521 = vector.broadcast %497 : vector<1x8xf32> to vector<8x8xf32>
    %522 = arith.mulf %520, %521 : vector<8x8xf32>
    %523 = arith.addf %519, %522 : vector<8x8xf32>
    %524 = vector.broadcast %517 : vector<8x1xf32> to vector<8x8xf32>
    %525 = arith.mulf %523, %524 : vector<8x8xf32>
    %526 = vector.extract_strided_slice %424 {offsets = [0, 24], sizes = [8, 8], strides = [1, 1]} : vector<8x32xf32> to vector<8x8xf32>
    %527 = vector.extract_strided_slice %425 {offsets = [0, 24], sizes = [8, 8], strides = [1, 1]} : vector<8x32xbf16> to vector<8x8xbf16>
    %528 = vector.extract_strided_slice %426 {offsets = [0, 24], sizes = [8, 8], strides = [1, 1]} : vector<8x32xbf16> to vector<8x8xbf16>
    %529 = vector.extract_strided_slice %6 {offsets = [0, 88], sizes = [1, 8], strides = [1, 1]} : vector<2x128xf32> to vector<1x8xf32>
    %530 = vector.extract_strided_slice %6 {offsets = [0, 120], sizes = [1, 8], strides = [1, 1]} : vector<2x128xf32> to vector<1x8xf32>
    %531 = arith.truncf %526 : vector<8x8xf32> to vector<8x8xbf16>
    %cst_130 = arith.constant dense<0.000000e+00> : vector<8x8xf32>
    %532 = tpu.matmul %531, %527, %cst_130 {dimension_numbers = #tpu.dot_dimension_numbers<[1], [1], [0], [0], [0, 0, 1, 0], [], []>} : vector<8x8xbf16>, vector<8x8xbf16>, vector<8x8xf32> -> vector<8x8xf32>
    %533 = arith.addf %532, %7 : vector<8x8xf32>
    %534 = vector.broadcast %529 : vector<1x8xf32> to vector<8x8xf32>
    %535 = arith.mulf %526, %534 : vector<8x8xf32>
    %cst_131 = arith.constant dense<0.000000e+00> : vector<8xf32>
    %536 = vector.multi_reduction <add>, %535, %cst_131 [1] : vector<8x8xf32> to vector<8xf32>
    %537 = vector.shape_cast %536 : vector<8xf32> to vector<8x1xf32>
    %538 = arith.addf %537, %9 : vector<8x1xf32>
    %cst_132 = arith.constant dense<0xFF800000> : vector<8xf32>
    %539 = vector.multi_reduction <maximumf>, %533, %cst_132 [1] : vector<8x8xf32> to vector<8xf32>
    %540 = vector.shape_cast %539 : vector<8xf32> to vector<8x1xf32>
    %541 = arith.maximumf %540, %538 : vector<8x1xf32>
    %542 = vector.broadcast %541 : vector<8x1xf32> to vector<8x8xf32>
    %543 = arith.subf %533, %542 : vector<8x8xf32>
    %544 = math.exp %543 : vector<8x8xf32>
    %545 = arith.subf %538, %541 : vector<8x1xf32>
    %546 = math.exp %545 : vector<8x1xf32>
    %cst_133 = arith.constant dense<0.000000e+00> : vector<8xf32>
    %547 = vector.multi_reduction <add>, %544, %cst_133 [1] : vector<8x8xf32> to vector<8xf32>
    %548 = vector.shape_cast %547 : vector<8xf32> to vector<8x1xf32>
    %549 = arith.addf %548, %546 : vector<8x1xf32>
    %550 = tpu.reciprocal %549 {approx = true} : vector<8x1xf32> -> vector<8x1xf32>
    %551 = arith.truncf %544 : vector<8x8xf32> to vector<8x8xbf16>
    %cst_134 = arith.constant dense<0.000000e+00> : vector<8x8xf32>
    %552 = tpu.matmul %551, %528, %cst_134 {dimension_numbers = #tpu.dot_dimension_numbers<[1], [0], [0], [1], [0, 0, 1, 1], [], []>} : vector<8x8xbf16>, vector<8x8xbf16>, vector<8x8xf32> -> vector<8x8xf32>
    %553 = vector.broadcast %546 : vector<8x1xf32> to vector<8x8xf32>
    %554 = vector.broadcast %530 : vector<1x8xf32> to vector<8x8xf32>
    %555 = arith.mulf %553, %554 : vector<8x8xf32>
    %556 = arith.addf %552, %555 : vector<8x8xf32>
    %557 = vector.broadcast %550 : vector<8x1xf32> to vector<8x8xf32>
    %558 = arith.mulf %556, %557 : vector<8x8xf32>
    %559 = tpu.concatenate %459, %492, %525, %558 in 1 : vector<8x8xf32>, vector<8x8xf32>, vector<8x8xf32>, vector<8x8xf32> -> vector<8x32xf32>
    %560 = vector.extract_strided_slice %419 {offsets = [8, 0], sizes = [8, 32], strides = [1, 1]} : vector<16x32xf32> to vector<8x32xf32>
    %561 = vector.extract_strided_slice %421 {offsets = [8, 0], sizes = [8, 32], strides = [1, 1]} : vector<16x32xbf16> to vector<8x32xbf16>
    %562 = vector.extract_strided_slice %423 {offsets = [8, 0], sizes = [8, 32], strides = [1, 1]} : vector<16x32xbf16> to vector<8x32xbf16>
    %563 = vector.extract_strided_slice %560 {offsets = [0, 0], sizes = [8, 8], strides = [1, 1]} : vector<8x32xf32> to vector<8x8xf32>
    %564 = vector.extract_strided_slice %561 {offsets = [0, 0], sizes = [8, 8], strides = [1, 1]} : vector<8x32xbf16> to vector<8x8xbf16>
    %565 = vector.extract_strided_slice %562 {offsets = [0, 0], sizes = [8, 8], strides = [1, 1]} : vector<8x32xbf16> to vector<8x8xbf16>
    %566 = vector.extract_strided_slice %6 {offsets = [1, 64], sizes = [1, 8], strides = [1, 1]} : vector<2x128xf32> to vector<1x8xf32>
    %567 = vector.extract_strided_slice %6 {offsets = [1, 96], sizes = [1, 8], strides = [1, 1]} : vector<2x128xf32> to vector<1x8xf32>
    %568 = arith.truncf %563 : vector<8x8xf32> to vector<8x8xbf16>
    %cst_135 = arith.constant dense<0.000000e+00> : vector<8x8xf32>
    %569 = tpu.matmul %568, %564, %cst_135 {dimension_numbers = #tpu.dot_dimension_numbers<[1], [1], [0], [0], [0, 0, 1, 0], [], []>} : vector<8x8xbf16>, vector<8x8xbf16>, vector<8x8xf32> -> vector<8x8xf32>
    %570 = arith.addf %569, %8 : vector<8x8xf32>
    %571 = vector.broadcast %566 : vector<1x8xf32> to vector<8x8xf32>
    %572 = arith.mulf %563, %571 : vector<8x8xf32>
    %cst_136 = arith.constant dense<0.000000e+00> : vector<8xf32>
    %573 = vector.multi_reduction <add>, %572, %cst_136 [1] : vector<8x8xf32> to vector<8xf32>
    %574 = vector.shape_cast %573 : vector<8xf32> to vector<8x1xf32>
    %575 = arith.addf %574, %10 : vector<8x1xf32>
    %cst_137 = arith.constant dense<0xFF800000> : vector<8xf32>
    %576 = vector.multi_reduction <maximumf>, %570, %cst_137 [1] : vector<8x8xf32> to vector<8xf32>
    %577 = vector.shape_cast %576 : vector<8xf32> to vector<8x1xf32>
    %578 = arith.maximumf %577, %575 : vector<8x1xf32>
    %579 = vector.broadcast %578 : vector<8x1xf32> to vector<8x8xf32>
    %580 = arith.subf %570, %579 : vector<8x8xf32>
    %581 = math.exp %580 : vector<8x8xf32>
    %582 = arith.subf %575, %578 : vector<8x1xf32>
    %583 = math.exp %582 : vector<8x1xf32>
    %cst_138 = arith.constant dense<0.000000e+00> : vector<8xf32>
    %584 = vector.multi_reduction <add>, %581, %cst_138 [1] : vector<8x8xf32> to vector<8xf32>
    %585 = vector.shape_cast %584 : vector<8xf32> to vector<8x1xf32>
    %586 = arith.addf %585, %583 : vector<8x1xf32>
    %587 = tpu.reciprocal %586 {approx = true} : vector<8x1xf32> -> vector<8x1xf32>
    %588 = arith.truncf %581 : vector<8x8xf32> to vector<8x8xbf16>
    %cst_139 = arith.constant dense<0.000000e+00> : vector<8x8xf32>
    %589 = tpu.matmul %588, %565, %cst_139 {dimension_numbers = #tpu.dot_dimension_numbers<[1], [0], [0], [1], [0, 0, 1, 1], [], []>} : vector<8x8xbf16>, vector<8x8xbf16>, vector<8x8xf32> -> vector<8x8xf32>
    %590 = vector.broadcast %583 : vector<8x1xf32> to vector<8x8xf32>
    %591 = vector.broadcast %567 : vector<1x8xf32> to vector<8x8xf32>
    %592 = arith.mulf %590, %591 : vector<8x8xf32>
    %593 = arith.addf %589, %592 : vector<8x8xf32>
    %594 = vector.broadcast %587 : vector<8x1xf32> to vector<8x8xf32>
    %595 = arith.mulf %593, %594 : vector<8x8xf32>
    %596 = vector.extract_strided_slice %560 {offsets = [0, 8], sizes = [8, 8], strides = [1, 1]} : vector<8x32xf32> to vector<8x8xf32>
    %597 = vector.extract_strided_slice %561 {offsets = [0, 8], sizes = [8, 8], strides = [1, 1]} : vector<8x32xbf16> to vector<8x8xbf16>
    %598 = vector.extract_strided_slice %562 {offsets = [0, 8], sizes = [8, 8], strides = [1, 1]} : vector<8x32xbf16> to vector<8x8xbf16>
    %599 = vector.extract_strided_slice %6 {offsets = [1, 72], sizes = [1, 8], strides = [1, 1]} : vector<2x128xf32> to vector<1x8xf32>
    %600 = vector.extract_strided_slice %6 {offsets = [1, 104], sizes = [1, 8], strides = [1, 1]} : vector<2x128xf32> to vector<1x8xf32>
    %601 = arith.truncf %596 : vector<8x8xf32> to vector<8x8xbf16>
    %cst_140 = arith.constant dense<0.000000e+00> : vector<8x8xf32>
    %602 = tpu.matmul %601, %597, %cst_140 {dimension_numbers = #tpu.dot_dimension_numbers<[1], [1], [0], [0], [0, 0, 1, 0], [], []>} : vector<8x8xbf16>, vector<8x8xbf16>, vector<8x8xf32> -> vector<8x8xf32>
    %603 = arith.addf %602, %8 : vector<8x8xf32>
    %604 = vector.broadcast %599 : vector<1x8xf32> to vector<8x8xf32>
    %605 = arith.mulf %596, %604 : vector<8x8xf32>
    %cst_141 = arith.constant dense<0.000000e+00> : vector<8xf32>
    %606 = vector.multi_reduction <add>, %605, %cst_141 [1] : vector<8x8xf32> to vector<8xf32>
    %607 = vector.shape_cast %606 : vector<8xf32> to vector<8x1xf32>
    %608 = arith.addf %607, %10 : vector<8x1xf32>
    %cst_142 = arith.constant dense<0xFF800000> : vector<8xf32>
    %609 = vector.multi_reduction <maximumf>, %603, %cst_142 [1] : vector<8x8xf32> to vector<8xf32>
    %610 = vector.shape_cast %609 : vector<8xf32> to vector<8x1xf32>
    %611 = arith.maximumf %610, %608 : vector<8x1xf32>
    %612 = vector.broadcast %611 : vector<8x1xf32> to vector<8x8xf32>
    %613 = arith.subf %603, %612 : vector<8x8xf32>
    %614 = math.exp %613 : vector<8x8xf32>
    %615 = arith.subf %608, %611 : vector<8x1xf32>
    %616 = math.exp %615 : vector<8x1xf32>
    %cst_143 = arith.constant dense<0.000000e+00> : vector<8xf32>
    %617 = vector.multi_reduction <add>, %614, %cst_143 [1] : vector<8x8xf32> to vector<8xf32>
    %618 = vector.shape_cast %617 : vector<8xf32> to vector<8x1xf32>
    %619 = arith.addf %618, %616 : vector<8x1xf32>
    %620 = tpu.reciprocal %619 {approx = true} : vector<8x1xf32> -> vector<8x1xf32>
    %621 = arith.truncf %614 : vector<8x8xf32> to vector<8x8xbf16>
    %cst_144 = arith.constant dense<0.000000e+00> : vector<8x8xf32>
    %622 = tpu.matmul %621, %598, %cst_144 {dimension_numbers = #tpu.dot_dimension_numbers<[1], [0], [0], [1], [0, 0, 1, 1], [], []>} : vector<8x8xbf16>, vector<8x8xbf16>, vector<8x8xf32> -> vector<8x8xf32>
    %623 = vector.broadcast %616 : vector<8x1xf32> to vector<8x8xf32>
    %624 = vector.broadcast %600 : vector<1x8xf32> to vector<8x8xf32>
    %625 = arith.mulf %623, %624 : vector<8x8xf32>
    %626 = arith.addf %622, %625 : vector<8x8xf32>
    %627 = vector.broadcast %620 : vector<8x1xf32> to vector<8x8xf32>
    %628 = arith.mulf %626, %627 : vector<8x8xf32>
    %629 = vector.extract_strided_slice %560 {offsets = [0, 16], sizes = [8, 8], strides = [1, 1]} : vector<8x32xf32> to vector<8x8xf32>
    %630 = vector.extract_strided_slice %561 {offsets = [0, 16], sizes = [8, 8], strides = [1, 1]} : vector<8x32xbf16> to vector<8x8xbf16>
    %631 = vector.extract_strided_slice %562 {offsets = [0, 16], sizes = [8, 8], strides = [1, 1]} : vector<8x32xbf16> to vector<8x8xbf16>
    %632 = vector.extract_strided_slice %6 {offsets = [1, 80], sizes = [1, 8], strides = [1, 1]} : vector<2x128xf32> to vector<1x8xf32>
    %633 = vector.extract_strided_slice %6 {offsets = [1, 112], sizes = [1, 8], strides = [1, 1]} : vector<2x128xf32> to vector<1x8xf32>
    %634 = arith.truncf %629 : vector<8x8xf32> to vector<8x8xbf16>
    %cst_145 = arith.constant dense<0.000000e+00> : vector<8x8xf32>
    %635 = tpu.matmul %634, %630, %cst_145 {dimension_numbers = #tpu.dot_dimension_numbers<[1], [1], [0], [0], [0, 0, 1, 0], [], []>} : vector<8x8xbf16>, vector<8x8xbf16>, vector<8x8xf32> -> vector<8x8xf32>
    %636 = arith.addf %635, %8 : vector<8x8xf32>
    %637 = vector.broadcast %632 : vector<1x8xf32> to vector<8x8xf32>
    %638 = arith.mulf %629, %637 : vector<8x8xf32>
    %cst_146 = arith.constant dense<0.000000e+00> : vector<8xf32>
    %639 = vector.multi_reduction <add>, %638, %cst_146 [1] : vector<8x8xf32> to vector<8xf32>
    %640 = vector.shape_cast %639 : vector<8xf32> to vector<8x1xf32>
    %641 = arith.addf %640, %10 : vector<8x1xf32>
    %cst_147 = arith.constant dense<0xFF800000> : vector<8xf32>
    %642 = vector.multi_reduction <maximumf>, %636, %cst_147 [1] : vector<8x8xf32> to vector<8xf32>
    %643 = vector.shape_cast %642 : vector<8xf32> to vector<8x1xf32>
    %644 = arith.maximumf %643, %641 : vector<8x1xf32>
    %645 = vector.broadcast %644 : vector<8x1xf32> to vector<8x8xf32>
    %646 = arith.subf %636, %645 : vector<8x8xf32>
    %647 = math.exp %646 : vector<8x8xf32>
    %648 = arith.subf %641, %644 : vector<8x1xf32>
    %649 = math.exp %648 : vector<8x1xf32>
    %cst_148 = arith.constant dense<0.000000e+00> : vector<8xf32>
    %650 = vector.multi_reduction <add>, %647, %cst_148 [1] : vector<8x8xf32> to vector<8xf32>
    %651 = vector.shape_cast %650 : vector<8xf32> to vector<8x1xf32>
    %652 = arith.addf %651, %649 : vector<8x1xf32>
    %653 = tpu.reciprocal %652 {approx = true} : vector<8x1xf32> -> vector<8x1xf32>
    %654 = arith.truncf %647 : vector<8x8xf32> to vector<8x8xbf16>
    %cst_149 = arith.constant dense<0.000000e+00> : vector<8x8xf32>
    %655 = tpu.matmul %654, %631, %cst_149 {dimension_numbers = #tpu.dot_dimension_numbers<[1], [0], [0], [1], [0, 0, 1, 1], [], []>} : vector<8x8xbf16>, vector<8x8xbf16>, vector<8x8xf32> -> vector<8x8xf32>
    %656 = vector.broadcast %649 : vector<8x1xf32> to vector<8x8xf32>
    %657 = vector.broadcast %633 : vector<1x8xf32> to vector<8x8xf32>
    %658 = arith.mulf %656, %657 : vector<8x8xf32>
    %659 = arith.addf %655, %658 : vector<8x8xf32>
    %660 = vector.broadcast %653 : vector<8x1xf32> to vector<8x8xf32>
    %661 = arith.mulf %659, %660 : vector<8x8xf32>
    %662 = vector.extract_strided_slice %560 {offsets = [0, 24], sizes = [8, 8], strides = [1, 1]} : vector<8x32xf32> to vector<8x8xf32>
    %663 = vector.extract_strided_slice %561 {offsets = [0, 24], sizes = [8, 8], strides = [1, 1]} : vector<8x32xbf16> to vector<8x8xbf16>
    %664 = vector.extract_strided_slice %562 {offsets = [0, 24], sizes = [8, 8], strides = [1, 1]} : vector<8x32xbf16> to vector<8x8xbf16>
    %665 = vector.extract_strided_slice %6 {offsets = [1, 88], sizes = [1, 8], strides = [1, 1]} : vector<2x128xf32> to vector<1x8xf32>
    %666 = vector.extract_strided_slice %6 {offsets = [1, 120], sizes = [1, 8], strides = [1, 1]} : vector<2x128xf32> to vector<1x8xf32>
    %667 = arith.truncf %662 : vector<8x8xf32> to vector<8x8xbf16>
    %cst_150 = arith.constant dense<0.000000e+00> : vector<8x8xf32>
    %668 = tpu.matmul %667, %663, %cst_150 {dimension_numbers = #tpu.dot_dimension_numbers<[1], [1], [0], [0], [0, 0, 1, 0], [], []>} : vector<8x8xbf16>, vector<8x8xbf16>, vector<8x8xf32> -> vector<8x8xf32>
    %669 = arith.addf %668, %8 : vector<8x8xf32>
    %670 = vector.broadcast %665 : vector<1x8xf32> to vector<8x8xf32>
    %671 = arith.mulf %662, %670 : vector<8x8xf32>
    %cst_151 = arith.constant dense<0.000000e+00> : vector<8xf32>
    %672 = vector.multi_reduction <add>, %671, %cst_151 [1] : vector<8x8xf32> to vector<8xf32>
    %673 = vector.shape_cast %672 : vector<8xf32> to vector<8x1xf32>
    %674 = arith.addf %673, %10 : vector<8x1xf32>
    %cst_152 = arith.constant dense<0xFF800000> : vector<8xf32>
    %675 = vector.multi_reduction <maximumf>, %669, %cst_152 [1] : vector<8x8xf32> to vector<8xf32>
    %676 = vector.shape_cast %675 : vector<8xf32> to vector<8x1xf32>
    %677 = arith.maximumf %676, %674 : vector<8x1xf32>
    %678 = vector.broadcast %677 : vector<8x1xf32> to vector<8x8xf32>
    %679 = arith.subf %669, %678 : vector<8x8xf32>
    %680 = math.exp %679 : vector<8x8xf32>
    %681 = arith.subf %674, %677 : vector<8x1xf32>
    %682 = math.exp %681 : vector<8x1xf32>
    %cst_153 = arith.constant dense<0.000000e+00> : vector<8xf32>
    %683 = vector.multi_reduction <add>, %680, %cst_153 [1] : vector<8x8xf32> to vector<8xf32>
    %684 = vector.shape_cast %683 : vector<8xf32> to vector<8x1xf32>
    %685 = arith.addf %684, %682 : vector<8x1xf32>
    %686 = tpu.reciprocal %685 {approx = true} : vector<8x1xf32> -> vector<8x1xf32>
    %687 = arith.truncf %680 : vector<8x8xf32> to vector<8x8xbf16>
    %cst_154 = arith.constant dense<0.000000e+00> : vector<8x8xf32>
    %688 = tpu.matmul %687, %664, %cst_154 {dimension_numbers = #tpu.dot_dimension_numbers<[1], [0], [0], [1], [0, 0, 1, 1], [], []>} : vector<8x8xbf16>, vector<8x8xbf16>, vector<8x8xf32> -> vector<8x8xf32>
    %689 = vector.broadcast %682 : vector<8x1xf32> to vector<8x8xf32>
    %690 = vector.broadcast %666 : vector<1x8xf32> to vector<8x8xf32>
    %691 = arith.mulf %689, %690 : vector<8x8xf32>
    %692 = arith.addf %688, %691 : vector<8x8xf32>
    %693 = vector.broadcast %686 : vector<8x1xf32> to vector<8x8xf32>
    %694 = arith.mulf %692, %693 : vector<8x8xf32>
    %695 = tpu.concatenate %595, %628, %661, %694 in 1 : vector<8x8xf32>, vector<8x8xf32>, vector<8x8xf32>, vector<8x8xf32> -> vector<8x32xf32>
    %696 = tpu.concatenate %559, %695 in 0 : vector<8x32xf32>, vector<8x32xf32> -> vector<16x32xf32>
    %c1_155 = arith.constant 1 : index
    %c0_156 = arith.constant 0 : index
    %c0_157 = arith.constant 0 : index
    %697 = vector.load %arg9[%c1_155, %c0_156, %c0_157] : memref<2x32x32xbf16, #tpu.memory_space<vmem>>, vector<1x32x32xbf16>
    %698 = vector.shape_cast %697 : vector<1x32x32xbf16> to vector<32x32xbf16>
    %699 = arith.truncf %696 : vector<16x32xf32> to vector<16x32xbf16>
    %cst_158 = arith.constant dense<0.000000e+00> : vector<16x32xf32>
    %700 = tpu.matmul %699, %698, %cst_158 {dimension_numbers = #tpu.dot_dimension_numbers<[1], [0], [0], [1], [0, 0, 1, 1], [], []>} : vector<16x32xbf16>, vector<32x32xbf16>, vector<16x32xf32> -> vector<16x32xf32>
    %701 = arith.addf %384, %700 : vector<16x32xf32>
    %c1_159 = arith.constant 1 : index
    %c0_160 = arith.constant 0 : index
    %c0_161 = arith.constant 0 : index
    %702 = vector.load %arg10[%c1_159, %c0_160, %c0_161] : memref<2x1x32xf32, #tpu.memory_space<vmem>>, vector<1x1x32xf32>
    %703 = vector.shape_cast %702 : vector<1x1x32xf32> to vector<1x32xf32>
    %704 = vector.broadcast %703 : vector<1x32xf32> to vector<16x32xf32>
    %705 = arith.addf %701, %704 : vector<16x32xf32>
    %706 = vector.extract_strided_slice %386 {offsets = [2, 0], sizes = [1, 32], strides = [1, 1]} : vector<4x32xf32> to vector<1x32xf32>
    %707 = vector.extract_strided_slice %386 {offsets = [3, 0], sizes = [1, 32], strides = [1, 1]} : vector<4x32xf32> to vector<1x32xf32>
    %cst_162 = arith.constant dense<0.000000e+00> : vector<16xf32>
    %708 = vector.multi_reduction <add>, %705, %cst_162 [1] : vector<16x32xf32> to vector<16xf32>
    %709 = vector.shape_cast %708 : vector<16xf32> to vector<16x1xf32>
    %cst_163 = arith.constant 3.200000e+01 : f32
    %710 = vector.broadcast %cst_163 : f32 to vector<16x1xf32>
    %711 = arith.divf %709, %710 : vector<16x1xf32>
    %712 = vector.broadcast %711 : vector<16x1xf32> to vector<16x32xf32>
    %713 = arith.subf %705, %712 : vector<16x32xf32>
    %714 = arith.mulf %713, %713 : vector<16x32xf32>
    %cst_164 = arith.constant dense<0.000000e+00> : vector<16xf32>
    %715 = vector.multi_reduction <add>, %714, %cst_164 [1] : vector<16x32xf32> to vector<16xf32>
    %716 = vector.shape_cast %715 : vector<16xf32> to vector<16x1xf32>
    %cst_165 = arith.constant 3.200000e+01 : f32
    %717 = vector.broadcast %cst_165 : f32 to vector<16x1xf32>
    %718 = arith.divf %716, %717 : vector<16x1xf32>
    %cst_166 = arith.constant 9.99999974E-6 : f32
    %719 = vector.broadcast %cst_166 : f32 to vector<16x1xf32>
    %720 = arith.addf %718, %719 : vector<16x1xf32>
    %721 = math.rsqrt %720 : vector<16x1xf32>
    %722 = vector.broadcast %721 : vector<16x1xf32> to vector<16x32xf32>
    %723 = arith.mulf %713, %722 : vector<16x32xf32>
    %724 = vector.broadcast %706 : vector<1x32xf32> to vector<16x32xf32>
    %725 = arith.mulf %723, %724 : vector<16x32xf32>
    %726 = vector.broadcast %707 : vector<1x32xf32> to vector<16x32xf32>
    %727 = arith.addf %725, %726 : vector<16x32xf32>
    %c1_167 = arith.constant 1 : index
    %c0_168 = arith.constant 0 : index
    %c0_169 = arith.constant 0 : index
    %728 = vector.load %arg11[%c1_167, %c0_168, %c0_169] : memref<2x32x128xbf16, #tpu.memory_space<vmem>>, vector<1x32x128xbf16>
    %729 = vector.shape_cast %728 : vector<1x32x128xbf16> to vector<32x128xbf16>
    %730 = arith.truncf %727 : vector<16x32xf32> to vector<16x32xbf16>
    %cst_170 = arith.constant dense<0.000000e+00> : vector<16x128xf32>
    %731 = tpu.matmul %730, %729, %cst_170 {dimension_numbers = #tpu.dot_dimension_numbers<[1], [0], [0], [1], [0, 0, 1, 1], [], []>} : vector<16x32xbf16>, vector<32x128xbf16>, vector<16x128xf32> -> vector<16x128xf32>
    %c1_171 = arith.constant 1 : index
    %c0_172 = arith.constant 0 : index
    %c0_173 = arith.constant 0 : index
    %732 = vector.load %arg12[%c1_171, %c0_172, %c0_173] : memref<2x1x128xf32, #tpu.memory_space<vmem>>, vector<1x1x128xf32>
    %733 = vector.shape_cast %732 : vector<1x1x128xf32> to vector<1x128xf32>
    %734 = vector.broadcast %733 : vector<1x128xf32> to vector<16x128xf32>
    %735 = arith.addf %731, %734 : vector<16x128xf32>
    %cst_174 = arith.constant 5.000000e-01 : f32
    %736 = vector.broadcast %cst_174 : f32 to vector<16x128xf32>
    %737 = arith.mulf %736, %735 : vector<16x128xf32>
    %cst_175 = arith.constant 4.471500e-02 : f32
    %738 = vector.broadcast %cst_175 : f32 to vector<16x128xf32>
    %739 = arith.mulf %738, %735 : vector<16x128xf32>
    %740 = arith.mulf %739, %735 : vector<16x128xf32>
    %741 = arith.mulf %740, %735 : vector<16x128xf32>
    %742 = arith.addf %735, %741 : vector<16x128xf32>
    %cst_176 = arith.constant 0.797884583 : f32
    %743 = vector.broadcast %cst_176 : f32 to vector<16x128xf32>
    %744 = arith.mulf %743, %742 : vector<16x128xf32>
    %745 = math.tanh %744 : vector<16x128xf32>
    %cst_177 = arith.constant 1.000000e+00 : f32
    %746 = vector.broadcast %cst_177 : f32 to vector<16x128xf32>
    %747 = arith.addf %746, %745 : vector<16x128xf32>
    %748 = arith.mulf %737, %747 : vector<16x128xf32>
    %c1_178 = arith.constant 1 : index
    %c0_179 = arith.constant 0 : index
    %c0_180 = arith.constant 0 : index
    %749 = vector.load %arg13[%c1_178, %c0_179, %c0_180] : memref<2x128x32xbf16, #tpu.memory_space<vmem>>, vector<1x128x32xbf16>
    %750 = vector.shape_cast %749 : vector<1x128x32xbf16> to vector<128x32xbf16>
    %751 = arith.truncf %748 : vector<16x128xf32> to vector<16x128xbf16>
    %cst_181 = arith.constant dense<0.000000e+00> : vector<16x32xf32>
    %752 = tpu.matmul %751, %750, %cst_181 {dimension_numbers = #tpu.dot_dimension_numbers<[1], [0], [0], [1], [0, 0, 1, 1], [], []>} : vector<16x128xbf16>, vector<128x32xbf16>, vector<16x32xf32> -> vector<16x32xf32>
    %753 = arith.addf %705, %752 : vector<16x32xf32>
    %c1_182 = arith.constant 1 : index
    %c0_183 = arith.constant 0 : index
    %c0_184 = arith.constant 0 : index
    %754 = vector.load %arg14[%c1_182, %c0_183, %c0_184] : memref<2x1x32xf32, #tpu.memory_space<vmem>>, vector<1x1x32xf32>
    %755 = vector.shape_cast %754 : vector<1x1x32xf32> to vector<1x32xf32>
    %756 = vector.broadcast %755 : vector<1x32xf32> to vector<16x32xf32>
    %757 = arith.addf %753, %756 : vector<16x32xf32>
    %c0_185 = arith.constant 0 : index
    %c0_186 = arith.constant 0 : index
    %758 = vector.load %arg15[%c0_185, %c0_186] : memref<2x32xf32, #tpu.memory_space<vmem>>, vector<2x32xf32>
    %759 = vector.extract_strided_slice %758 {offsets = [0, 0], sizes = [1, 32], strides = [1, 1]} : vector<2x32xf32> to vector<1x32xf32>
    %760 = vector.extract_strided_slice %758 {offsets = [1, 0], sizes = [1, 32], strides = [1, 1]} : vector<2x32xf32> to vector<1x32xf32>
    %cst_187 = arith.constant dense<0.000000e+00> : vector<16xf32>
    %761 = vector.multi_reduction <add>, %757, %cst_187 [1] : vector<16x32xf32> to vector<16xf32>
    %762 = vector.shape_cast %761 : vector<16xf32> to vector<16x1xf32>
    %cst_188 = arith.constant 3.200000e+01 : f32
    %763 = vector.broadcast %cst_188 : f32 to vector<16x1xf32>
    %764 = arith.divf %762, %763 : vector<16x1xf32>
    %765 = vector.broadcast %764 : vector<16x1xf32> to vector<16x32xf32>
    %766 = arith.subf %757, %765 : vector<16x32xf32>
    %767 = arith.mulf %766, %766 : vector<16x32xf32>
    %cst_189 = arith.constant dense<0.000000e+00> : vector<16xf32>
    %768 = vector.multi_reduction <add>, %767, %cst_189 [1] : vector<16x32xf32> to vector<16xf32>
    %769 = vector.shape_cast %768 : vector<16xf32> to vector<16x1xf32>
    %cst_190 = arith.constant 3.200000e+01 : f32
    %770 = vector.broadcast %cst_190 : f32 to vector<16x1xf32>
    %771 = arith.divf %769, %770 : vector<16x1xf32>
    %cst_191 = arith.constant 9.99999974E-6 : f32
    %772 = vector.broadcast %cst_191 : f32 to vector<16x1xf32>
    %773 = arith.addf %771, %772 : vector<16x1xf32>
    %774 = math.rsqrt %773 : vector<16x1xf32>
    %775 = vector.broadcast %774 : vector<16x1xf32> to vector<16x32xf32>
    %776 = arith.mulf %766, %775 : vector<16x32xf32>
    %777 = vector.broadcast %759 : vector<1x32xf32> to vector<16x32xf32>
    %778 = arith.mulf %776, %777 : vector<16x32xf32>
    %779 = vector.broadcast %760 : vector<1x32xf32> to vector<16x32xf32>
    %780 = arith.addf %778, %779 : vector<16x32xf32>
    %c0_192 = arith.constant 0 : index
    %c0_193 = arith.constant 0 : index
    %781 = vector.load %arg16[%c0_192, %c0_193] : memref<32x128xbf16, #tpu.memory_space<vmem>>, vector<32x128xbf16>
    %782 = arith.truncf %780 : vector<16x32xf32> to vector<16x32xbf16>
    %cst_194 = arith.constant dense<0.000000e+00> : vector<16x128xf32>
    %783 = tpu.matmul %782, %781, %cst_194 {dimension_numbers = #tpu.dot_dimension_numbers<[1], [0], [0], [1], [0, 0, 1, 1], [], []>} : vector<16x32xbf16>, vector<32x128xbf16>, vector<16x128xf32> -> vector<16x128xf32>
    %c0_195 = arith.constant 0 : index
    %c0_196 = arith.constant 0 : index
    %784 = vector.load %arg17[%c0_195, %c0_196] : memref<16x128xf32, #tpu.memory_space<vmem>>, vector<16x128xf32>
    tpu.vector_store %arg17[%c0_195, %c0_196], %783 {strides = array<i32>} : memref<16x128xf32, #tpu.memory_space<vmem>>, vector<16x128xf32>,
    return
  }
}

</mosaic_0001>

<bundles_post_ra>
// kernel: gpt2_wrapper_forward.1
= control target key start
LH: loop header
LB: loop body
LE: loop exit
PB: predicated region body
PF: predicated region fallthrough
CT: control target
= control target key end

     0   :  { %vm125_vm0 = vcmask 261120   ;;  %v4163_v15 = vmov 0.0   ;;  %vm4164_vm1 = vmmov 0   ;;  %vm74_vm2 = vcmask 130048   ;;  %s4165_s27 = smov 88   ;;  %s4166_s28 = smov 96   ;;  %s5194_s1 = inlined_call_operand.vmem [shape: f32[16,32], index: 1, kind: input, shape index: {}]   ;;  %s5195_s4 = inlined_call_operand.vmem [shape: bf16[16,128], index: 4, kind: input, shape index: {}]   ;;  %s5196_s0 = inlined_call_operand.vmem [shape: f32[2,16], index: 0, kind: input, shape index: {}]   ;;  %s5197_s7 = inlined_call_operand.vmem [shape: bf16[2,32,96], index: 7, kind: input, shape index: {}]   ;;  %s5198_s6 = inlined_call_operand.vmem [shape: f32[2,4,32], index: 6, kind: input, shape index: {}]   ;;  %s5199_s8 = inlined_call_operand.vmem [shape: f32[2,1,96], index: 8, kind: input, shape index: {}]   ;;  %s5200_s5 = inlined_call_operand.vmem [shape: f32[1,128], index: 5, kind: input, shape index: {}]   ;;  %s5201_s3 = inlined_call_operand.vmem [shape: f32[16,8], index: 3, kind: input, shape index: {}]   ;;  %s5202_s2 = inlined_call_operand.vmem [shape: f32[16,1], index: 2, kind: input, shape index: {}]   ;;  %s5203_s9 = inlined_call_operand.vmem [shape: bf16[2,32,32], index: 9, kind: input, shape index: {}]   ;;  %s5204_s10 = inlined_call_operand.vmem [shape: f32[2,1,32], index: 10, kind: input, shape index: {}]   ;;  %s5205_s11 = inlined_call_operand.vmem [shape: bf16[2,32,128], index: 11, kind: input, shape index: {}]   ;;  %s5206_s13 = inlined_call_operand.vmem [shape: bf16[2,128,32], index: 13, kind: input, shape index: {}]   ;;  %s5207_s12 = inlined_call_operand.vmem [shape: f32[2,1,128], index: 12, kind: input, shape index: {}]   ;;  %s5208_s14 = inlined_call_operand.vmem [shape: f32[2,1,32], index: 14, kind: input, shape index: {}]   ;;  %s5209_s16 = inlined_call_operand.vmem [shape: bf16[32,128], index: 16, kind: input, shape index: {}]   ;;  %s5210_s15 = inlined_call_operand.vmem [shape: f32[2,32], index: 15, kind: input, shape index: {}]   ;;  %s5211_s17 = inlined_call_operand.vmem [shape: f32[16,128], index: 17, kind: output, shape index: {}]  }
   0x1   :  { %5223 = sst [smem:[#allocation2_spill]] %s5194_s1  ;;  %3656 = vmatprep.subr.bf16.mxu0 %v4163_v15  ;;  %3676 = vmatprep.subr.bf16.mxu1 %v4163_v15  ;;  %v57_v16 = vld [vmem:[%s5196_s0] sm:$0x3]  ;;  %v4001_v18 = vld [vmem:[%s5197_s7 + $0x8] sm:$0xff]   ;;  %v153_v26 = vlaneseq  ;;  %s4167_s29 = smov 120   ;;  %vm240_vm3 = vcmask 64512  }
   0x2   :  { %5224 = sst [smem:[#allocation3_spill]] %s5195_s4  ;;  %v60_v17 = vpack.c.bf16 %v57_v16, %v57_v16  ;;  %3658 = vmatprep.mubr.msk.bf16.mxu0 %vm4164_vm1, %v4163_v15  ;;  %3678 = vmatprep.mubr.msk.bf16.mxu1 %vm4164_vm1, %v4163_v15  ;;  %v4002_v19 = vld [vmem:[%s5197_s7] sm:$0xff]   ;;  %s4168_s1 = smov 112   ;;  %vm332_vm4 = vcmask 1043456   ;;  %vm824_vm5 = vcmask 195584  }
   0x3   :  { %s5225_s26 = sld [smem:[#allocation2_spill]]  ;;  %v4305_v27 = vshrl.u32 %v153_v26, 7  ;;  %v124_v29 = vld [vmem:[%s5198_s6] sm:$0xf]  ;;  %s4170_s18 = smov 104  }
   0x4   :  { %s5226_s30 = sld [smem:[#allocation3_spill]]  ;;  %v3441_v46 = vld [vmem:[%s5199_s8] ss:$0 sm:$0xff]  ;;  %s4171_s19 = smov 72  }
   0x5   :  { %v4308_v28 = vsub.s32 0, %v4305_v27  ;;  %v4315_v33 = vsub.s32 1, %v4305_v27  ;;  %v3438_v57 = vld [vmem:[%s5200_s5] ss:$0 sm:$0xff]  ;;  %s5219_s25 = smov 40   ;;  %s4174_s4 = smov 64  }
   0x6   :  { %s4175_s20 = smov 56   ;;  %s5221_s21 = smov 48  }
   0x7   :  { %v156_v32 = vrot.slane %v124_v29, %v4308_v28  ;;  %v162_v37 = vrot.slane %v124_v29, %v4315_v33  ;;  %v118_v29 = vld [vmem:[%s5201_s3] sm:$0xff]  ;;  %s5213_s24 = smov 8   ;;  %s5215_s5 = smov 16  }
   0x8   :  { %s5217_s23 = smov 24  }
   0x9   :  { %v122_v0 = vld [vmem:[%s5225_s26] sm:$0xff]  ;;  %v123_v1 = vld [vmem:[%s5225_s26 + $0x8] sm:$0xff] }
   0xa   :  { %v126_v2 = vsel %vm125_vm0, %v122_v0, 0.0  ;;  %v129_v3 = vsel %vm125_vm0, %v123_v1, 0.0  ;;  %v4000_v14 = vld [vmem:[%s5226_s30] sm:$0xff]   ;;  %s4169_s30 = smov 80  }
   0xb   :  { %127 = vadd.xlane.f32.xlu0 %v126_v2  ;;  %3657 = vmatpush3.bf16.msra.mxu0 %v4000_v14 }
   0xc   :  { %3662 = vmatprep.subr.bf16.mxu0 %v4163_v15 }
   0xe   :  { %3659 = vmatmul.mubr.msk.bf16.vlgmr.msra.gmra.mxu0 %vm74_vm2, %v60_v17 }
   0xf   :  { %130 = vadd.xlane.f32.xlu0 %v129_v3  ;;  %3666 = vmatprep.mubr.msk.bf16.mxu0 %vm4164_vm1, %v4163_v15 }
  0x10   :  { %3663 = vmatpush3.bf16.msra.mxu0 %v4001_v18 }
  0x11   :  { %3664 = vmatprep.subr.bf16.mxu0 %v4163_v15 }
  0x14   :  { %3665 = vmatpush3.bf16.msra.mxu0 %v4002_v19 }
  0x15   :  { %3670 = vmatprep.subr.bf16.mxu0 %v4163_v15 }
  0x94   :  { %v128_v4 = vpop.xlane.xlu0 %127 }
  0x95   :  { %v133_v5 = vmul.f32 0.03125, %v128_v4 }
  0x97   :  { %v135_v6 = vsub.f32 %v122_v0, %v133_v5 }
  0x98   :  { %v131_v7 = vpop.xlane.xlu0 %130 }
  0x99   :  { %v134_v8 = vmul.f32 0.03125, %v131_v7  ;;  %v137_v9 = vmul.f32 %v135_v6, %v135_v6 }
  0x9b   :  { %v136_v10 = vsub.f32 %v123_v1, %v134_v8  ;;  %v139_v11 = vsel %vm125_vm0, %v137_v9, 0.0 }
  0x9c   :  { %140 = vadd.xlane.f32.xlu1 %v139_v11 }
  0x9d   :  { %v138_v12 = vmul.f32 %v136_v10, %v136_v10 }
  0x9f   :  { %v142_v13 = vsel %vm125_vm0, %v138_v12, 0.0 }
  0xa0   :  { %143 = vadd.xlane.f32.xlu1 %v142_v13 }
  0xce   :  { %v112_v42 = vpop.f32.mrf.mxu0 }
  0xcf   :  { %v113_v59 = vadd.f32 %v3438_v57, %v112_v42 }
  0xd0   :  { %v3660_v43 = vpop.f32.mrf.mxu0 }
  0xd1   :  { %v4350_v61 = vrot.slane %v113_v59, %v4308_v28  ;;  %v4361_v63 = vrot.slane %v113_v59, %v4315_v33 }
  0xd2   :  { %v115_v44 = vpop.f32.mrf.mxu0 }
  0xd4   :  { %v3661_v45 = vpop.f32.mrf.mxu0 }
  0xd5   :  { %v4172_v45 = vmov 0  }
  0xd6   :  { %3968 = vset.pattern.permute.xlu0 %v4172_v45  ;;  %3969 = vset.pattern.permute.xlu1 %v4172_v45 }
 0x125   :  { %v141_v20 = vpop.xlane.xlu1 %140 }
 0x126   :  { %v145_v21 = vmul.f32 0.03125, %v141_v20 }
 0x128   :  { %v147_v22 = vadd.f32 1e-05, %v145_v21 }
 0x129   :  { %v144_v23 = vpop.xlane.xlu1 %143 }
 0x12a   :  { %4031 = vrsqrt.f32 %v147_v22  ;;  %v146_v24 = vmul.f32 0.03125, %v144_v23 }
 0x12c   :  { %v148_v25 = vadd.f32 1e-05, %v146_v24 }
 0x12e   :  { %4033 = vrsqrt.f32 %v148_v25 }
 0x137   :  { %v4032_v30 = vpop.eup %4031 }
 0x138   :  { %v151_v31 = vmul.f32 %v4032_v30, %v135_v6 }
 0x13a   :  { %v157_v36 = vmul.f32 %v156_v32, %v151_v31 }
 0x13b   :  { %v4034_v34 = vpop.eup %4033 }
 0x13c   :  { %v152_v35 = vmul.f32 %v4034_v34, %v136_v10  ;;  %v163_v39 = vadd.f32 %v162_v37, %v157_v36 }
 0x13e   :  { %v158_v38 = vmul.f32 %v156_v32, %v152_v35 }
 0x140   :  { %v164_v40 = vadd.f32 %v162_v37, %v158_v38 }
 0x142   :  { %v169_v41 = vpack.c.bf16 %v164_v40, %v163_v39 }
 0x144   :  { %3667 = vmatmul.mubr.msk.bf16.vlgmr.msra.gmra.mxu0 %vm125_vm0, %v169_v41 }
 0x145   :  { %3672 = vmatprep.mubr.msk.bf16.mxu0 %vm4164_vm1, %v4163_v15 }
 0x204   :  { %v226_v47 = vpop.f32.mrf.mxu0 }
 0x205   :  { %v227_v49 = vadd.f32 %v3441_v46, %v226_v47 }
 0x206   :  { %v3668_v48 = vpop.f32.mrf.mxu0 }
 0x207   :  { %v233_v53 = vmul.f32 0.35355338, %v227_v49 }
 0x208   :  { %v229_v50 = vpop.f32.mrf.mxu0 }
 0x209   :  { %v230_v51 = vadd.f32 %v3441_v46, %v229_v50  ;;  %v236_v55 = vpack.c.bf16 %v233_v53, %v233_v53  ;;  %v291_v62 = vmul.f32 %v4350_v61, %v233_v53 }
 0x20a   :  { %v3669_v52 = vpop.f32.mrf.mxu0 }
 0x20b   :  { %v4324_v54 = vpack.c.bf16 %v230_v51, %v227_v49  ;;  %v234_v58 = vmul.f32 0.35355338, %v230_v51  ;;  %v292_v1 = vsel %vm240_vm3, %v291_v62, 0.0 }
 0x20d   :  { %385 = vrot.lane.b32.xlu1 %v4324_v54, %s4165_s27  ;;  %238 = vrot.lane.b32.xlu0 %v4324_v54, %s4166_s28  ;;  %v4336_v56 = vrot.slane %v4324_v54, 4  ;;  %v826_v60 = vpack.c.bf16 %v234_v58, %v234_v58  ;;  %v4365_v0 = vmul.f32 %v4361_v63, %v234_v58 }
 0x20f   :  { %v881_v57 = vsel %vm240_vm3, %v4365_v0, 0.0 }
 0x211   :  { %383 = vrot.lane.b32.xlu1 %v236_v55, %s4167_s29  ;;  %526 = vrot.lane.b32.xlu0 %v236_v55, %s4168_s1 }
 0x215   :  { %528 = vrot.lane.b32.xlu1 %v4324_v54, %s4169_s30  ;;  %668 = vrot.lane.b32.xlu0 %v236_v55, %s4170_s18 }
 0x219   :  { %670 = vrot.lane.b32.xlu1 %v4324_v54, %s4171_s19  ;;  %973 = vrot.lane.b32.xlu0 %v4336_v56, %s4165_s27 }
 0x21d   :  { %1116 = vrot.lane.b32.xlu0 %v4336_v56, %s4169_s30  ;;  %828 = vrot.lane.b32.xlu1 %v4336_v56, %s4166_s28 }
 0x221   :  { %1258 = vrot.lane.b32.xlu0 %v4336_v56, %s4171_s19  ;;  %971 = vrot.lane.b32.xlu1 %v826_v60, %s4167_s29 }
 0x225   :  { %434 = vrot.lane.b32.xlu0 %v291_v62, %s4167_s29  ;;  %1114 = vrot.lane.b32.xlu1 %v826_v60, %s4168_s1 }
 0x229   :  { %718 = vrot.lane.b32.xlu0 %v291_v62, %s4170_s18  ;;  %1256 = vrot.lane.b32.xlu1 %v826_v60, %s4170_s18 }
 0x22d   :  { %576 = vrot.lane.b32.xlu1 %v291_v62, %s4168_s1 }
 0x231   :  { %1022 = vrot.lane.b32.xlu1 %v4365_v0, %s4167_s29 }
 0x235   :  { %1306 = vrot.lane.b32.xlu1 %v4365_v0, %s4170_s18 }
 0x248   :  { %293 = vadd.xlane.f32.xlu0 %v292_v1 }
 0x25e   :  { %1164 = vrot.lane.b32.xlu0 %v4365_v0, %s4168_s1  ;;  %v119_v0 = vld [vmem:[%s5201_s3 + $0x8] sm:$0xff] }
 0x27f   :  { %v239_v2 = vpop.permute.xlu0 %238  ;;  %v386_v4 = vpop.permute.xlu1 %385 }
 0x280   :  { %v245_v3 = vsel %vm240_vm3, %v239_v2, 0  ;;  %v391_v8 = vsel %vm240_vm3, %v386_v4, 0 }
 0x281   :  { %3671 = vmatpush3.bf16.xpose.msra.mxu0 %v245_v3 }
 0x282   :  { %3682 = vmatprep.subr.bf16.mxu0 %v4163_v15 }
 0x283   :  { %v527_v5 = vpop.permute.xlu0 %526  ;;  %v384_v6 = vpop.permute.xlu1 %383 }
 0x287   :  { %v669_v7 = vpop.permute.xlu0 %668  ;;  %v529_v10 = vpop.permute.xlu1 %528 }
 0x288   :  { %3673 = vmatmul.mubr.msk.bf16.vlgmr.msra.gmra.mxu0 %vm240_vm3, %v236_v55  ;;  %v534_v12 = vsel %vm240_vm3, %v529_v10, 0 }
 0x289   :  { %3683 = vmatpush3.bf16.xpose.msra.mxu0 %v391_v8  ;;  %3684 = vmatprep.mubr.msk.bf16.mxu0 %vm4164_vm1, %v4163_v15 }
 0x28a   :  { %3694 = vmatprep.subr.bf16.mxu0 %v4163_v15 }
 0x28b   :  { %v974_v9 = vpop.permute.xlu0 %973  ;;  %v671_v14 = vpop.permute.xlu1 %670 }
 0x28c   :  { %v676_v17 = vsel %vm240_vm3, %v671_v14, 0  ;;  %v979_v21 = vsel %vm240_vm3, %v974_v9, 0 }
 0x28f   :  { %v1117_v11 = vpop.permute.xlu0 %1116  ;;  %v829_v19 = vpop.permute.xlu1 %828 }
 0x290   :  { %3685 = vmatmul.mubr.msk.bf16.vlgmr.msra.gmra.mxu0 %vm240_vm3, %v384_v6  ;;  %v834_v20 = vsel %vm240_vm3, %v829_v19, 0  ;;  %v1122_v23 = vsel %vm240_vm3, %v1117_v11, 0 }
 0x291   :  { %3695 = vmatpush3.bf16.xpose.msra.mxu0 %v534_v12  ;;  %3696 = vmatprep.mubr.msk.bf16.mxu0 %vm4164_vm1, %v4163_v15 }
 0x292   :  { %3706 = vmatprep.subr.bf16.mxu0 %v4163_v15 }
 0x293   :  { %v1259_v13 = vpop.permute.xlu0 %1258  ;;  %v972_v22 = vpop.permute.xlu1 %971 }
 0x294   :  { %v1264_v25 = vsel %vm240_vm3, %v1259_v13, 0 }
 0x297   :  { %v435_v16 = vpop.permute.xlu0 %434  ;;  %v1115_v24 = vpop.permute.xlu1 %1114 }
 0x298   :  { %3697 = vmatmul.mubr.msk.bf16.vlgmr.msra.gmra.mxu0 %vm240_vm3, %v527_v5  ;;  %v437_v18 = vsel %vm240_vm3, %v435_v16, 0.0 }
 0x299   :  { %3707 = vmatpush3.bf16.xpose.msra.mxu0 %v676_v17  ;;  %438 = vadd.xlane.f32.xlu0 %v437_v18 }
 0x29a   :  { %3708 = vmatprep.mubr.msk.bf16.mxu0 %vm4164_vm1, %v4163_v15  ;;  %3718 = vmatprep.subr.bf16.mxu0 %v4163_v15 }
 0x29b   :  { %v1257_v26 = vpop.permute.xlu1 %1256  ;;  %v719_v46 = vpop.permute.xlu0 %718 }
 0x29c   :  { %v721_v50 = vsel %vm240_vm3, %v719_v46, 0.0 }
 0x29f   :  { %v577_v41 = vpop.permute.xlu1 %576 }
 0x2a0   :  { %3709 = vmatmul.mubr.msk.bf16.vlgmr.msra.gmra.mxu0 %vm240_vm3, %v669_v7  ;;  %v579_v44 = vsel %vm240_vm3, %v577_v41, 0.0 }
 0x2a1   :  { %3719 = vmatpush3.bf16.xpose.msra.mxu0 %v834_v20  ;;  %3720 = vmatprep.mubr.msk.bf16.mxu0 %vm4164_vm1, %v4163_v15 }
 0x2a2   :  { %3730 = vmatprep.subr.bf16.mxu0 %v4163_v15 }
 0x2a3   :  { %v1023_v58 = vpop.permute.xlu1 %1022 }
 0x2a4   :  { %v1025_v1 = vsel %vm240_vm3, %v1023_v58, 0.0 }
 0x2a7   :  { %v1307_v7 = vpop.permute.xlu1 %1306 }
 0x2a8   :  { %3721 = vmatmul.mubr.msk.bf16.vlgmr.msra.gmra.mxu0 %vm240_vm3, %v826_v60  ;;  %v1309_v11 = vsel %vm240_vm3, %v1307_v7, 0.0 }
 0x2a9   :  { %3731 = vmatpush3.bf16.xpose.msra.mxu0 %v979_v21  ;;  %3732 = vmatprep.mubr.msk.bf16.mxu0 %vm4164_vm1, %v4163_v15 }
 0x2aa   :  { %3742 = vmatprep.subr.bf16.mxu0 %v4163_v15 }
 0x2b0   :  { %3733 = vmatmul.mubr.msk.bf16.vlgmr.msra.gmra.mxu0 %vm240_vm3, %v972_v22 }
 0x2b1   :  { %3743 = vmatpush3.bf16.xpose.msra.mxu0 %v1122_v23  ;;  %3744 = vmatprep.mubr.msk.bf16.mxu0 %vm4164_vm1, %v4163_v15 }
 0x2b2   :  { %3754 = vmatprep.subr.bf16.mxu0 %v4163_v15 }
 0x2b8   :  { %3745 = vmatmul.mubr.msk.bf16.vlgmr.msra.gmra.mxu0 %vm240_vm3, %v1115_v24 }
 0x2b9   :  { %3755 = vmatpush3.bf16.xpose.msra.mxu0 %v1264_v25  ;;  %3756 = vmatprep.mubr.msk.bf16.mxu0 %vm4164_vm1, %v4163_v15 }
 0x2ba   :  { %3766 = vmatprep.subr.bf16.mxu0 %v4163_v15 }
 0x2c0   :  { %3757 = vmatmul.mubr.msk.bf16.vlgmr.msra.gmra.mxu0 %vm240_vm3, %v1257_v26 }
 0x2c1   :  { %3770 = vmatprep.mubr.msk.bf16.mxu0 %vm4164_vm1, %v4163_v15 }
 0x2d1   :  { %v294_v53 = vpop.xlane.xlu0 %293 }
 0x2d5   :  { %v1165_v3 = vpop.permute.xlu0 %1164 }
 0x2d6   :  { %v1167_v6 = vsel %vm240_vm3, %v1165_v3, 0.0  ;;  %v121_v3 = vld [vmem:[%s5202_s2 + $0x8] sm:$0xff] }
 0x348   :  { %v281_v30 = vpop.f32.mrf.mxu0 }
 0x349   :  { %v4418_v31 = vadd.f32 %v281_v30, %v118_v29 }
 0x34a   :  { %v3674_v32 = vpop.f32.mrf.mxu0 }
 0x34b   :  { %v296_v34 = vsel %vm240_vm3, %v4418_v31, -inf }
 0x34c   :  { %297 = vmax.xlane.f32.xlu1 %v296_v34  ;;  %v284_v35 = vpop.f32.mrf.mxu0 }
 0x34e   :  { %v3675_v36 = vpop.f32.mrf.mxu0 }
 0x350   :  { %v427_v37 = vpop.f32.mrf.mxu0 }
 0x351   :  { %v4422_v38 = vadd.f32 %v427_v37, %v118_v29 }
 0x352   :  { %v3686_v39 = vpop.f32.mrf.mxu0 }
 0x353   :  { %v441_v40 = vsel %vm240_vm3, %v4422_v38, -inf  ;;  %v120_v39 = vld [vmem:[%s5202_s2] sm:$0xff] }
 0x354   :  { %442 = vmax.xlane.f32.xlu0 %v441_v40  ;;  %v430_v42 = vpop.f32.mrf.mxu0  ;;  %v4463_v40 = vadd.f32 %v294_v53, %v120_v39 }
 0x356   :  { %v3687_v43 = vpop.f32.mrf.mxu0 }
 0x358   :  { %580 = vadd.xlane.f32.xlu0 %v579_v44  ;;  %v570_v47 = vpop.f32.mrf.mxu0  ;;  %v439_v44 = vpop.xlane.xlu0 %438 }
 0x359   :  { %v4427_v48 = vadd.f32 %v570_v47, %v118_v29  ;;  %v440_v45 = vadd.f32 %v439_v44, %v120_v39 }
 0x35a   :  { %v3698_v49 = vpop.f32.mrf.mxu0 }
 0x35b   :  { %v583_v51 = vsel %vm240_vm3, %v4427_v48, -inf }
 0x35c   :  { %722 = vadd.xlane.f32.xlu0 %v721_v50  ;;  %584 = vmax.xlane.f32.xlu1 %v583_v51  ;;  %v573_v52 = vpop.f32.mrf.mxu0 }
 0x35e   :  { %v3699_v55 = vpop.f32.mrf.mxu0 }
 0x360   :  { %882 = vadd.xlane.f32.xlu0 %v881_v57  ;;  %v712_v59 = vpop.f32.mrf.mxu0 }
 0x361   :  { %v4434_v60 = vadd.f32 %v712_v59, %v118_v29 }
 0x362   :  { %v3710_v62 = vpop.f32.mrf.mxu0 }
 0x363   :  { %v725_v2 = vsel %vm240_vm3, %v4434_v60, -inf }
 0x364   :  { %1026 = vadd.xlane.f32.xlu0 %v1025_v1  ;;  %726 = vmax.xlane.f32.xlu1 %v725_v2  ;;  %v715_v4 = vpop.f32.mrf.mxu0 }
 0x366   :  { %v3711_v5 = vpop.f32.mrf.mxu0 }
 0x368   :  { %1168 = vadd.xlane.f32.xlu0 %v1167_v6  ;;  %v870_v8 = vpop.f32.mrf.mxu0 }
 0x369   :  { %v4443_v9 = vadd.f32 %v870_v8, %v119_v0 }
 0x36a   :  { %v3722_v10 = vpop.f32.mrf.mxu0 }
 0x36b   :  { %v885_v12 = vsel %vm240_vm3, %v4443_v9, -inf }
 0x36c   :  { %1310 = vadd.xlane.f32.xlu0 %v1309_v11  ;;  %886 = vmax.xlane.f32.xlu1 %v885_v12  ;;  %v873_v13 = vpop.f32.mrf.mxu0 }
 0x36e   :  { %v3723_v14 = vpop.f32.mrf.mxu0 }
 0x370   :  { %v1015_v16 = vpop.f32.mrf.mxu0 }
 0x371   :  { %v4448_v17 = vadd.f32 %v1015_v16, %v119_v0 }
 0x372   :  { %v3734_v18 = vpop.f32.mrf.mxu0 }
 0x373   :  { %v1029_v19 = vsel %vm240_vm3, %v4448_v17, -inf }
 0x374   :  { %1030 = vmax.xlane.f32.xlu1 %v1029_v19  ;;  %v1018_v20 = vpop.f32.mrf.mxu0 }
 0x376   :  { %v3735_v21 = vpop.f32.mrf.mxu0 }
 0x378   :  { %v1158_v22 = vpop.f32.mrf.mxu0 }
 0x379   :  { %v4452_v23 = vadd.f32 %v1158_v22, %v119_v0 }
 0x37a   :  { %v3746_v24 = vpop.f32.mrf.mxu0 }
 0x37b   :  { %v1171_v25 = vsel %vm240_vm3, %v4452_v23, -inf }
 0x37c   :  { %1172 = vmax.xlane.f32.xlu1 %v1171_v25  ;;  %v1161_v26 = vpop.f32.mrf.mxu0 }
 0x37e   :  { %v3747_v29 = vpop.f32.mrf.mxu0 }
 0x380   :  { %v1300_v30 = vpop.f32.mrf.mxu0 }
 0x381   :  { %v4456_v32 = vadd.f32 %v1300_v30, %v119_v0 }
 0x382   :  { %v3758_v34 = vpop.f32.mrf.mxu0 }
 0x383   :  { %v1313_v35 = vsel %vm240_vm3, %v4456_v32, -inf }
 0x384   :  { %1314 = vmax.xlane.f32.xlu1 %v1313_v35  ;;  %v1303_v36 = vpop.f32.mrf.mxu0 }
 0x386   :  { %v3759_v37 = vpop.f32.mrf.mxu0 }
 0x3d5   :  { %v298_v41 = vpop.xlane.xlu1 %297 }
 0x3d6   :  { %v4466_v42 = vmax.f32 %v298_v41, %v4463_v40 }
 0x3d8   :  { %v308_v43 = vsub.f32 %v4463_v40, %v4466_v42  ;;  %302 = vperm.xlu0 %3968, %v4466_v42  }
 0x3dc   :  { %752 = vrot.lane.b32.xlu0 %v4324_v54, %s5219_s25 }
 0x3dd   :  { %v443_v46 = vpop.xlane.xlu0 %442 }
 0x3de   :  { %v444_v47 = vmax.f32 %v443_v46, %v440_v45 }
 0x3e0   :  { %v453_v49 = vsub.f32 %v440_v45, %v444_v47  ;;  %912 = vrot.lane.b32.xlu0 %v4336_v56, %s4174_s4  ;;  %447 = vperm.xlu1 %3969, %v444_v47  }
 0x3e1   :  { %v581_v50 = vpop.xlane.xlu0 %580 }
 0x3e2   :  { %v454_v51 = vmul.f32 1.442695, %v453_v49  ;;  %v582_v52 = vadd.f32 %v581_v50, %v120_v39 }
 0x3e4   :  { %4035 = vpow2.f32 %v454_v51  ;;  %1056 = vrot.lane.b32.xlu0 %v4336_v56, %s4175_s20 }
 0x3e5   :  { %v585_v53 = vpop.xlane.xlu1 %584  ;;  %v723_v57 = vpop.xlane.xlu0 %722 }
 0x3e6   :  { %v586_v55 = vmax.f32 %v585_v53, %v582_v52  ;;  %v4479_v58 = vadd.f32 %v723_v57, %v120_v39 }
 0x3e8   :  { %1340 = vrot.lane.b32.xlu0 %v4336_v56, %s5219_s25  ;;  %589 = vperm.xlu1 %3969, %v586_v55   ;;  %v595_v14 = vsub.f32 %v582_v52, %v586_v55 }
 0x3e9   :  { %v883_v4 = vpop.xlane.xlu0 %882 }
 0x3ea   :  { %v4495_v5 = vadd.f32 %v883_v4, %v121_v3  ;;  %v596_v19 = vmul.f32 1.442695, %v595_v14 }
 0x3ec   :  { %323 = vrot.lane.b32.xlu1 %v4324_v54, %s4174_s4  ;;  %4037 = vpow2.f32 %v596_v19 }
 0x3ed   :  { %v727_v59 = vpop.xlane.xlu1 %726  ;;  %v1027_v8 = vpop.xlane.xlu0 %1026 }
 0x3ee   :  { %v4484_v62 = vmax.f32 %v727_v59, %v4479_v58  ;;  %v1028_v10 = vadd.f32 %v1027_v8, %v121_v3 }
 0x3f0   :  { %v737_v1 = vsub.f32 %v4479_v58, %v4484_v62  ;;  %731 = vperm.xlu1 %3969, %v4484_v62   ;;  %v309_v58 = vmul.f32 1.442695, %v308_v43 }
 0x3f1   :  { %v4489_v2 = vpop.eup %4035  ;;  %v1169_v13 = vpop.xlane.xlu0 %1168 }
 0x3f2   :  { %464 = vperm.xlu0 %3968, %v4489_v2   ;;  %v1170_v16 = vadd.f32 %v1169_v13, %v121_v3 }
 0x3f4   :  { %468 = vrot.lane.b32.xlu1 %v4324_v54, %s4175_s20 }
 0x3f5   :  { %v887_v0 = vpop.xlane.xlu1 %886  ;;  %v1311_v24 = vpop.xlane.xlu0 %1310 }
 0x3f6   :  { %v4500_v6 = vmax.f32 %v887_v0, %v4495_v5  ;;  %v4507_v29 = vadd.f32 %v1311_v24, %v121_v3 }
 0x3f8   :  { %v897_v7 = vsub.f32 %v4495_v5, %v4500_v6  ;;  %891 = vperm.xlu1 %3969, %v4500_v6  }
 0x3f9   :  { %v4517_v35 = vpop.eup %4037 }
 0x3fa   :  { %v898_v62 = vmul.f32 1.442695, %v897_v7 }
 0x3fc   :  { %610 = vrot.lane.b32.xlu1 %v4324_v54, %s5221_s21 }
 0x3fd   :  { %v1031_v11 = vpop.xlane.xlu1 %1030 }
 0x3fe   :  { %v1032_v12 = vmax.f32 %v1031_v11, %v1028_v10 }
 0x400   :  { %1035 = vperm.xlu1 %3969, %v1032_v12   ;;  %v1041_v20 = vsub.f32 %v1028_v10, %v1032_v12 }
 0x402   :  { %v1042_v25 = vmul.f32 1.442695, %v1041_v20 }
 0x405   :  { %v1173_v18 = vpop.xlane.xlu1 %1172 }
 0x406   :  { %v1174_v21 = vmax.f32 %v1173_v18, %v1170_v16 }
 0x408   :  { %v1183_v22 = vsub.f32 %v1170_v16, %v1174_v21  ;;  %1177 = vperm.xlu1 %3969, %v1174_v21  }
 0x40a   :  { %v1184_v26 = vmul.f32 1.442695, %v1183_v22 }
 0x40c   :  { %4039 = vpow2.f32 %v1184_v26 }
 0x40d   :  { %v1315_v54 = vpop.xlane.xlu1 %1314  ;;  %4041 = vpow2.f32 %v1042_v25 }
 0x40e   :  { %v4510_v30 = vmax.f32 %v1315_v54, %v4507_v29 }
 0x410   :  { %v1325_v34 = vsub.f32 %v4507_v29, %v4510_v30  ;;  %1319 = vperm.xlu1 %3969, %v4510_v30  }
 0x414   :  { %1198 = vrot.lane.b32.xlu1 %v4336_v56, %s5221_s21 }
 0x418   :  { %606 = vperm.xlu1 %3969, %v4517_v35  }
 0x419   :  { %v4520_v36 = vpop.eup %4039 }
 0x41a   :  { %1194 = vperm.xlu0 %3968, %v4520_v36   ;;  %v4523_v37 = vpop.eup %4041 }
 0x41c   :  { %1052 = vperm.xlu1 %3969, %v4523_v37  }
 0x453   :  { %v303_v39 = vpop.permute.xlu0 %302 }
 0x454   :  { %v305_v41 = vsub.f32 %v4418_v31, %v303_v39 }
 0x456   :  { %v306_v44 = vmul.f32 1.442695, %v305_v41 }
 0x457   :  { %v753_v16 = vpop.permute.xlu0 %752 }
 0x458   :  { %4043 = vpow2.f32 %v306_v44  ;;  %v762_v19 = vsel %vm332_vm4, %v753_v16, 0 }
 0x45b   :  { %v448_v45 = vpop.permute.xlu1 %447  ;;  %v913_v25 = vpop.permute.xlu0 %912 }
 0x45c   :  { %v450_v56 = vsub.f32 %v4422_v38, %v448_v45  ;;  %v922_v39 = vsel %vm332_vm4, %v913_v25, 0 }
 0x45e   :  { %v451_v46 = vmul.f32 1.442695, %v450_v56 }
 0x45f   :  { %v1057_v45 = vpop.permute.xlu0 %1056 }
 0x460   :  { %4045 = vpow2.f32 %v451_v46 }
 0x463   :  { %v590_v47 = vpop.permute.xlu1 %589 }
 0x464   :  { %v592_v49 = vsub.f32 %v4427_v48, %v590_v47  ;;  %v1066_v47 = vsel %vm332_vm4, %v1057_v45, 0 }
 0x465   :  { %v4529_v51 = vpop.eup %4043 }
 0x466   :  { %v593_v50 = vmul.f32 1.442695, %v592_v49  ;;  %v316_v31 = vpack.c.bf16 %v4529_v51, %v4529_v51 }
 0x467   :  { %v324_v52 = vpop.permute.xlu1 %323 }
 0x468   :  { %4047 = vpow2.f32 %v593_v50  ;;  %v334_v53 = vsel %vm332_vm4, %v324_v52, 0 }
 0x469   :  { %3677 = vmatpush3.bf16.msra.mxu1 %v334_v53 }
 0x46a   :  { %3688 = vmatprep.subr.bf16.mxu1 %v4163_v15 }
 0x46b   :  { %v732_v38 = vpop.permute.xlu1 %731 }
 0x46c   :  { %v734_v55 = vsub.f32 %v4434_v60, %v732_v38  ;;  %3679 = vmatmul.mubr.msk.bf16.vlgmr.msra.gmra.mxu1 %vm240_vm3, %v316_v31 }
 0x46d   :  { %v4046_v48 = vpop.eup %4045  ;;  %3690 = vmatprep.mubr.msk.bf16.mxu1 %vm4164_vm1, %v4163_v15 }
 0x46e   :  { %v735_v57 = vmul.f32 1.442695, %v734_v55  ;;  %v456_v59 = vsel %vm240_vm3, %v4046_v48, 0.0  ;;  %v461_v0 = vpack.c.bf16 %v4046_v48, %v4046_v48 }
 0x46f   :  { %457 = vadd.xlane.f32.xlu1 %v456_v59  ;;  %v469_v3 = vpop.permute.xlu1 %468 }
 0x470   :  { %4049 = vpow2.f32 %v735_v57  ;;  %v478_v4 = vsel %vm332_vm4, %v469_v3, 0  ;;  %v1341_v57 = vpop.permute.xlu0 %1340 }
 0x471   :  { %3689 = vmatpush3.bf16.msra.mxu1 %v478_v4  ;;  %v1350_v29 = vsel %vm332_vm4, %v1341_v57, 0 }
 0x472   :  { %3700 = vmatprep.subr.bf16.mxu1 %v4163_v15 }
 0x473   :  { %v892_v8 = vpop.permute.xlu1 %891 }
 0x474   :  { %v894_v60 = vsub.f32 %v4443_v9, %v892_v8  ;;  %3691 = vmatmul.mubr.msk.bf16.vlgmr.msra.gmra.mxu1 %vm240_vm3, %v461_v0 }
 0x475   :  { %v4048_v10 = vpop.eup %4047  ;;  %3702 = vmatprep.mubr.msk.bf16.mxu1 %vm4164_vm1, %v4163_v15 }
 0x476   :  { %v895_v11 = vmul.f32 1.442695, %v894_v60  ;;  %v598_v12 = vsel %vm240_vm3, %v4048_v10, 0.0  ;;  %v603_v18 = vpack.c.bf16 %v4048_v10, %v4048_v10  ;;  %v311_v10 = vsel %vm240_vm3, %v4529_v51, 0.0 }
 0x477   :  { %599 = vadd.xlane.f32.xlu0 %v598_v12  ;;  %v611_v13 = vpop.permute.xlu1 %610  ;;  %v465_v12 = vpop.permute.xlu0 %464 }
 0x478   :  { %v620_v14 = vsel %vm332_vm4, %v611_v13, 0  ;;  %4051 = vpow2.f32 %v895_v11  ;;  %v467_v6 = vmul.f32 %v465_v12, %v4350_v61 }
 0x479   :  { %3701 = vmatpush3.bf16.msra.mxu1 %v620_v14 }
 0x47a   :  { %3712 = vmatprep.subr.bf16.mxu1 %v4163_v15 }
 0x47b   :  { %v1036_v9 = vpop.permute.xlu1 %1035 }
 0x47c   :  { %v1038_v20 = vsub.f32 %v4448_v17, %v1036_v9  ;;  %3703 = vmatmul.mubr.msk.bf16.vlgmr.msra.gmra.mxu1 %vm240_vm3, %v603_v18 }
 0x47d   :  { %v4050_v21 = vpop.eup %4049  ;;  %3713 = vmatpush3.bf16.msra.mxu1 %v762_v19  ;;  %3714 = vmatprep.mubr.msk.bf16.mxu1 %vm4164_vm1, %v4163_v15 }
 0x47e   :  { %v1039_v22 = vmul.f32 1.442695, %v1038_v20  ;;  %v740_v24 = vsel %vm240_vm3, %v4050_v21, 0.0  ;;  %3724 = vmatprep.subr.bf16.mxu1 %v4163_v15  ;;  %v745_v26 = vpack.c.bf16 %v4050_v21, %v4050_v21 }
 0x47f   :  { %741 = vadd.xlane.f32.xlu0 %v740_v24 }
 0x480   :  { %4053 = vpow2.f32 %v1039_v22 }
 0x483   :  { %v1178_v54 = vpop.permute.xlu1 %1177 }
 0x484   :  { %v1180_v17 = vsub.f32 %v4452_v23, %v1178_v54  ;;  %3715 = vmatmul.mubr.msk.bf16.vlgmr.msra.gmra.mxu1 %vm240_vm3, %v745_v26 }
 0x485   :  { %3725 = vmatpush3.bf16.msra.mxu1 %v922_v39  ;;  %3726 = vmatprep.mubr.msk.bf16.mxu1 %vm4164_vm1, %v4163_v15  ;;  %v4052_v44 = vpop.eup %4051 }
 0x486   :  { %v1181_v41 = vmul.f32 1.442695, %v1180_v17  ;;  %3736 = vmatprep.subr.bf16.mxu1 %v4163_v15  ;;  %v905_v56 = vpack.c.bf16 %v4052_v44, %v4052_v44  ;;  %v900_v60 = vsel %vm240_vm3, %v4052_v44, 0.0 }
 0x488   :  { %4055 = vpow2.f32 %v1181_v41 }
 0x48b   :  { %v1320_v46 = vpop.permute.xlu1 %1319 }
 0x48c   :  { %v1322_v49 = vsub.f32 %v4456_v32, %v1320_v46  ;;  %3727 = vmatmul.mubr.msk.bf16.vlgmr.msra.gmra.mxu1 %vm240_vm3, %v905_v56  ;;  %v1326_v32 = vmul.f32 1.442695, %v1325_v34  ;;  %v738_v34 = vmul.f32 1.442695, %v737_v1 }
 0x48d   :  { %v4054_v23 = vpop.eup %4053  ;;  %3737 = vmatpush3.bf16.msra.mxu1 %v1066_v47  ;;  %3738 = vmatprep.mubr.msk.bf16.mxu1 %vm4164_vm1, %v4163_v15 }
 0x48e   :  { %v1323_v50 = vmul.f32 1.442695, %v1322_v49  ;;  %v1044_v52 = vsel %vm240_vm3, %v4054_v23, 0.0  ;;  %3748 = vmatprep.subr.bf16.mxu1 %v4163_v15  ;;  %v1049_v31 = vpack.c.bf16 %v4054_v23, %v4054_v23 }
 0x48f   :  { %1045 = vadd.xlane.f32.xlu0 %v1044_v52  ;;  %v1199_v53 = vpop.permute.xlu1 %1198 }
 0x490   :  { %4057 = vpow2.f32 %v1323_v50  ;;  %v1208_v38 = vsel %vm332_vm4, %v1199_v53, 0 }
 0x491   :  { %4059 = vpow2.f32 %v1326_v32 }
 0x492   :  { %4061 = vpow2.f32 %v738_v34 }
 0x493   :  { %4063 = vpow2.f32 %v309_v58  ;;  %v607_v1 = vpop.permute.xlu1 %606 }
 0x494   :  { %3739 = vmatmul.mubr.msk.bf16.vlgmr.msra.gmra.mxu1 %vm240_vm3, %v1049_v31  ;;  %4065 = vpow2.f32 %v898_v62  ;;  %v609_v7 = vmul.f32 %v607_v1, %v4350_v61 }
 0x495   :  { %v4056_v55 = vpop.eup %4055  ;;  %3749 = vmatpush3.bf16.msra.mxu1 %v1208_v38  ;;  %3750 = vmatprep.mubr.msk.bf16.mxu1 %vm4164_vm1, %v4163_v15  ;;  %v1195_v42 = vpop.permute.xlu0 %1194 }
 0x496   :  { %v1186_v48 = vsel %vm240_vm3, %v4056_v55, 0.0  ;;  %3760 = vmatprep.subr.bf16.mxu1 %v4163_v15  ;;  %v1191_v59 = vpack.c.bf16 %v4056_v55, %v4056_v55  ;;  %v1197_v43 = vmul.f32 %v1195_v42, %v4361_v63 }
 0x497   :  { %1187 = vadd.xlane.f32.xlu1 %v1186_v48  ;;  %v1053_v13 = vpop.permute.xlu1 %1052 }
 0x498   :  { %v1055_v40 = vmul.f32 %v1053_v13, %v4361_v63 }
 0x49c   :  { %3751 = vmatmul.mubr.msk.bf16.vlgmr.msra.gmra.mxu1 %vm240_vm3, %v1191_v59 }
 0x49d   :  { %v4058_v30 = vpop.eup %4057  ;;  %3761 = vmatpush3.bf16.msra.mxu1 %v1350_v29  ;;  %3762 = vmatprep.mubr.msk.bf16.mxu1 %vm4164_vm1, %v4163_v15 }
 0x49e   :  { %v1328_v3 = vsel %vm240_vm3, %v4058_v30, 0.0  ;;  %3774 = vmatprep.subr.bf16.mxu1 %v4163_v15  ;;  %v1333_v4 = vpack.c.bf16 %v4058_v30, %v4058_v30  ;;  %v4060_v0 = vpop.eup %4059 }
 0x49f   :  { %1329 = vadd.xlane.f32.xlu1 %v1328_v3  ;;  %v4062_v8 = vpop.eup %4061 }
 0x4a0   :  { %v4599_v11 = vpop.eup %4063 }
 0x4a1   :  { %v4066_v5 = vpop.eup %4065 }
 0x4a4   :  { %3763 = vmatmul.mubr.msk.bf16.vlgmr.msra.gmra.mxu1 %vm240_vm3, %v1333_v4 }
 0x4a5   :  { %1336 = vperm.xlu0 %3968, %v4060_v0   ;;  %3778 = vmatprep.mubr.msk.bf16.mxu1 %vm4164_vm1, %v4163_v15 }
 0x4b0   :  { %748 = vperm.xlu1 %3969, %v4062_v8  }
 0x4c4   :  { %901 = vadd.xlane.f32.xlu0 %v900_v60 }
 0x4d4   :  { %312 = vadd.xlane.f32.xlu1 %v311_v10 }
 0x4da   :  { %319 = vperm.xlu0 %3968, %v4599_v11  }
 0x4de   :  { %1059 = vrot.lane.b32.xlu0 %v1055_v40, %s4165_s27 }
 0x4e2   :  { %1201 = vrot.lane.b32.xlu0 %v1197_v43, %s4169_s30 }
 0x4e5   :  { %908 = vperm.xlu1 %3969, %v4066_v5  }
 0x4e9   :  { %471 = vrot.lane.b32.xlu1 %v467_v6, %s4165_s27 }
 0x4ed   :  { %613 = vrot.lane.b32.xlu1 %v609_v7, %s4169_s30 }
 0x4f8   :  { %v458_v51 = vpop.xlane.xlu1 %457 }
 0x4f9   :  { %v459_v14 = vadd.f32 %v4489_v2, %v458_v51 }
 0x4fb   :  { %4067 = vrcp.f32 %v459_v14 }
 0x500   :  { %v600_v16 = vpop.xlane.xlu0 %599 }
 0x501   :  { %v601_v18 = vadd.f32 %v4517_v35, %v600_v16 }
 0x503   :  { %4069 = vrcp.f32 %v601_v18 }
 0x508   :  { %v4068_v9 = vpop.eup %4067  ;;  %v742_v19 = vpop.xlane.xlu0 %741 }
 0x509   :  { %v743_v20 = vadd.f32 %v4062_v8, %v742_v19  ;;  %522 = vperm.xlu1 %3969, %v4068_v9  }
 0x50b   :  { %4071 = vrcp.f32 %v743_v20 }
 0x510   :  { %v4070_v21 = vpop.eup %4069 }
 0x511   :  { %664 = vperm.xlu1 %3969, %v4070_v21  }
 0x518   :  { %v4072_v22 = vpop.eup %4071  ;;  %v1046_v24 = vpop.xlane.xlu0 %1045 }
 0x519   :  { %v1047_v25 = vadd.f32 %v4523_v37, %v1046_v24  ;;  %806 = vperm.xlu1 %3969, %v4072_v22  }
 0x51b   :  { %4073 = vrcp.f32 %v1047_v25 }
 0x520   :  { %v1188_v26 = vpop.xlane.xlu1 %1187  ;;  %v1337_v23 = vpop.permute.xlu0 %1336 }
 0x521   :  { %v1189_v2 = vadd.f32 %v4520_v36, %v1188_v26  ;;  %v1339_v53 = vmul.f32 %v1337_v23, %v4361_v63 }
 0x523   :  { %4075 = vrcp.f32 %v1189_v2 }
 0x528   :  { %v4074_v54 = vpop.eup %4073  ;;  %v1330_v35 = vpop.xlane.xlu1 %1329 }
 0x529   :  { %v1331_v39 = vadd.f32 %v4060_v0, %v1330_v35  ;;  %1110 = vperm.xlu0 %3968, %v4074_v54  }
 0x52b   :  { %4077 = vrcp.f32 %v1331_v39 }
 0x52c   :  { %v4614_v17 = vpop.f32.mrf.mxu1  ;;  %v749_v41 = vpop.permute.xlu1 %748 }
 0x52d   :  { %v751_v44 = vmul.f32 %v749_v41, %v4350_v61 }
 0x52e   :  { %v3680_v45 = vpop.f32.mrf.mxu1 }
 0x52f   :  { %755 = vrot.lane.b32.xlu1 %v751_v44, %s4171_s19  ;;  %v4003_v44 = vld [vmem:[%s5203_s9 + $0x8] sm:$0xff]  }
 0x530   :  { %v4076_v37 = vpop.eup %4075  ;;  %v373_v56 = vpop.f32.mrf.mxu1  ;;  %3767 = vmatpush3.bf16.msra.mxu0 %v4003_v44 }
 0x531   :  { %1252 = vperm.xlu0 %3968, %v4076_v37   ;;  %3768 = vmatprep.subr.bf16.mxu0 %v4163_v15 }
 0x532   :  { %v3681_v46 = vpop.f32.mrf.mxu1 }
 0x534   :  { %v514_v47 = vpop.f32.mrf.mxu1 }
 0x536   :  { %v3692_v36 = vpop.f32.mrf.mxu1 }
 0x538   :  { %v4078_v49 = vpop.eup %4077  ;;  %v517_v50 = vpop.f32.mrf.mxu1 }
 0x539   :  { %1394 = vperm.xlu0 %3968, %v4078_v49   ;;  %v4004_v50 = vld [vmem:[%s5203_s9] sm:$0xff]  }
 0x53a   :  { %v3693_v52 = vpop.f32.mrf.mxu1  ;;  %3769 = vmatpush3.bf16.msra.mxu0 %v4004_v50 }
 0x53b   :  { %3782 = vmatprep.subr.bf16.mxu0 %v4163_v15 }
 0x53c   :  { %v656_v31 = vpop.f32.mrf.mxu1 }
 0x53d   :  { %1343 = vrot.lane.b32.xlu0 %v1339_v53, %s4171_s19 }
 0x53e   :  { %v3704_v32 = vpop.f32.mrf.mxu1 }
 0x540   :  { %v659_v38 = vpop.f32.mrf.mxu1 }
 0x542   :  { %v3705_v55 = vpop.f32.mrf.mxu1 }
 0x544   :  { %v4620_v48 = vpop.f32.mrf.mxu1 }
 0x546   :  { %v3716_v57 = vpop.f32.mrf.mxu1 }
 0x548   :  { %v801_v59 = vpop.f32.mrf.mxu1 }
 0x54a   :  { %v3717_v29 = vpop.f32.mrf.mxu1 }
 0x54c   :  { %v4622_v30 = vpop.f32.mrf.mxu1 }
 0x54d   :  { %v902_v34 = vpop.xlane.xlu0 %901 }
 0x54e   :  { %v903_v3 = vadd.f32 %v4066_v5, %v902_v34  ;;  %v3728_v4 = vpop.f32.mrf.mxu1 }
 0x550   :  { %4079 = vrcp.f32 %v903_v3  ;;  %v961_v0 = vpop.f32.mrf.mxu1 }
 0x552   :  { %v3729_v8 = vpop.f32.mrf.mxu1 }
 0x554   :  { %v1102_v60 = vpop.f32.mrf.mxu1 }
 0x555   :  { %v320_v19 = vpop.permute.xlu0 %319 }
 0x556   :  { %v3740_v58 = vpop.f32.mrf.mxu1  ;;  %v322_v20 = vmul.f32 %v320_v19, %v4350_v61 }
 0x558   :  { %v1105_v62 = vpop.f32.mrf.mxu1 }
 0x559   :  { %v1060_v21 = vpop.permute.xlu0 %1059 }
 0x55a   :  { %v3741_v1 = vpop.f32.mrf.mxu1  ;;  %v1103_v26 = vadd.f32 %v1102_v60, %v1060_v21 }
 0x55c   :  { %v1244_v10 = vpop.f32.mrf.mxu1 }
 0x55d   :  { %v4080_v12 = vpop.eup %4079  ;;  %v313_v13 = vpop.xlane.xlu1 %312 }
 0x55e   :  { %v314_v40 = vadd.f32 %v4599_v11, %v313_v13  ;;  %v3752_v42 = vpop.f32.mrf.mxu1  ;;  %966 = vperm.xlu0 %3968, %v4080_v12   ;;  %v1202_v24 = vpop.permute.xlu0 %1201 }
 0x55f   :  { %v1245_v37 = vadd.f32 %v1244_v10, %v1202_v24 }
 0x560   :  { %4081 = vrcp.f32 %v314_v40  ;;  %v1247_v43 = vpop.f32.mrf.mxu1 }
 0x561   :  { %v909_v6 = vpop.permute.xlu1 %908 }
 0x562   :  { %v911_v5 = vmul.f32 %v909_v6, %v4361_v63  ;;  %v3753_v7 = vpop.f32.mrf.mxu1 }
 0x564   :  { %v1386_v51 = vpop.f32.mrf.mxu1  ;;  %915 = vrot.lane.b32.xlu0 %v911_v5, %s4166_s28 }
 0x565   :  { %v472_v11 = vpop.permute.xlu1 %471 }
 0x566   :  { %v3764_v14 = vpop.f32.mrf.mxu1  ;;  %v515_v2 = vadd.f32 %v514_v47, %v472_v11 }
 0x568   :  { %v1389_v16 = vpop.f32.mrf.mxu1 }
 0x569   :  { %v614_v22 = vpop.permute.xlu1 %613 }
 0x56a   :  { %v3765_v18 = vpop.f32.mrf.mxu1  ;;  %v657_v56 = vadd.f32 %v656_v31, %v614_v22  ;;  %v4156_v22 = vld [vmem:[%s5225_s26 + $0x8] sm:$0xff] }
 0x56b   :  { %v3464_v18 = vld [vmem:[%s5204_s10] ss:$0 sm:$0xff] }
 0x56d   :  { %v4082_v9 = vpop.eup %4081 }
 0x56e   :  { %378 = vperm.xlu1 %3969, %v4082_v9   ;;  %v4155_v9 = vld [vmem:[%s5225_s26] sm:$0xff] }
 0x572   :  { %326 = vrot.lane.b32.xlu1 %v322_v20, %s4166_s28 }
 0x584   :  { %v523_v25 = vpop.permute.xlu1 %522 }
 0x585   :  { %v525_v35 = vmul.f32 %v523_v25, %v515_v2 }
 0x58c   :  { %v665_v45 = vpop.permute.xlu1 %664 }
 0x58d   :  { %v667_v36 = vmul.f32 %v665_v45, %v657_v56 }
 0x594   :  { %v807_v23 = vpop.permute.xlu1 %806 }
 0x5a1   :  { %v756_v52 = vpop.permute.xlu1 %755 }
 0x5a2   :  { %v799_v32 = vadd.f32 %v4620_v48, %v756_v52 }
 0x5a4   :  { %v1111_v54 = vpop.permute.xlu0 %1110  ;;  %v809_v55 = vmul.f32 %v807_v23, %v799_v32  ;;  %v4006_v23 = vld [vmem:[%s5205_s11] sm:$0xff]  }
 0x5a5   :  { %v1113_v39 = vmul.f32 %v1111_v54, %v1103_v26 }
 0x5a7   :  { %v3970_v41 = vpack.i.bf16 %v1113_v39, %v525_v35 }
 0x5a9   :  { %3971 = vrot.lane.b32.xlu1 %v3970_v41, %s5213_s24 }
 0x5ac   :  { %v1253_v46 = vpop.permute.xlu0 %1252 }
 0x5ad   :  { %v1255_v47 = vmul.f32 %v1253_v46, %v1245_v37 }
 0x5af   :  { %v3975_v49 = vpack.i.bf16 %v1255_v47, %v667_v36 }
 0x5b1   :  { %3976 = vrot.lane.b32.xlu0 %v3975_v49, %s5215_s5  ;;  %v4005_v49 = vld [vmem:[%s5205_s11 + $0x8] sm:$0xff]  }
 0x5b2   :  { %3775 = vmatpush3.bf16.msra.mxu1 %v4005_v49 }
 0x5b3   :  { %3776 = vmatprep.subr.bf16.mxu1 %v4163_v15 }
 0x5b4   :  { %v1395_v53 = vpop.permute.xlu0 %1394 }
 0x5b6   :  { %3777 = vmatpush3.bf16.msra.mxu1 %v4006_v23  ;;  %v3477_v23 = vld [vmem:[%s5208_s14] ss:$0 sm:$0xff] }
 0x5b7   :  { %3802 = vmatprep.subr.bf16.mxu1 %v4163_v15 }
 0x5b8   :  { %v1344_v31 = vpop.permute.xlu0 %1343 }
 0x5b9   :  { %v1387_v38 = vadd.f32 %v1386_v51, %v1344_v31 }
 0x5bb   :  { %v1397_v57 = vmul.f32 %v1395_v53, %v1387_v38 }
 0x5bd   :  { %v3980_v59 = vpack.i.bf16 %v1397_v57, %v809_v55  ;;  %v1513_v55 = vsub.s32 2, %v4305_v27 }
 0x5bf   :  { %3981 = vrot.lane.b32.xlu1 %v3980_v59, %s5217_s23 }
 0x5d9   :  { %v967_v34 = vpop.permute.xlu0 %966 }
 0x5dd   :  { %v916_v4 = vpop.permute.xlu0 %915 }
 0x5de   :  { %v959_v8 = vadd.f32 %v4622_v30, %v916_v4 }
 0x5e0   :  { %v969_v12 = vmul.f32 %v967_v34, %v959_v8 }
 0x5e9   :  { %v379_v29 = vpop.permute.xlu1 %378 }
 0x5ed   :  { %v327_v3 = vpop.permute.xlu1 %326 }
 0x5ee   :  { %v371_v60 = vadd.f32 %v4614_v17, %v327_v3  ;;  %v1519_v3 = vsub.s32 3, %v4305_v27  ;;  %v4022_v27 = vld [vmem:[%s5206_s13 + $0x70] sm:$0xff]  }
 0x5f0   :  { %v381_v13 = vmul.f32 %v379_v29, %v371_v60  ;;  %v4157_v29 = vld [vmem:[%s5198_s6] sm:$0xf] }
 0x5f1   :  { %v1514_v34 = vrot.slane %v4157_v29, %v1513_v55  ;;  %v1520_v60 = vrot.slane %v4157_v29, %v1519_v3 }
 0x61b   :  { %v3972_v0 = vpop.permute.xlu1 %3971 }
 0x61c   :  { %v3974_v62 = vunpack.i.h.bf16 %v3972_v0  ;;  %v3973_v48 = vunpack.i.l.bf16 %v3972_v0 }
 0x61e   :  { %v1410_v42 = vsel %vm240_vm3, %v969_v12, %v3974_v62  ;;  %v822_v43 = vsel %vm240_vm3, %v381_v13, %v3973_v48  ;;  %v4008_v12 = vld [vmem:[%s5206_s13 + $0x30] sm:$0xff]   ;;  %v4009_v13 = vld [vmem:[%s5206_s13 + $0x28] sm:$0xff]  }
 0x623   :  { %v3977_v58 = vpop.permute.xlu0 %3976 }
 0x624   :  { %v3979_v1 = vunpack.i.h.bf16 %v3977_v58  ;;  %v3978_v10 = vunpack.i.l.bf16 %v3977_v58 }
 0x626   :  { %v823_v7 = vsel %vm74_vm2, %v822_v43, %v3978_v10  ;;  %v1411_v30 = vsel %vm74_vm2, %v1410_v42, %v3979_v1  ;;  %v4007_v10 = vld [vmem:[%s5206_s13 + $0x38] sm:$0xff]   ;;  %v4012_v43 = vld [vmem:[%s5206_s13 + $0x10] sm:$0xff]  }
 0x627   :  { %v4011_v42 = vld [vmem:[%s5206_s13 + $0x18] sm:$0xff]  }
 0x631   :  { %v3982_v40 = vpop.permute.xlu1 %3981 }
 0x632   :  { %v3984_v6 = vunpack.i.h.bf16 %v3982_v40  ;;  %v3983_v5 = vunpack.i.l.bf16 %v3982_v40  ;;  %v4010_v40 = vld [vmem:[%s5206_s13 + $0x20] sm:$0xff]  }
 0x634   :  { %v825_v17 = vsel %vm824_vm5, %v823_v7, %v3983_v5  ;;  %v1412_v51 = vsel %vm824_vm5, %v1411_v30, %v3984_v6  ;;  %v4013_v6 = vld [vmem:[%s5206_s13 + $0x8] sm:$0xff]   ;;  %v4014_v5 = vld [vmem:[%s5206_s13] sm:$0xff]  }
 0x635   :  { %v1417_v14 = vpack.c.bf16 %v1412_v51, %v825_v17  ;;  %v3465_v7 = vld [vmem:[%s5207_s12] ss:$0 sm:$0xff] }
 0x637   :  { %3771 = vmatmul.mubr.msk.bf16.vlgmr.msra.gmra.mxu0 %vm125_vm0, %v1417_v14 }
 0x638   :  { %3798 = vmatprep.mubr.msk.bf16.mxu0 %vm4164_vm1, %v4163_v15  ;;  %3783 = vmatpush3.bf16.msra.mxu0 %v4007_v10  ;;  %v4016_v10 = vld [vmem:[%s5197_s7 + $0x10] sm:$0xff]  }
 0x639   :  { %3784 = vmatprep.subr.bf16.mxu0 %v4163_v15 }
 0x63c   :  { %3785 = vmatpush3.bf16.msra.mxu0 %v4008_v12 }
 0x63d   :  { %3786 = vmatprep.subr.bf16.mxu0 %v4163_v15 }
 0x640   :  { %3787 = vmatpush3.bf16.msra.mxu0 %v4009_v13 }
 0x641   :  { %3788 = vmatprep.subr.bf16.mxu0 %v4163_v15 }
 0x644   :  { %3789 = vmatpush3.bf16.msra.mxu0 %v4010_v40 }
 0x645   :  { %3790 = vmatprep.subr.bf16.mxu0 %v4163_v15 }
 0x648   :  { %3791 = vmatpush3.bf16.msra.mxu0 %v4011_v42 }
 0x649   :  { %3792 = vmatprep.subr.bf16.mxu0 %v4163_v15 }
 0x64c   :  { %3793 = vmatpush3.bf16.msra.mxu0 %v4012_v43 }
 0x64d   :  { %3794 = vmatprep.subr.bf16.mxu0 %v4163_v15 }
 0x650   :  { %3795 = vmatpush3.bf16.msra.mxu0 %v4013_v6 }
 0x651   :  { %3796 = vmatprep.subr.bf16.mxu0 %v4163_v15 }
 0x654   :  { %3797 = vmatpush3.bf16.msra.mxu0 %v4014_v5  ;;  %v3478_v5 = vld [vmem:[%s5198_s6 + $0x4] sm:$0xf] }
 0x655   :  { %3828 = vmatprep.subr.bf16.mxu0 %v4163_v15 }
 0x6f7   :  { %v1467_v16 = vpop.f32.mrf.mxu0 }
 0x6f8   :  { %v1474_v19 = vadd.f32 %v4155_v9, %v1467_v16 }
 0x6f9   :  { %v3772_v20 = vpop.f32.mrf.mxu0 }
 0x6fa   :  { %v4658_v11 = vadd.f32 %v3464_v18, %v1474_v19 }
 0x6fb   :  { %v1470_v21 = vpop.f32.mrf.mxu0 }
 0x6fc   :  { %v1475_v24 = vadd.f32 %v4156_v22, %v1470_v21  ;;  %v1485_v25 = vsel %vm125_vm0, %v4658_v11, 0.0 }
 0x6fd   :  { %1486 = vadd.xlane.f32.xlu0 %v1485_v25  ;;  %v3773_v26 = vpop.f32.mrf.mxu0 }
 0x6fe   :  { %v4665_v2 = vadd.f32 %v3464_v18, %v1475_v24 }
 0x700   :  { %v1488_v54 = vsel %vm125_vm0, %v4665_v2, 0.0 }
 0x701   :  { %1489 = vadd.xlane.f32.xlu1 %v1488_v54 }
 0x786   :  { %v1487_v35 = vpop.xlane.xlu0 %1486 }
 0x787   :  { %v1491_v39 = vmul.f32 0.03125, %v1487_v35 }
 0x789   :  { %v1493_v41 = vsub.f32 %v4658_v11, %v1491_v39 }
 0x78a   :  { %v1490_v44 = vpop.xlane.xlu1 %1489 }
 0x78b   :  { %v1492_v45 = vmul.f32 0.03125, %v1490_v44  ;;  %v1495_v37 = vmul.f32 %v1493_v41, %v1493_v41 }
 0x78d   :  { %v1494_v56 = vsub.f32 %v4665_v2, %v1492_v45  ;;  %v1497_v46 = vsel %vm125_vm0, %v1495_v37, 0.0 }
 0x78e   :  { %1498 = vadd.xlane.f32.xlu0 %v1497_v46 }
 0x78f   :  { %v1496_v36 = vmul.f32 %v1494_v56, %v1494_v56 }
 0x791   :  { %v1500_v47 = vsel %vm125_vm0, %v1496_v36, 0.0 }
 0x792   :  { %1501 = vadd.xlane.f32.xlu0 %v1500_v47 }
 0x817   :  { %v1499_v50 = vpop.xlane.xlu0 %1498 }
 0x818   :  { %v1503_v52 = vmul.f32 0.03125, %v1499_v50 }
 0x81a   :  { %v1505_v53 = vadd.f32 1e-05, %v1503_v52 }
 0x81b   :  { %v1502_v32 = vpop.xlane.xlu0 %1501 }
 0x81c   :  { %4083 = vrsqrt.f32 %v1505_v53  ;;  %v1504_v31 = vmul.f32 0.03125, %v1502_v32 }
 0x81e   :  { %v1506_v38 = vadd.f32 1e-05, %v1504_v31 }
 0x820   :  { %4085 = vrsqrt.f32 %v1506_v38 }
 0x829   :  { %v4084_v57 = vpop.eup %4083 }
 0x82a   :  { %v1509_v59 = vmul.f32 %v4084_v57, %v1493_v41 }
 0x82c   :  { %v1515_v8 = vmul.f32 %v1514_v34, %v1509_v59 }
 0x82d   :  { %v4086_v4 = vpop.eup %4085 }
 0x82e   :  { %v1510_v0 = vmul.f32 %v4086_v4, %v1494_v56  ;;  %v1521_v62 = vadd.f32 %v1520_v60, %v1515_v8 }
 0x830   :  { %v1516_v58 = vmul.f32 %v1514_v34, %v1510_v0 }
 0x832   :  { %v1522_v48 = vadd.f32 %v1520_v60, %v1516_v58 }
 0x834   :  { %v1527_v1 = vpack.c.bf16 %v1522_v48, %v1521_v62 }
 0x836   :  { %3779 = vmatmul.mubr.msk.bf16.vlgmr.msra.gmra.mxu1 %vm125_vm0, %v1527_v1  ;;  %v4015_v1 = vld [vmem:[%s5197_s7 + $0x18] sm:$0xff]  }
 0x837   :  { %3806 = vmatprep.mubr.msk.bf16.mxu1 %vm4164_vm1, %v4163_v15  ;;  %3803 = vmatpush3.bf16.msra.mxu1 %v4015_v1 }
 0x838   :  { %3804 = vmatprep.subr.bf16.mxu1 %v4163_v15 }
 0x83b   :  { %3805 = vmatpush3.bf16.msra.mxu1 %v4016_v10 }
 0x83c   :  { %3810 = vmatprep.subr.bf16.mxu1 %v4163_v15 }
 0x8f6   :  { %v1584_v30 = vpop.f32.mrf.mxu1 }
 0x8f7   :  { %v1585_v17 = vadd.f32 %v3465_v7, %v1584_v30 }
 0x8f8   :  { %v3780_v51 = vpop.f32.mrf.mxu1 }
 0x8f9   :  { %v1593_v14 = vmul.f32 0.044715, %v1585_v17  ;;  %v1591_v45 = vmul.f32 0.5, %v1585_v17 }
 0x8fa   :  { %v1587_v16 = vpop.f32.mrf.mxu1 }
 0x8fb   :  { %v1595_v18 = vmul.f32 %v1593_v14, %v1585_v17  ;;  %v1588_v9 = vadd.f32 %v3465_v7, %v1587_v16 }
 0x8fc   :  { %v3781_v19 = vpop.f32.mrf.mxu1 }
 0x8fd   :  { %v1597_v20 = vmul.f32 %v1595_v18, %v1585_v17  ;;  %v1594_v21 = vmul.f32 0.044715, %v1588_v9  ;;  %v1592_v37 = vmul.f32 0.5, %v1588_v9  ;;  %v1763_v18 = vrot.slane %v3478_v5, %v4315_v33 }
 0x8ff   :  { %v1599_v22 = vadd.f32 %v1597_v20, %v1585_v17  ;;  %v1596_v24 = vmul.f32 %v1594_v21, %v1588_v9  ;;  %v1757_v17 = vrot.slane %v3478_v5, %v4308_v28 }
 0x901   :  { %v1601_v25 = vmul.f32 0.7978846, %v1599_v22  ;;  %v1598_v26 = vmul.f32 %v1596_v24, %v1588_v9  ;;  %v3484_v24 = vld [vmem:[%s5199_s8 + $0x1] ss:$0 sm:$0xff] }
 0x903   :  { %4087 = vtanh.f32 %v1601_v25  ;;  %v1600_v54 = vadd.f32 %v1598_v26, %v1588_v9 }
 0x905   :  { %v1602_v35 = vmul.f32 0.7978846, %v1600_v54 }
 0x907   :  { %4089 = vtanh.f32 %v1602_v35 }
 0x910   :  { %v4088_v39 = vpop.eup %4087 }
 0x911   :  { %v1605_v41 = vadd.f32 1.0, %v4088_v39 }
 0x913   :  { %v1607_v46 = vmul.f32 %v1605_v41, %v1591_v45 }
 0x914   :  { %v4090_v44 = vpop.eup %4089 }
 0x915   :  { %v1606_v56 = vadd.f32 1.0, %v4090_v44 }
 0x917   :  { %v1608_v36 = vmul.f32 %v1606_v56, %v1592_v37 }
 0x919   :  { %v1625_v47 = vpack.c.bf16 %v1608_v36, %v1607_v46 }
 0x91b   :  { %3799 = vmatmul.mubr.bf16.vlgmr.msra.gmra.mxu0 %v1625_v47 }
 0x91c   :  { %3830 = vmatprep.mubr.msk.bf16.mxu0 %vm4164_vm1, %v4163_v15 }
 0x9db   :  { %v1708_v49 = vpop.f32.mrf.mxu0 }
 0x9dc   :  { %v1715_v50 = vadd.f32 %v1708_v49, %v4658_v11 }
 0x9dd   :  { %v3800_v52 = vpop.f32.mrf.mxu0 }
 0x9de   :  { %v4734_v53 = vadd.f32 %v3477_v23, %v1715_v50 }
 0x9df   :  { %v1711_v32 = vpop.f32.mrf.mxu0 }
 0x9e0   :  { %v1716_v31 = vadd.f32 %v1711_v32, %v4665_v2  ;;  %v1728_v38 = vsel %vm125_vm0, %v4734_v53, 0.0 }
 0x9e1   :  { %1729 = vadd.xlane.f32.xlu1 %v1728_v38  ;;  %v3801_v57 = vpop.f32.mrf.mxu0 }
 0x9e2   :  { %v4739_v59 = vadd.f32 %v3477_v23, %v1716_v31  ;;  %v4781_v23 = vld [vmem:[%s5201_s3] sm:$0xff] }
 0x9e4   :  { %v1731_v29 = vsel %vm125_vm0, %v4739_v59, 0.0 }
 0x9e5   :  { %1732 = vadd.xlane.f32.xlu0 %v1731_v29 }
 0xa6a   :  { %v1730_v34 = vpop.xlane.xlu1 %1729 }
 0xa6b   :  { %v1734_v4 = vmul.f32 0.03125, %v1730_v34 }
 0xa6d   :  { %v1736_v11 = vsub.f32 %v4734_v53, %v1734_v4 }
 0xa6e   :  { %v1733_v0 = vpop.xlane.xlu0 %1732 }
 0xa6f   :  { %v1735_v8 = vmul.f32 0.03125, %v1733_v0  ;;  %v1738_v60 = vmul.f32 %v1736_v11, %v1736_v11 }
 0xa71   :  { %v1737_v2 = vsub.f32 %v4739_v59, %v1735_v8  ;;  %v1740_v58 = vsel %vm125_vm0, %v1738_v60, 0.0 }
 0xa72   :  { %1741 = vadd.xlane.f32.xlu1 %v1740_v58 }
 0xa73   :  { %v1739_v62 = vmul.f32 %v1737_v2, %v1737_v2 }
 0xa75   :  { %v1743_v48 = vsel %vm125_vm0, %v1739_v62, 0.0 }
 0xa76   :  { %1744 = vadd.xlane.f32.xlu0 %v1743_v48 }
 0xa8c   :  { %1890 = vrot.lane.b32.xlu0 %v4350_v61, %s4174_s4 }
 0xafb   :  { %v1742_v12 = vpop.xlane.xlu1 %1741 }
 0xafc   :  { %v1746_v13 = vmul.f32 0.03125, %v1742_v12 }
 0xafe   :  { %v1748_v40 = vadd.f32 1e-05, %v1746_v13 }
 0xaff   :  { %v1745_v42 = vpop.xlane.xlu0 %1744 }
 0xb00   :  { %4091 = vrsqrt.f32 %v1748_v40  ;;  %v1747_v43 = vmul.f32 0.03125, %v1745_v42 }
 0xb02   :  { %v1749_v6 = vadd.f32 1e-05, %v1747_v43 }
 0xb03   :  { %v1891_v45 = vpop.permute.xlu0 %1890 }
 0xb04   :  { %4093 = vrsqrt.f32 %v1749_v6 }
 0xb0d   :  { %v4092_v7 = vpop.eup %4091 }
 0xb0e   :  { %v1752_v30 = vmul.f32 %v4092_v7, %v1736_v11  ;;  %v4809_v11 = vld [vmem:[%s5202_s2] sm:$0xff] }
 0xb10   :  { %v1758_v16 = vmul.f32 %v1757_v17, %v1752_v30 }
 0xb11   :  { %v4094_v51 = vpop.eup %4093 }
 0xb12   :  { %v1753_v14 = vmul.f32 %v4094_v51, %v1737_v2  ;;  %v1764_v19 = vadd.f32 %v1763_v18, %v1758_v16 }
 0xb14   :  { %v1759_v9 = vmul.f32 %v1757_v17, %v1753_v14 }
 0xb16   :  { %v1765_v20 = vadd.f32 %v1763_v18, %v1759_v9 }
 0xb18   :  { %v1771_v21 = vpack.c.bf16 %v1765_v20, %v1764_v19 }
 0xb1a   :  { %3807 = vmatmul.mubr.msk.bf16.vlgmr.msra.gmra.mxu1 %vm125_vm0, %v1771_v21 }
 0xb1b   :  { %3812 = vmatprep.mubr.msk.bf16.mxu1 %vm4164_vm1, %v4163_v15 }
 0xbda   :  { %v1829_v22 = vpop.f32.mrf.mxu1 }
 0xbdb   :  { %v1830_v54 = vadd.f32 %v3484_v24, %v1829_v22 }
 0xbdc   :  { %v3808_v25 = vpop.f32.mrf.mxu1 }
 0xbdd   :  { %v1836_v44 = vmul.f32 0.35355338, %v1830_v54 }
 0xbde   :  { %v1832_v26 = vpop.f32.mrf.mxu1 }
 0xbdf   :  { %v1833_v35 = vadd.f32 %v3484_v24, %v1832_v26  ;;  %v1893_v37 = vmul.f32 %v1891_v45, %v1836_v44  ;;  %v1839_v47 = vpack.c.bf16 %v1836_v44, %v1836_v44 }
 0xbe0   :  { %v3809_v39 = vpop.f32.mrf.mxu1 }
 0xbe1   :  { %v4768_v41 = vpack.c.bf16 %v1833_v35, %v1830_v54  ;;  %v1894_v56 = vsel %vm240_vm3, %v1893_v37, 0.0  ;;  %v1837_v57 = vmul.f32 0.35355338, %v1833_v35 }
 0xbe3   :  { %1841 = vrot.lane.b32.xlu1 %v4768_v41, %s4166_s28  ;;  %v4792_v29 = vrot.slane %v4768_v41, 4  ;;  %v4796_v34 = vpack.c.bf16 %v1837_v57, %v1837_v57 }
 0xc07   :  { %1895 = vadd.xlane.f32.xlu1 %v1894_v56 }
 0xc55   :  { %v1842_v46 = vpop.permute.xlu1 %1841 }
 0xc56   :  { %v1847_v36 = vsel %vm240_vm3, %v1842_v46, 0 }
 0xc57   :  { %3811 = vmatpush3.bf16.xpose.msra.mxu1 %v1847_v36 }
 0xc58   :  { %3816 = vmatprep.subr.bf16.mxu1 %v4163_v15 }
 0xc5e   :  { %3813 = vmatmul.mubr.msk.bf16.vlgmr.msra.gmra.mxu1 %vm240_vm3, %v1839_v47 }
 0xc5f   :  { %3818 = vmatprep.mubr.msk.bf16.mxu1 %vm4164_vm1, %v4163_v15 }
 0xc90   :  { %v1896_v4 = vpop.xlane.xlu1 %1895 }
 0xc91   :  { %v4812_v0 = vadd.f32 %v4809_v11, %v1896_v4 }
 0xd1e   :  { %v1883_v49 = vpop.f32.mrf.mxu1 }
 0xd1f   :  { %v1884_v50 = vadd.f32 %v4781_v23, %v1883_v49 }
 0xd20   :  { %v3814_v52 = vpop.f32.mrf.mxu1 }
 0xd21   :  { %v1898_v32 = vsel %vm240_vm3, %v1884_v50, -inf }
 0xd22   :  { %1899 = vmax.xlane.f32.xlu0 %v1898_v32  ;;  %v1886_v31 = vpop.f32.mrf.mxu1 }
 0xd24   :  { %v3815_v38 = vpop.f32.mrf.mxu1 }
 0xd38   :  { %1925 = vrot.lane.b32.xlu0 %v4768_v41, %s4174_s4 }
 0xd3c   :  { %2129 = vrot.lane.b32.xlu0 %v4768_v41, %s4169_s30 }
 0xd40   :  { %2271 = vrot.lane.b32.xlu0 %v4768_v41, %s4171_s19 }
 0xd44   :  { %2428 = vrot.lane.b32.xlu0 %v4792_v29, %s4166_s28 }
 0xd48   :  { %2571 = vrot.lane.b32.xlu0 %v4796_v34, %s4167_s29 }
 0xd4c   :  { %2714 = vrot.lane.b32.xlu0 %v4796_v34, %s4168_s1 }
 0xd50   :  { %2856 = vrot.lane.b32.xlu0 %v4796_v34, %s4170_s18 }
 0xd54   :  { %2035 = vrot.lane.b32.xlu0 %v1893_v37, %s4167_s29 }
 0xd58   :  { %2319 = vrot.lane.b32.xlu0 %v1893_v37, %s4170_s18 }
 0xdab   :  { %v1900_v8 = vpop.xlane.xlu0 %1899 }
 0xdac   :  { %v4815_v60 = vmax.f32 %v1900_v8, %v4812_v0 }
 0xdae   :  { %v1910_v2 = vsub.f32 %v4812_v0, %v4815_v60  ;;  %1904 = vperm.xlu1 %3969, %v4815_v60  }
 0xdaf   :  { %v1926_v58 = vpop.permute.xlu0 %1925 }
 0xdb0   :  { %v1935_v62 = vsel %vm332_vm4, %v1926_v58, 0 }
 0xdb1   :  { %3817 = vmatpush3.bf16.msra.mxu1 %v1935_v62 }
 0xdb2   :  { %1986 = vrot.lane.b32.xlu1 %v4768_v41, %s4165_s27  ;;  %3822 = vmatprep.subr.bf16.mxu1 %v4163_v15 }
 0xdb3   :  { %v2130_v17 = vpop.permute.xlu0 %2129 }
 0xdb4   :  { %v2135_v14 = vsel %vm240_vm3, %v2130_v17, 0 }
 0xdb6   :  { %1984 = vrot.lane.b32.xlu1 %v1839_v47, %s4167_s29 }
 0xdb7   :  { %v2272_v16 = vpop.permute.xlu0 %2271 }
 0xdb8   :  { %v2277_v19 = vsel %vm240_vm3, %v2272_v16, 0 }
 0xdba   :  { %2127 = vrot.lane.b32.xlu1 %v1839_v47, %s4168_s1 }
 0xdbb   :  { %v2429_v20 = vpop.permute.xlu0 %2428 }
 0xdbc   :  { %v2434_v22 = vsel %vm240_vm3, %v2429_v20, 0 }
 0xdbe   :  { %2269 = vrot.lane.b32.xlu1 %v1839_v47, %s4170_s18 }
 0xdbf   :  { %v2572_v21 = vpop.permute.xlu0 %2571 }
 0xdc2   :  { %2573 = vrot.lane.b32.xlu1 %v4792_v29, %s4165_s27 }
 0xdc3   :  { %v2715_v24 = vpop.permute.xlu0 %2714 }
 0xdc6   :  { %2716 = vrot.lane.b32.xlu1 %v4792_v29, %s4169_s30  ;;  %s5229_s30 = smov 24  }
 0xdc7   :  { %v2857_v26 = vpop.permute.xlu0 %2856 }
 0xdca   :  { %2858 = vrot.lane.b32.xlu1 %v4792_v29, %s4171_s19  ;;  %s5231_s19 = smov 8  }
 0xdcb   :  { %v2036_v35 = vpop.permute.xlu0 %2035 }
 0xdcc   :  { %v2038_v39 = vsel %vm240_vm3, %v2036_v35, 0.0 }
 0xdce   :  { %2477 = vrot.lane.b32.xlu1 %v4361_v63, %s4174_s4 }
 0xdcf   :  { %v2320_v31 = vpop.permute.xlu0 %2319 }
 0xdd2   :  { %2177 = vrot.lane.b32.xlu1 %v1893_v37, %s4168_s1 }
 0xe29   :  { %v1905_v48 = vpop.permute.xlu1 %1904 }
 0xe2a   :  { %v1907_v1 = vsub.f32 %v1884_v50, %v1905_v48 }
 0xe2c   :  { %v1908_v10 = vmul.f32 1.442695, %v1907_v1 }
 0xe2d   :  { %v1987_v12 = vpop.permute.xlu1 %1986 }
 0xe2e   :  { %4095 = vpow2.f32 %v1908_v10  ;;  %v1992_v7 = vsel %vm240_vm3, %v1987_v12, 0 }
 0xe31   :  { %v1985_v13 = vpop.permute.xlu1 %1984 }
 0xe35   :  { %v2128_v40 = vpop.permute.xlu1 %2127 }
 0xe39   :  { %v2270_v42 = vpop.permute.xlu1 %2269 }
 0xe3b   :  { %v4836_v43 = vpop.eup %4095 }
 0xe3c   :  { %v1918_v6 = vpack.c.bf16 %v4836_v43, %v4836_v43 }
 0xe3d   :  { %v2574_v5 = vpop.permute.xlu1 %2573 }
 0xe3e   :  { %3819 = vmatmul.mubr.msk.bf16.vlgmr.msra.gmra.mxu1 %vm240_vm3, %v1918_v6  ;;  %v2579_v25 = vsel %vm240_vm3, %v2574_v5, 0 }
 0xe3f   :  { %3823 = vmatpush3.bf16.xpose.msra.mxu1 %v1992_v7  ;;  %3824 = vmatprep.mubr.msk.bf16.mxu1 %vm4164_vm1, %v4163_v15 }
 0xe40   :  { %3834 = vmatprep.subr.bf16.mxu1 %v4163_v15 }
 0xe41   :  { %v2717_v30 = vpop.permute.xlu1 %2716 }
 0xe42   :  { %v2722_v54 = vsel %vm240_vm3, %v2717_v30, 0 }
 0xe45   :  { %v2859_v51 = vpop.permute.xlu1 %2858 }
 0xe46   :  { %3825 = vmatmul.mubr.msk.bf16.vlgmr.msra.gmra.mxu1 %vm240_vm3, %v1985_v13  ;;  %v2864_v45 = vsel %vm240_vm3, %v2859_v51, 0 }
 0xe47   :  { %3835 = vmatpush3.bf16.xpose.msra.mxu1 %v2135_v14  ;;  %3836 = vmatprep.mubr.msk.bf16.mxu1 %vm4164_vm1, %v4163_v15 }
 0xe48   :  { %3846 = vmatprep.subr.bf16.mxu1 %v4163_v15 }
 0xe49   :  { %v2478_v18 = vpop.permute.xlu1 %2477 }
 0xe4a   :  { %v2480_v9 = vmul.f32 %v2478_v18, %v1837_v57 }
 0xe4c   :  { %2764 = vrot.lane.b32.xlu0 %v2480_v9, %s4168_s1  ;;  %2622 = vrot.lane.b32.xlu1 %v2480_v9, %s4167_s29  ;;  %v2481_v48 = vsel %vm240_vm3, %v2480_v9, 0.0  ;;  %s5227_s1 = smov 48  }
 0xe4d   :  { %v2178_v44 = vpop.permute.xlu1 %2177 }
 0xe4e   :  { %3837 = vmatmul.mubr.msk.bf16.vlgmr.msra.gmra.mxu1 %vm240_vm3, %v2128_v40  ;;  %v2180_v37 = vsel %vm240_vm3, %v2178_v44, 0.0 }
 0xe4f   :  { %3847 = vmatpush3.bf16.xpose.msra.mxu1 %v2277_v19  ;;  %3848 = vmatprep.mubr.msk.bf16.mxu1 %vm4164_vm1, %v4163_v15 }
 0xe50   :  { %2906 = vrot.lane.b32.xlu1 %v2480_v9, %s4170_s18  ;;  %3858 = vmatprep.subr.bf16.mxu1 %v4163_v15  ;;  %s5230_s18 = smov 16  }
 0xe56   :  { %3849 = vmatmul.mubr.msk.bf16.vlgmr.msra.gmra.mxu1 %vm240_vm3, %v2270_v42 }
 0xe57   :  { %3859 = vmatpush3.bf16.xpose.msra.mxu1 %v2434_v22  ;;  %3860 = vmatprep.mubr.msk.bf16.mxu1 %vm4164_vm1, %v4163_v15 }
 0xe58   :  { %3870 = vmatprep.subr.bf16.mxu1 %v4163_v15 }
 0xe5e   :  { %3861 = vmatmul.mubr.msk.bf16.vlgmr.msra.gmra.mxu1 %vm240_vm3, %v4796_v34  ;;  %v2322_v34 = vsel %vm240_vm3, %v2320_v31, 0.0 }
 0xe5f   :  { %3871 = vmatpush3.bf16.xpose.msra.mxu1 %v2579_v25  ;;  %3872 = vmatprep.mubr.msk.bf16.mxu1 %vm4164_vm1, %v4163_v15 }
 0xe60   :  { %3882 = vmatprep.subr.bf16.mxu1 %v4163_v15 }
 0xe66   :  { %3873 = vmatmul.mubr.msk.bf16.vlgmr.msra.gmra.mxu1 %vm240_vm3, %v2572_v21 }
 0xe67   :  { %3883 = vmatpush3.bf16.xpose.msra.mxu1 %v2722_v54  ;;  %3884 = vmatprep.mubr.msk.bf16.mxu1 %vm4164_vm1, %v4163_v15 }
 0xe68   :  { %3894 = vmatprep.subr.bf16.mxu1 %v4163_v15 }
 0xe6b   :  { %2039 = vadd.xlane.f32.xlu0 %v2038_v39 }
 0xe6e   :  { %3885 = vmatmul.mubr.msk.bf16.vlgmr.msra.gmra.mxu1 %vm240_vm3, %v2715_v24 }
 0xe6f   :  { %3895 = vmatpush3.bf16.xpose.msra.mxu1 %v2864_v45  ;;  %2181 = vadd.xlane.f32.xlu0 %v2180_v37 }
 0xe70   :  { %3896 = vmatprep.mubr.msk.bf16.mxu1 %vm4164_vm1, %v4163_v15  ;;  %3906 = vmatprep.subr.bf16.mxu1 %v4163_v15 }
 0xe76   :  { %3897 = vmatmul.mubr.msk.bf16.vlgmr.msra.gmra.mxu1 %vm240_vm3, %v2857_v26 }
 0xe77   :  { %3910 = vmatprep.mubr.msk.bf16.mxu1 %vm4164_vm1, %v4163_v15 }
 0xebe   :  { %v2623_v1 = vpop.permute.xlu1 %2622  ;;  %v2765_v40 = vpop.permute.xlu0 %2764 }
 0xebf   :  { %v2625_v13 = vsel %vm240_vm3, %v2623_v1, 0.0  ;;  %v2767_v7 = vsel %vm240_vm3, %v2765_v40, 0.0 }
 0xec2   :  { %v2907_v17 = vpop.permute.xlu1 %2906 }
 0xec3   :  { %v2909_v16 = vsel %vm240_vm3, %v2907_v17, 0.0  ;;  %v4161_v17 = vld [vmem:[%s5202_s2 + $0x8] sm:$0xff]  ;;  %s5228_s2 = smov 40  }
 0xefe   :  { %v4884_v56 = vpop.f32.mrf.mxu1 }
 0xf00   :  { %v3820_v46 = vpop.f32.mrf.mxu1 }
 0xf02   :  { %v1974_v36 = vpop.f32.mrf.mxu1 }
 0xf04   :  { %v3821_v47 = vpop.f32.mrf.mxu1 }
 0xf06   :  { %v2028_v49 = vpop.f32.mrf.mxu1 }
 0xf07   :  { %v4887_v50 = vadd.f32 %v4781_v23, %v2028_v49 }
 0xf08   :  { %v3826_v52 = vpop.f32.mrf.mxu1 }
 0xf09   :  { %v2042_v32 = vsel %vm240_vm3, %v4887_v50, -inf }
 0xf0a   :  { %2043 = vmax.xlane.f32.xlu1 %v2042_v32  ;;  %v2031_v38 = vpop.f32.mrf.mxu1 }
 0xf0c   :  { %v3827_v57 = vpop.f32.mrf.mxu1 }
 0xf0e   :  { %v2171_v4 = vpop.f32.mrf.mxu1  ;;  %2323 = vadd.xlane.f32.xlu1 %v2322_v34  ;;  %v2040_v34 = vpop.xlane.xlu0 %2039 }
 0xf0f   :  { %v4893_v8 = vadd.f32 %v4781_v23, %v2171_v4  ;;  %v2041_v4 = vadd.f32 %v4809_v11, %v2040_v34 }
 0xf10   :  { %v3838_v58 = vpop.f32.mrf.mxu1 }
 0xf11   :  { %v2184_v62 = vsel %vm240_vm3, %v4893_v8, -inf }
 0xf12   :  { %v2174_v10 = vpop.f32.mrf.mxu1  ;;  %2185 = vmax.xlane.f32.xlu0 %v2184_v62  ;;  %2482 = vadd.xlane.f32.xlu1 %v2481_v48  ;;  %v2182_v48 = vpop.xlane.xlu0 %2181 }
 0xf13   :  { %v2183_v1 = vadd.f32 %v4809_v11, %v2182_v48 }
 0xf14   :  { %v3839_v12 = vpop.f32.mrf.mxu1 }
 0xf16   :  { %v2313_v42 = vpop.f32.mrf.mxu1  ;;  %2626 = vadd.xlane.f32.xlu1 %v2625_v13 }
 0xf17   :  { %v4900_v6 = vadd.f32 %v4781_v23, %v2313_v42  ;;  %v4160_v23 = vld [vmem:[%s5201_s3 + $0x8] sm:$0xff] }
 0xf18   :  { %v3850_v5 = vpop.f32.mrf.mxu1 }
 0xf19   :  { %v2326_v30 = vsel %vm240_vm3, %v4900_v6, -inf }
 0xf1a   :  { %v2316_v51 = vpop.f32.mrf.mxu1  ;;  %2327 = vmax.xlane.f32.xlu0 %v2326_v30  ;;  %2768 = vadd.xlane.f32.xlu1 %v2767_v7 }
 0xf1c   :  { %v3851_v14 = vpop.f32.mrf.mxu1 }
 0xf1e   :  { %v2470_v18 = vpop.f32.mrf.mxu1  ;;  %2910 = vadd.xlane.f32.xlu1 %v2909_v16 }
 0xf1f   :  { %v4909_v9 = vadd.f32 %v4160_v23, %v2470_v18 }
 0xf20   :  { %v3862_v19 = vpop.f32.mrf.mxu1 }
 0xf21   :  { %v2485_v20 = vsel %vm240_vm3, %v4909_v9, -inf }
 0xf22   :  { %v2473_v21 = vpop.f32.mrf.mxu1  ;;  %2486 = vmax.xlane.f32.xlu0 %v2485_v20 }
 0xf24   :  { %v3863_v22 = vpop.f32.mrf.mxu1 }
 0xf26   :  { %v2615_v24 = vpop.f32.mrf.mxu1 }
 0xf27   :  { %v4913_v25 = vadd.f32 %v4160_v23, %v2615_v24 }
 0xf28   :  { %v3874_v26 = vpop.f32.mrf.mxu1 }
 0xf29   :  { %v2629_v54 = vsel %vm240_vm3, %v4913_v25, -inf }
 0xf2a   :  { %v2618_v35 = vpop.f32.mrf.mxu1  ;;  %2630 = vmax.xlane.f32.xlu0 %v2629_v54 }
 0xf2c   :  { %v3875_v39 = vpop.f32.mrf.mxu1 }
 0xf2e   :  { %v2758_v44 = vpop.f32.mrf.mxu1 }
 0xf2f   :  { %v4917_v45 = vadd.f32 %v4160_v23, %v2758_v44 }
 0xf30   :  { %v3886_v37 = vpop.f32.mrf.mxu1 }
 0xf31   :  { %v2771_v46 = vsel %vm240_vm3, %v4917_v45, -inf }
 0xf32   :  { %v2761_v36 = vpop.f32.mrf.mxu1  ;;  %2772 = vmax.xlane.f32.xlu0 %v2771_v46 }
 0xf34   :  { %v3887_v47 = vpop.f32.mrf.mxu1 }
 0xf36   :  { %v2900_v49 = vpop.f32.mrf.mxu1 }
 0xf37   :  { %v4921_v52 = vadd.f32 %v4160_v23, %v2900_v49 }
 0xf38   :  { %v3898_v32 = vpop.f32.mrf.mxu1 }
 0xf39   :  { %v2913_v31 = vsel %vm240_vm3, %v4921_v52, -inf }
 0xf3a   :  { %v2903_v38 = vpop.f32.mrf.mxu1  ;;  %2914 = vmax.xlane.f32.xlu0 %v2913_v31 }
 0xf3c   :  { %v3899_v57 = vpop.f32.mrf.mxu1 }
 0xf93   :  { %v2044_v58 = vpop.xlane.xlu1 %2043 }
 0xf94   :  { %v2045_v62 = vmax.f32 %v2044_v58, %v2041_v4 }
 0xf96   :  { %2048 = vperm.xlu1 %3969, %v2045_v62   ;;  %v2054_v14 = vsub.f32 %v2041_v4, %v2045_v62 }
 0xf97   :  { %v2324_v13 = vpop.xlane.xlu1 %2323 }
 0xf98   :  { %v4928_v40 = vadd.f32 %v4809_v11, %v2324_v13  ;;  %v2055_v19 = vmul.f32 1.442695, %v2054_v14 }
 0xf9a   :  { %4097 = vpow2.f32 %v2055_v19 }
 0xf9b   :  { %v2186_v10 = vpop.xlane.xlu0 %2185  ;;  %v2483_v30 = vpop.xlane.xlu1 %2482 }
 0xf9c   :  { %v2187_v12 = vmax.f32 %v2186_v10, %v2183_v1  ;;  %v4939_v51 = vadd.f32 %v4161_v17, %v2483_v30 }
 0xf9e   :  { %2190 = vperm.xlu0 %3968, %v2187_v12   ;;  %v2196_v20 = vsub.f32 %v2183_v1, %v2187_v12 }
 0xf9f   :  { %v2627_v23 = vpop.xlane.xlu1 %2626 }
 0xfa0   :  { %v2628_v21 = vadd.f32 %v4161_v17, %v2627_v23  ;;  %v2197_v24 = vmul.f32 1.442695, %v2196_v20 }
 0xfa2   :  { %4099 = vpow2.f32 %v2197_v24 }
 0xfa3   :  { %v2328_v42 = vpop.xlane.xlu0 %2327  ;;  %v2769_v54 = vpop.xlane.xlu1 %2768 }
 0xfa4   :  { %v4931_v5 = vmax.f32 %v2328_v42, %v4928_v40  ;;  %v2770_v39 = vadd.f32 %v4161_v17, %v2769_v54 }
 0xfa6   :  { %v2338_v7 = vsub.f32 %v4928_v40, %v4931_v5  ;;  %2332 = vperm.xlu1 %3969, %v4931_v5   ;;  %v1913_v40 = vsel %vm240_vm3, %v4836_v43, 0.0 }
 0xfa7   :  { %v4959_v49 = vpop.eup %4097 }
 0xfaa   :  { %2069 = vrot.lane.b32.xlu1 %v4768_v41, %s4175_s20 }
 0xfab   :  { %v2487_v11 = vpop.xlane.xlu0 %2486 }
 0xfac   :  { %v4944_v16 = vmax.f32 %v2487_v11, %v4939_v51 }
 0xfae   :  { %v2497_v18 = vsub.f32 %v4939_v51, %v4944_v16  ;;  %2211 = vrot.lane.b32.xlu1 %v4768_v41, %s5227_s1  ;;  %2491 = vperm.xlu0 %3968, %v4944_v16   ;;  %v1911_v51 = vmul.f32 1.442695, %v1910_v2 }
 0xfaf   :  { %v4967_v57 = vpop.eup %4099 }
 0xfb2   :  { %2353 = vrot.lane.b32.xlu1 %v4768_v41, %s5228_s2  ;;  %v2911_v41 = vpop.xlane.xlu1 %2910 }
 0xfb3   :  { %v2631_v22 = vpop.xlane.xlu0 %2630  ;;  %v4961_v32 = vadd.f32 %v4161_v17, %v2911_v41 }
 0xfb4   :  { %v2632_v26 = vmax.f32 %v2631_v22, %v2628_v21 }
 0xfb6   :  { %2512 = vrot.lane.b32.xlu1 %v4792_v29, %s4174_s4  ;;  %2635 = vperm.xlu0 %3968, %v2632_v26   ;;  %v2641_v35 = vsub.f32 %v2628_v21, %v2632_v26  ;;  %s4180_s4 = smov 32  }
 0xfb8   :  { %v2642_v37 = vmul.f32 1.442695, %v2641_v35 }
 0xfba   :  { %2656 = vrot.lane.b32.xlu1 %v4792_v29, %s4175_s20  ;;  %4101 = vpow2.f32 %v2642_v37 }
 0xfbb   :  { %v2773_v44 = vpop.xlane.xlu0 %2772 }
 0xfbc   :  { %v2774_v46 = vmax.f32 %v2773_v44, %v2770_v39 }
 0xfbe   :  { %v2783_v36 = vsub.f32 %v2770_v39, %v2774_v46  ;;  %2940 = vrot.lane.b32.xlu1 %v4792_v29, %s5228_s2  ;;  %2777 = vperm.xlu0 %3968, %v2774_v46  }
 0xfc0   :  { %v2784_v47 = vmul.f32 1.442695, %v2783_v36 }
 0xfc2   :  { %4103 = vpow2.f32 %v2784_v47  ;;  %2065 = vperm.xlu1 %3969, %v4959_v49  }
 0xfc3   :  { %v2915_v31 = vpop.xlane.xlu0 %2914 }
 0xfc4   :  { %v4965_v38 = vmax.f32 %v2915_v31, %v4961_v32 }
 0xfc6   :  { %v2925_v34 = vsub.f32 %v4961_v32, %v4965_v38  ;;  %2207 = vperm.xlu1 %3969, %v4967_v57   ;;  %2919 = vperm.xlu0 %3968, %v4965_v38  }
 0xfc7   :  { %v4975_v4 = vpop.eup %4101 }
 0xfca   :  { %2798 = vrot.lane.b32.xlu0 %v4792_v29, %s5227_s1 }
 0xfce   :  { %2652 = vperm.xlu0 %3968, %v4975_v4  }
 0xfcf   :  { %v4978_v58 = vpop.eup %4103 }
 0xfd0   :  { %2794 = vperm.xlu1 %3969, %v4978_v58  }
0x1011   :  { %v2049_v62 = vpop.permute.xlu1 %2048 }
0x1012   :  { %v2051_v48 = vsub.f32 %v4887_v50, %v2049_v62 }
0x1014   :  { %v2052_v1 = vmul.f32 1.442695, %v2051_v48 }
0x1016   :  { %4105 = vpow2.f32 %v2052_v1 }
0x1019   :  { %v2191_v10 = vpop.permute.xlu0 %2190 }
0x101a   :  { %v2193_v12 = vsub.f32 %v4893_v8, %v2191_v10 }
0x101c   :  { %v2194_v13 = vmul.f32 1.442695, %v2193_v12 }
0x101e   :  { %4107 = vpow2.f32 %v2194_v13 }
0x1021   :  { %v2333_v42 = vpop.permute.xlu1 %2332 }
0x1022   :  { %v2335_v29 = vsub.f32 %v4900_v6, %v2333_v42 }
0x1023   :  { %v4106_v30 = vpop.eup %4105 }
0x1024   :  { %v2336_v17 = vmul.f32 1.442695, %v2335_v29  ;;  %v2057_v11 = vsel %vm240_vm3, %v4106_v30, 0.0  ;;  %v2062_v50 = vpack.c.bf16 %v4106_v30, %v4106_v30  ;;  %v2926_v29 = vmul.f32 1.442695, %v2925_v34 }
0x1025   :  { %v2070_v14 = vpop.permute.xlu1 %2069  ;;  %2058 = vadd.xlane.f32.xlu0 %v2057_v11 }
0x1026   :  { %4109 = vpow2.f32 %v2336_v17  ;;  %v2079_v23 = vsel %vm332_vm4, %v2070_v14, 0 }
0x1027   :  { %3829 = vmatpush3.bf16.msra.mxu0 %v2079_v23 }
0x1028   :  { %3840 = vmatprep.subr.bf16.mxu0 %v4163_v15 }
0x1029   :  { %v2212_v19 = vpop.permute.xlu1 %2211  ;;  %v2492_v8 = vpop.permute.xlu0 %2491 }
0x102a   :  { %v2221_v20 = vsel %vm332_vm4, %v2212_v19, 0  ;;  %v2494_v21 = vsub.f32 %v4909_v9, %v2492_v8  ;;  %3831 = vmatmul.mubr.msk.bf16.vlgmr.msra.gmra.mxu0 %vm240_vm3, %v2062_v50 }
0x102b   :  { %v4108_v6 = vpop.eup %4107  ;;  %3841 = vmatpush3.bf16.msra.mxu0 %v2221_v20  ;;  %3842 = vmatprep.mubr.msk.bf16.mxu0 %vm4164_vm1, %v4163_v15 }
0x102c   :  { %v2495_v22 = vmul.f32 1.442695, %v2494_v21  ;;  %v2199_v24 = vsel %vm240_vm3, %v4108_v6, 0.0  ;;  %3852 = vmatprep.subr.bf16.mxu0 %v4163_v15  ;;  %v2204_v54 = vpack.c.bf16 %v4108_v6, %v4108_v6  ;;  %v2339_v6 = vmul.f32 1.442695, %v2338_v7 }
0x102d   :  { %2200 = vadd.xlane.f32.xlu0 %v2199_v24  ;;  %v2354_v26 = vpop.permute.xlu1 %2353  ;;  %v2498_v24 = vmul.f32 1.442695, %v2497_v18 }
0x102e   :  { %4111 = vpow2.f32 %v2495_v22  ;;  %v2363_v39 = vsel %vm332_vm4, %v2354_v26, 0 }
0x1031   :  { %v2636_v35 = vpop.permute.xlu0 %2635  ;;  %v2513_v36 = vpop.permute.xlu1 %2512 }
0x1032   :  { %v2638_v9 = vsub.f32 %v4913_v25, %v2636_v35  ;;  %3843 = vmatmul.mubr.msk.bf16.vlgmr.msra.gmra.mxu0 %vm240_vm3, %v2204_v54  ;;  %v2522_v31 = vsel %vm332_vm4, %v2513_v36, 0 }
0x1033   :  { %v4110_v44 = vpop.eup %4109  ;;  %3853 = vmatpush3.bf16.msra.mxu0 %v2363_v39  ;;  %3854 = vmatprep.mubr.msk.bf16.mxu0 %vm4164_vm1, %v4163_v15 }
0x1034   :  { %v2639_v37 = vmul.f32 1.442695, %v2638_v9  ;;  %v2341_v46 = vsel %vm240_vm3, %v4110_v44, 0.0  ;;  %3864 = vmatprep.subr.bf16.mxu0 %v4163_v15  ;;  %v2346_v41 = vpack.c.bf16 %v4110_v44, %v4110_v44 }
0x1035   :  { %2342 = vadd.xlane.f32.xlu1 %v2341_v46  ;;  %v2657_v1 = vpop.permute.xlu1 %2656 }
0x1036   :  { %4113 = vpow2.f32 %v2639_v37  ;;  %v2666_v13 = vsel %vm332_vm4, %v2657_v1, 0 }
0x1039   :  { %v2778_v47 = vpop.permute.xlu0 %2777  ;;  %v2941_v38 = vpop.permute.xlu1 %2940 }
0x103a   :  { %v2780_v25 = vsub.f32 %v4917_v45, %v2778_v47  ;;  %3855 = vmatmul.mubr.msk.bf16.vlgmr.msra.gmra.mxu0 %vm240_vm3, %v2346_v41  ;;  %v2950_v50 = vsel %vm332_vm4, %v2941_v38, 0 }
0x103b   :  { %3865 = vmatpush3.bf16.msra.mxu0 %v2522_v31  ;;  %3866 = vmatprep.mubr.msk.bf16.mxu0 %vm4164_vm1, %v4163_v15  ;;  %v4112_v48 = vpop.eup %4111 }
0x103c   :  { %v2781_v62 = vmul.f32 1.442695, %v2780_v25  ;;  %3876 = vmatprep.subr.bf16.mxu0 %v4163_v15  ;;  %v2505_v10 = vpack.c.bf16 %v4112_v48, %v4112_v48  ;;  %v2500_v26 = vsel %vm240_vm3, %v4112_v48, 0.0 }
0x103d   :  { %v2066_v54 = vpop.permute.xlu1 %2065 }
0x103e   :  { %4115 = vpow2.f32 %v2781_v62  ;;  %v2068_v9 = vmul.f32 %v2066_v54, %v4350_v61 }
0x1041   :  { %v2920_v12 = vpop.permute.xlu0 %2919  ;;  %v2208_v7 = vpop.permute.xlu1 %2207 }
0x1042   :  { %v2922_v42 = vsub.f32 %v4921_v52, %v2920_v12  ;;  %3867 = vmatmul.mubr.msk.bf16.vlgmr.msra.gmra.mxu0 %vm240_vm3, %v2505_v10  ;;  %v2210_v44 = vmul.f32 %v2208_v7, %v4350_v61 }
0x1043   :  { %v4114_v45 = vpop.eup %4113  ;;  %3877 = vmatpush3.bf16.msra.mxu0 %v2666_v13  ;;  %3878 = vmatprep.mubr.msk.bf16.mxu0 %vm4164_vm1, %v4163_v15 }
0x1044   :  { %v2923_v30 = vmul.f32 1.442695, %v2922_v42  ;;  %v2644_v17 = vsel %vm240_vm3, %v4114_v45, 0.0  ;;  %3888 = vmatprep.subr.bf16.mxu0 %v4163_v15  ;;  %v2649_v52 = vpack.c.bf16 %v4114_v45, %v4114_v45 }
0x1045   :  { %2645 = vadd.xlane.f32.xlu1 %v2644_v17  ;;  %v2799_v11 = vpop.permute.xlu0 %2798 }
0x1046   :  { %4117 = vpow2.f32 %v2923_v30  ;;  %v2808_v14 = vsel %vm332_vm4, %v2799_v11, 0 }
0x1047   :  { %4119 = vpow2.f32 %v2926_v29 }
0x1048   :  { %4121 = vpow2.f32 %v2339_v6 }
0x1049   :  { %4123 = vpow2.f32 %v2498_v24  ;;  %v2653_v35 = vpop.permute.xlu0 %2652 }
0x104a   :  { %3879 = vmatmul.mubr.msk.bf16.vlgmr.msra.gmra.mxu0 %vm240_vm3, %v2649_v52  ;;  %v2655_v39 = vmul.f32 %v2653_v35, %v4361_v63  ;;  %4125 = vpow2.f32 %v1911_v51 }
0x104b   :  { %v4116_v23 = vpop.eup %4115  ;;  %3889 = vmatpush3.bf16.msra.mxu0 %v2808_v14  ;;  %3890 = vmatprep.mubr.msk.bf16.mxu0 %vm4164_vm1, %v4163_v15  ;;  %v2795_v16 = vpop.permute.xlu1 %2794 }
0x104c   :  { %v2786_v32 = vsel %vm240_vm3, %v4116_v23, 0.0  ;;  %3900 = vmatprep.subr.bf16.mxu0 %v4163_v15  ;;  %v2791_v34 = vpack.c.bf16 %v4116_v23, %v4116_v23  ;;  %v2797_v18 = vmul.f32 %v2795_v16, %v4361_v63 }
0x104d   :  { %2787 = vadd.xlane.f32.xlu0 %v2786_v32 }
0x1052   :  { %3891 = vmatmul.mubr.msk.bf16.vlgmr.msra.gmra.mxu0 %vm240_vm3, %v2791_v34 }
0x1053   :  { %v4118_v19 = vpop.eup %4117  ;;  %3901 = vmatpush3.bf16.msra.mxu0 %v2950_v50  ;;  %3902 = vmatprep.mubr.msk.bf16.mxu0 %vm4164_vm1, %v4163_v15 }
0x1054   :  { %v2928_v8 = vsel %vm240_vm3, %v4118_v19, 0.0  ;;  %3914 = vmatprep.subr.bf16.mxu0 %v4163_v15  ;;  %v4120_v20 = vpop.eup %4119  ;;  %v2933_v21 = vpack.c.bf16 %v4118_v19, %v4118_v19 }
0x1055   :  { %2929 = vadd.xlane.f32.xlu0 %v2928_v8  ;;  %v4122_v22 = vpop.eup %4121 }
0x1056   :  { %2936 = vperm.xlu1 %3969, %v4120_v20   ;;  %v5041_v5 = vpop.eup %4123 }
0x1057   :  { %v5051_v43 = vpop.eup %4125 }
0x105a   :  { %3903 = vmatmul.mubr.msk.bf16.vlgmr.msra.gmra.mxu0 %vm240_vm3, %v2933_v21 }
0x105b   :  { %3918 = vmatprep.mubr.msk.bf16.mxu0 %vm4164_vm1, %v4163_v15 }
0x106b   :  { %2349 = vperm.xlu0 %3968, %v4122_v22  }
0x107a   :  { %2501 = vadd.xlane.f32.xlu1 %v2500_v26 }
0x108a   :  { %1914 = vadd.xlane.f32.xlu0 %v1913_v40 }
0x108b   :  { %2508 = vperm.xlu1 %3969, %v5041_v5  }
0x108f   :  { %2659 = vrot.lane.b32.xlu1 %v2655_v39, %s5229_s30 }
0x1093   :  { %2801 = vrot.lane.b32.xlu1 %v2797_v18, %s5230_s18 }
0x10a0   :  { %1921 = vperm.xlu0 %3968, %v5051_v43  }
0x10a4   :  { %2072 = vrot.lane.b32.xlu0 %v2068_v9, %s5229_s30 }
0x10a8   :  { %2214 = vrot.lane.b32.xlu0 %v2210_v44, %s5230_s18 }
0x10ae   :  { %v2059_v0 = vpop.xlane.xlu0 %2058 }
0x10af   :  { %v2060_v60 = vadd.f32 %v4959_v49, %v2059_v0 }
0x10b1   :  { %4127 = vrcp.f32 %v2060_v60 }
0x10b6   :  { %v2201_v2 = vpop.xlane.xlu0 %2200 }
0x10b7   :  { %v2202_v37 = vadd.f32 %v4967_v57, %v2201_v2 }
0x10b9   :  { %4129 = vrcp.f32 %v2202_v37 }
0x10be   :  { %v4128_v46 = vpop.eup %4127  ;;  %v2343_v36 = vpop.xlane.xlu1 %2342 }
0x10bf   :  { %v2344_v41 = vadd.f32 %v4122_v22, %v2343_v36  ;;  %2123 = vperm.xlu0 %3968, %v4128_v46  }
0x10c1   :  { %4131 = vrcp.f32 %v2344_v41 }
0x10c6   :  { %v4130_v47 = vpop.eup %4129 }
0x10c7   :  { %2265 = vperm.xlu0 %3968, %v4130_v47  }
0x10ce   :  { %v4132_v31 = vpop.eup %4131  ;;  %v2646_v25 = vpop.xlane.xlu1 %2645 }
0x10cf   :  { %v2647_v62 = vadd.f32 %v4975_v4, %v2646_v25  ;;  %2407 = vperm.xlu0 %3968, %v4132_v31  }
0x10d1   :  { %4133 = vrcp.f32 %v2647_v62 }
0x10d2   :  { %v2937_v30 = vpop.permute.xlu1 %2936 }
0x10d3   :  { %v2939_v11 = vmul.f32 %v2937_v30, %v4361_v63 }
0x10d6   :  { %v2788_v48 = vpop.xlane.xlu0 %2787 }
0x10d7   :  { %v2789_v49 = vadd.f32 %v4978_v58, %v2788_v48 }
0x10d9   :  { %4135 = vrcp.f32 %v2789_v49 }
0x10de   :  { %v4134_v1 = vpop.eup %4133  ;;  %v2930_v57 = vpop.xlane.xlu0 %2929 }
0x10df   :  { %v2931_v10 = vadd.f32 %v4120_v20, %v2930_v57  ;;  %2710 = vperm.xlu1 %3969, %v4134_v1  }
0x10e1   :  { %4137 = vrcp.f32 %v2931_v10 }
0x10e6   :  { %v4136_v12 = vpop.eup %4135  ;;  %v2350_v13 = vpop.permute.xlu0 %2349 }
0x10e7   :  { %v2352_v42 = vmul.f32 %v2350_v13, %v4350_v61  ;;  %2852 = vperm.xlu1 %3969, %v4136_v12   ;;  %v4017_v12 = vld [vmem:[%s5203_s9 + $0x18] sm:$0xff]  }
0x10e8   :  { %3907 = vmatpush3.bf16.msra.mxu1 %v4017_v12 }
0x10e9   :  { %2356 = vrot.lane.b32.xlu0 %v2352_v42, %s5231_s19  ;;  %3908 = vmatprep.subr.bf16.mxu1 %v4163_v15 }
0x10ea   :  { %v2115_v45 = vpop.f32.mrf.mxu0 }
0x10ec   :  { %v3832_v4 = vpop.f32.mrf.mxu0 }
0x10ee   :  { %v4138_v29 = vpop.eup %4137  ;;  %v2118_v17 = vpop.f32.mrf.mxu0 }
0x10ef   :  { %2994 = vperm.xlu1 %3969, %v4138_v29  }
0x10f0   :  { %v3833_v58 = vpop.f32.mrf.mxu0 }
0x10f2   :  { %v2257_v52 = vpop.f32.mrf.mxu0 }
0x10f3   :  { %2943 = vrot.lane.b32.xlu1 %v2939_v11, %s5231_s19  ;;  %v4018_v11 = vld [vmem:[%s5203_s9 + $0x10] sm:$0xff]  }
0x10f4   :  { %v3844_v14 = vpop.f32.mrf.mxu0  ;;  %3909 = vmatpush3.bf16.msra.mxu1 %v4018_v11 }
0x10f5   :  { %3922 = vmatprep.subr.bf16.mxu1 %v4163_v15 }
0x10f6   :  { %v2260_v23 = vpop.f32.mrf.mxu0 }
0x10f8   :  { %v3845_v32 = vpop.f32.mrf.mxu0 }
0x10fa   :  { %v5066_v38 = vpop.f32.mrf.mxu0 }
0x10fc   :  { %v3856_v34 = vpop.f32.mrf.mxu0 }
0x10fe   :  { %v2402_v50 = vpop.f32.mrf.mxu0 }
0x1100   :  { %v3857_v19 = vpop.f32.mrf.mxu0 }
0x1102   :  { %v5068_v8 = vpop.f32.mrf.mxu0 }
0x1103   :  { %v2502_v20 = vpop.xlane.xlu1 %2501 }
0x1104   :  { %v2503_v21 = vadd.f32 %v5041_v5, %v2502_v20  ;;  %v3868_v6 = vpop.f32.mrf.mxu0 }
0x1106   :  { %4139 = vrcp.f32 %v2503_v21  ;;  %v2561_v22 = vpop.f32.mrf.mxu0 }
0x1107   :  { %v2509_v51 = vpop.permute.xlu1 %2508 }
0x1108   :  { %v3869_v24 = vpop.f32.mrf.mxu0  ;;  %v2511_v44 = vmul.f32 %v2509_v51, %v4361_v63 }
0x110a   :  { %v2702_v26 = vpop.f32.mrf.mxu0 }
0x110b   :  { %v2660_v31 = vpop.permute.xlu1 %2659 }
0x110c   :  { %v3880_v54 = vpop.f32.mrf.mxu0  ;;  %v2703_v48 = vadd.f32 %v2702_v26, %v2660_v31 }
0x110e   :  { %v2705_v40 = vpop.f32.mrf.mxu0 }
0x110f   :  { %v2802_v62 = vpop.permute.xlu1 %2801 }
0x1110   :  { %v3881_v7 = vpop.f32.mrf.mxu0 }
0x1112   :  { %v2844_v35 = vpop.f32.mrf.mxu0 }
0x1113   :  { %v4140_v39 = vpop.eup %4139  ;;  %v1915_v16 = vpop.xlane.xlu0 %1914  ;;  %v2845_v42 = vadd.f32 %v2844_v35, %v2802_v62 }
0x1114   :  { %v1916_v18 = vadd.f32 %v5051_v43, %v1915_v16  ;;  %2566 = vperm.xlu1 %3969, %v4140_v39   ;;  %v3892_v9 = vpop.f32.mrf.mxu0 }
0x1116   :  { %4141 = vrcp.f32 %v1916_v18  ;;  %v2847_v5 = vpop.f32.mrf.mxu0 }
0x1118   :  { %2515 = vrot.lane.b32.xlu1 %v2511_v44, %s4180_s4  ;;  %v3893_v0 = vpop.f32.mrf.mxu0 }
0x111a   :  { %v2986_v60 = vpop.f32.mrf.mxu0 }
0x111b   :  { %v1922_v41 = vpop.permute.xlu0 %1921 }
0x111c   :  { %v3904_v2 = vpop.f32.mrf.mxu0  ;;  %v1924_v47 = vmul.f32 %v1922_v41, %v4350_v61  ;;  %v3512_v41 = vld [vmem:[%s5204_s10 + $0x1] ss:$0 sm:$0xff] }
0x111e   :  { %v2989_v37 = vpop.f32.mrf.mxu0 }
0x111f   :  { %v2073_v43 = vpop.permute.xlu0 %2072 }
0x1120   :  { %v3905_v46 = vpop.f32.mrf.mxu0  ;;  %v2116_v49 = vadd.f32 %v2115_v45, %v2073_v43 }
0x1123   :  { %v4142_v36 = vpop.eup %4141  ;;  %v2215_v25 = vpop.permute.xlu0 %2214 }
0x1124   :  { %1979 = vperm.xlu0 %3968, %v4142_v36   ;;  %v2258_v4 = vadd.f32 %v2257_v52, %v2215_v25 }
0x1128   :  { %1928 = vrot.lane.b32.xlu0 %v1924_v47, %s4180_s4 }
0x113a   :  { %v2124_v63 = vpop.permute.xlu0 %2123 }
0x113b   :  { %v2126_v57 = vmul.f32 %v2124_v63, %v2116_v49 }
0x1142   :  { %v2266_v61 = vpop.permute.xlu0 %2265 }
0x1143   :  { %v2268_v30 = vmul.f32 %v2266_v61, %v2258_v4 }
0x114a   :  { %v2408_v58 = vpop.permute.xlu0 %2407 }
0x115a   :  { %v2711_v1 = vpop.permute.xlu1 %2710 }
0x115b   :  { %v2713_v10 = vmul.f32 %v2711_v1, %v2703_v48  ;;  %v2357_v14 = vpop.permute.xlu0 %2356 }
0x115c   :  { %v2400_v32 = vadd.f32 %v5066_v38, %v2357_v14 }
0x115d   :  { %v3985_v13 = vpack.i.bf16 %v2713_v10, %v2126_v57 }
0x115e   :  { %v2410_v50 = vmul.f32 %v2408_v58, %v2400_v32 }
0x115f   :  { %3986 = vrot.lane.b32.xlu0 %v3985_v13, %s5231_s19 }
0x1162   :  { %v2853_v29 = vpop.permute.xlu1 %2852 }
0x1163   :  { %v2855_v17 = vmul.f32 %v2853_v29, %v2845_v42 }
0x1165   :  { %v3990_v45 = vpack.i.bf16 %v2855_v17, %v2268_v30  ;;  %v4019_v30 = vld [vmem:[%s5205_s11 + $0x18] sm:$0xff]   ;;  %v4020_v17 = vld [vmem:[%s5205_s11 + $0x10] sm:$0xff]  }
0x1166   :  { %3915 = vmatpush3.bf16.msra.mxu0 %v4019_v30 }
0x1167   :  { %3991 = vrot.lane.b32.xlu1 %v3990_v45, %s5230_s18  ;;  %3916 = vmatprep.subr.bf16.mxu0 %v4163_v15 }
0x116a   :  { %v2995_v23 = vpop.permute.xlu1 %2994  ;;  %3917 = vmatpush3.bf16.msra.mxu0 %v4020_v17 }
0x116b   :  { %3942 = vmatprep.subr.bf16.mxu0 %v4163_v15 }
0x116e   :  { %v2944_v34 = vpop.permute.xlu1 %2943 }
0x116f   :  { %v2987_v52 = vadd.f32 %v2986_v60, %v2944_v34 }
0x1171   :  { %v2997_v19 = vmul.f32 %v2995_v23, %v2987_v52 }
0x1173   :  { %v3995_v20 = vpack.i.bf16 %v2997_v19, %v2410_v50  ;;  %v4162_v50 = vld [vmem:[%s5198_s6 + $0x4] sm:$0xf] }
0x1174   :  { %v3116_v19 = vrot.slane %v4162_v50, %v1513_v55  ;;  %v4023_v55 = vld [vmem:[%s5206_s13 + $0x68] sm:$0xff]  }
0x1175   :  { %3996 = vrot.lane.b32.xlu0 %v3995_v20, %s5229_s30 }
0x118f   :  { %v2567_v6 = vpop.permute.xlu1 %2566 }
0x1193   :  { %v2516_v24 = vpop.permute.xlu1 %2515 }
0x1194   :  { %v2559_v54 = vadd.f32 %v5068_v8, %v2516_v24 }
0x1196   :  { %v2569_v16 = vmul.f32 %v2567_v6, %v2559_v54 }
0x119f   :  { %v1980_v21 = vpop.permute.xlu0 %1979 }
0x11a3   :  { %v1929_v22 = vpop.permute.xlu0 %1928 }
0x11a4   :  { %v1972_v40 = vadd.f32 %v4884_v56, %v1929_v22  ;;  %v3122_v22 = vrot.slane %v4162_v50, %v1519_v3  ;;  %v4024_v3 = vld [vmem:[%s5206_s13 + $0x60] sm:$0xff]  }
0x11a6   :  { %v1982_v18 = vmul.f32 %v1980_v21, %v1972_v40 }
0x11d1   :  { %v3987_v26 = vpop.permute.xlu0 %3986 }
0x11d2   :  { %v3989_v35 = vunpack.i.h.bf16 %v3987_v26  ;;  %v3988_v39 = vunpack.i.l.bf16 %v3987_v26 }
0x11d4   :  { %v3010_v44 = vsel %vm240_vm3, %v2569_v16, %v3989_v35  ;;  %v2423_v5 = vsel %vm240_vm3, %v1982_v18, %v3988_v39  ;;  %v4025_v35 = vld [vmem:[%s5206_s13 + $0x58] sm:$0xff]   ;;  %v4026_v39 = vld [vmem:[%s5206_s13 + $0x50] sm:$0xff]   ;;  %v3518_v16 = vld [vmem:[%s5207_s12 + $0x1] ss:$0 sm:$0xff] }
0x11d9   :  { %v3992_v7 = vpop.permute.xlu1 %3991 }
0x11da   :  { %v3994_v38 = vunpack.i.h.bf16 %v3992_v7  ;;  %v3993_v51 = vunpack.i.l.bf16 %v3992_v7  ;;  %v4021_v7 = vld [vmem:[%s5206_s13 + $0x78] sm:$0xff]  }
0x11dc   :  { %v3011_v2 = vsel %vm74_vm2, %v3010_v44, %v3994_v38  ;;  %v2424_v8 = vsel %vm74_vm2, %v2423_v5, %v3993_v51  ;;  %v4027_v38 = vld [vmem:[%s5206_s13 + $0x48] sm:$0xff]   ;;  %v4028_v51 = vld [vmem:[%s5206_s13 + $0x40] sm:$0xff]  }
0x11e7   :  { %v3997_v9 = vpop.permute.xlu0 %3996 }
0x11e8   :  { %v3999_v0 = vunpack.i.h.bf16 %v3997_v9  ;;  %v3998_v60 = vunpack.i.l.bf16 %v3997_v9 }
0x11ea   :  { %v3012_v56 = vsel %vm824_vm5, %v3011_v2, %v3999_v0  ;;  %v2425_v37 = vsel %vm824_vm5, %v2424_v8, %v3998_v60 }
0x11eb   :  { %v3018_v46 = vpack.c.bf16 %v3012_v56, %v2425_v37 }
0x11ed   :  { %3911 = vmatmul.mubr.msk.bf16.vlgmr.msra.gmra.mxu1 %vm125_vm0, %v3018_v46 }
0x11ee   :  { %3938 = vmatprep.mubr.msk.bf16.mxu1 %vm4164_vm1, %v4163_v15  ;;  %3923 = vmatpush3.bf16.msra.mxu1 %v4021_v7 }
0x11ef   :  { %3924 = vmatprep.subr.bf16.mxu1 %v4163_v15 }
0x11f2   :  { %3925 = vmatpush3.bf16.msra.mxu1 %v4022_v27 }
0x11f3   :  { %3926 = vmatprep.subr.bf16.mxu1 %v4163_v15 }
0x11f6   :  { %3927 = vmatpush3.bf16.msra.mxu1 %v4023_v55  ;;  %v3332_v55 = vld [vmem:[%s5210_s15] sm:$0x3] }
0x11f7   :  { %3928 = vmatprep.subr.bf16.mxu1 %v4163_v15 }
0x11fa   :  { %3929 = vmatpush3.bf16.msra.mxu1 %v4024_v3 }
0x11fb   :  { %3930 = vmatprep.subr.bf16.mxu1 %v4163_v15 }
0x11fe   :  { %3931 = vmatpush3.bf16.msra.mxu1 %v4025_v35 }
0x11ff   :  { %3932 = vmatprep.subr.bf16.mxu1 %v4163_v15 }
0x1202   :  { %3933 = vmatpush3.bf16.msra.mxu1 %v4026_v39  ;;  %v3362_v39 = vrot.slane %v3332_v55, %v4308_v28 }
0x1203   :  { %3934 = vmatprep.subr.bf16.mxu1 %v4163_v15 }
0x1206   :  { %3935 = vmatpush3.bf16.msra.mxu1 %v4027_v38 }
0x1207   :  { %3936 = vmatprep.subr.bf16.mxu1 %v4163_v15 }
0x120a   :  { %3937 = vmatpush3.bf16.msra.mxu1 %v4028_v51 }
0x12ad   :  { %v3068_v36 = vpop.f32.mrf.mxu1 }
0x12ae   :  { %v3075_v47 = vadd.f32 %v3068_v36, %v4734_v53 }
0x12af   :  { %v3912_v43 = vpop.f32.mrf.mxu1 }
0x12b0   :  { %v5101_v31 = vadd.f32 %v3512_v41, %v3075_v47 }
0x12b1   :  { %v3071_v25 = vpop.f32.mrf.mxu1 }
0x12b2   :  { %v3076_v62 = vadd.f32 %v3071_v25, %v4739_v59  ;;  %v3087_v63 = vsel %vm125_vm0, %v5101_v31, 0.0 }
0x12b3   :  { %3088 = vadd.xlane.f32.xlu1 %v3087_v63  ;;  %v3913_v48 = vpop.f32.mrf.mxu1 }
0x12b4   :  { %v5106_v49 = vadd.f32 %v3512_v41, %v3076_v62 }
0x12b6   :  { %v3090_v1 = vsel %vm125_vm0, %v5106_v49, 0.0 }
0x12b7   :  { %3091 = vadd.xlane.f32.xlu0 %v3090_v1 }
0x133c   :  { %v3089_v57 = vpop.xlane.xlu1 %3088 }
0x133d   :  { %v3093_v10 = vmul.f32 0.03125, %v3089_v57 }
0x133f   :  { %v3095_v53 = vsub.f32 %v5101_v31, %v3093_v10 }
0x1340   :  { %v3092_v12 = vpop.xlane.xlu0 %3091 }
0x1341   :  { %v3094_v13 = vmul.f32 0.03125, %v3092_v12  ;;  %v3097_v61 = vmul.f32 %v3095_v53, %v3095_v53 }
0x1343   :  { %v3096_v59 = vsub.f32 %v5106_v49, %v3094_v13  ;;  %v3099_v42 = vsel %vm125_vm0, %v3097_v61, 0.0 }
0x1344   :  { %3100 = vadd.xlane.f32.xlu0 %v3099_v42 }
0x1345   :  { %v3098_v4 = vmul.f32 %v3096_v59, %v3096_v59 }
0x1347   :  { %v3102_v29 = vsel %vm125_vm0, %v3098_v4, 0.0 }
0x1348   :  { %3103 = vadd.xlane.f32.xlu1 %v3102_v29 }
0x13cd   :  { %v3101_v45 = vpop.xlane.xlu0 %3100 }
0x13ce   :  { %v3105_v58 = vmul.f32 0.03125, %v3101_v45 }
0x13d0   :  { %v3107_v11 = vadd.f32 1e-05, %v3105_v58 }
0x13d1   :  { %v3104_v14 = vpop.xlane.xlu1 %3103 }
0x13d2   :  { %4143 = vrsqrt.f32 %v3107_v11  ;;  %v3106_v23 = vmul.f32 0.03125, %v3104_v14 }
0x13d4   :  { %v3108_v32 = vadd.f32 1e-05, %v3106_v23 }
0x13d6   :  { %4145 = vrsqrt.f32 %v3108_v32 }
0x13df   :  { %v4144_v34 = vpop.eup %4143 }
0x13e0   :  { %v3111_v52 = vmul.f32 %v4144_v34, %v3095_v53 }
0x13e2   :  { %v3117_v6 = vmul.f32 %v3116_v19, %v3111_v52 }
0x13e3   :  { %v4146_v20 = vpop.eup %4145 }
0x13e4   :  { %v3112_v21 = vmul.f32 %v4146_v20, %v3096_v59  ;;  %v3123_v26 = vadd.f32 %v3122_v22, %v3117_v6  ;;  %v3547_v59 = vld [vmem:[%s5208_s14 + $0x1] ss:$0 sm:$0xff]  ;;  %v4029_v6 = vld [vmem:[%s5209_s16 + $0x8] sm:$0xff]  }
0x13e6   :  { %v3118_v24 = vmul.f32 %v3116_v19, %v3112_v21 }
0x13e8   :  { %v3124_v54 = vadd.f32 %v3122_v22, %v3118_v24  ;;  %v4030_v22 = vld [vmem:[%s5209_s16] sm:$0xff]  }
0x13ea   :  { %v3130_v40 = vpack.c.bf16 %v3124_v54, %v3123_v26 }
0x13ec   :  { %3919 = vmatmul.mubr.msk.bf16.vlgmr.msra.gmra.mxu0 %vm125_vm0, %v3130_v40 }
0x13ed   :  { %3946 = vmatprep.mubr.msk.bf16.mxu0 %vm4164_vm1, %v4163_v15  ;;  %3943 = vmatpush3.bf16.msra.mxu0 %v4029_v6 }
0x13ee   :  { %3944 = vmatprep.subr.bf16.mxu0 %v4163_v15 }
0x13f1   :  { %3945 = vmatpush3.bf16.msra.mxu0 %v4030_v22 }
0x14ac   :  { %v3188_v18 = vpop.f32.mrf.mxu0 }
0x14ad   :  { %v3189_v9 = vadd.f32 %v3518_v16, %v3188_v18 }
0x14ae   :  { %v3920_v44 = vpop.f32.mrf.mxu0 }
0x14af   :  { %v3197_v5 = vmul.f32 0.044715, %v3189_v9  ;;  %v3195_v1 = vmul.f32 0.5, %v3189_v9 }
0x14b0   :  { %v3191_v0 = vpop.f32.mrf.mxu0 }
0x14b1   :  { %v3199_v60 = vmul.f32 %v3197_v5, %v3189_v9  ;;  %v3192_v2 = vadd.f32 %v3518_v16, %v3191_v0  ;;  %v3368_v16 = vrot.slane %v3332_v55, %v4315_v33 }
0x14b2   :  { %v3921_v8 = vpop.f32.mrf.mxu0 }
0x14b3   :  { %v3201_v56 = vmul.f32 %v3199_v60, %v3189_v9  ;;  %v3198_v37 = vmul.f32 0.044715, %v3192_v2  ;;  %v3196_v57 = vmul.f32 0.5, %v3192_v2 }
0x14b5   :  { %v3203_v46 = vadd.f32 %v3201_v56, %v3189_v9  ;;  %v3200_v36 = vmul.f32 %v3198_v37, %v3192_v2 }
0x14b7   :  { %v3205_v41 = vmul.f32 0.7978846, %v3203_v46  ;;  %v3202_v47 = vmul.f32 %v3200_v36, %v3192_v2 }
0x14b9   :  { %4147 = vtanh.f32 %v3205_v41  ;;  %v3204_v43 = vadd.f32 %v3202_v47, %v3192_v2 }
0x14bb   :  { %v3206_v25 = vmul.f32 0.7978846, %v3204_v43 }
0x14bd   :  { %4149 = vtanh.f32 %v3206_v25 }
0x14c6   :  { %v4148_v62 = vpop.eup %4147 }
0x14c7   :  { %v3209_v63 = vadd.f32 1.0, %v4148_v62 }
0x14c9   :  { %v3211_v53 = vmul.f32 %v3209_v63, %v3195_v1 }
0x14ca   :  { %v4150_v48 = vpop.eup %4149 }
0x14cb   :  { %v3210_v10 = vadd.f32 1.0, %v4150_v48 }
0x14cd   :  { %v3212_v12 = vmul.f32 %v3210_v10, %v3196_v57 }
0x14cf   :  { %v3230_v13 = vpack.c.bf16 %v3212_v12, %v3211_v53 }
0x14d1   :  { %3939 = vmatmul.mubr.bf16.vlgmr.msra.gmra.mxu1 %v3230_v13 }
0x1591   :  { %v3313_v61 = vpop.f32.mrf.mxu1 }
0x1592   :  { %v3320_v42 = vadd.f32 %v3313_v61, %v5101_v31 }
0x1593   :  { %v3940_v4 = vpop.f32.mrf.mxu1 }
0x1594   :  { %v3330_v29 = vadd.f32 %v3547_v59, %v3320_v42 }
0x1595   :  { %v3316_v30 = vpop.f32.mrf.mxu1 }
0x1596   :  { %v3321_v17 = vadd.f32 %v3316_v30, %v5106_v49  ;;  %v3333_v45 = vsel %vm125_vm0, %v3330_v29, 0.0 }
0x1597   :  { %3334 = vadd.xlane.f32.xlu0 %v3333_v45  ;;  %v3941_v58 = vpop.f32.mrf.mxu1 }
0x1598   :  { %v3331_v11 = vadd.f32 %v3547_v59, %v3321_v17 }
0x159a   :  { %v3336_v14 = vsel %vm125_vm0, %v3331_v11, 0.0 }
0x159b   :  { %3337 = vadd.xlane.f32.xlu1 %v3336_v14 }
0x1620   :  { %v3335_v23 = vpop.xlane.xlu0 %3334 }
0x1621   :  { %v3339_v32 = vmul.f32 0.03125, %v3335_v23 }
0x1623   :  { %v3341_v34 = vsub.f32 %v3330_v29, %v3339_v32 }
0x1624   :  { %v3338_v52 = vpop.xlane.xlu1 %3337 }
0x1625   :  { %v3340_v50 = vmul.f32 0.03125, %v3338_v52  ;;  %v3343_v19 = vmul.f32 %v3341_v34, %v3341_v34 }
0x1627   :  { %v3342_v31 = vsub.f32 %v3331_v11, %v3340_v50  ;;  %v3345_v20 = vsel %vm125_vm0, %v3343_v19, 0.0 }
0x1628   :  { %3346 = vadd.xlane.f32.xlu0 %v3345_v20 }
0x1629   :  { %v3344_v21 = vmul.f32 %v3342_v31, %v3342_v31 }
0x162b   :  { %v3348_v49 = vsel %vm125_vm0, %v3344_v21, 0.0 }
0x162c   :  { %3349 = vadd.xlane.f32.xlu1 %v3348_v49 }
0x16b1   :  { %v3347_v24 = vpop.xlane.xlu0 %3346 }
0x16b2   :  { %v3351_v26 = vmul.f32 0.03125, %v3347_v24 }
0x16b4   :  { %v3353_v54 = vadd.f32 1e-05, %v3351_v26 }
0x16b5   :  { %v3350_v40 = vpop.xlane.xlu1 %3349 }
0x16b6   :  { %4151 = vrsqrt.f32 %v3353_v54  ;;  %v3352_v7 = vmul.f32 0.03125, %v3350_v40 }
0x16b8   :  { %v3354_v27 = vadd.f32 1e-05, %v3352_v7 }
0x16ba   :  { %4153 = vrsqrt.f32 %v3354_v27 }
0x16c3   :  { %v4152_v3 = vpop.eup %4151 }
0x16c4   :  { %v3357_v35 = vmul.f32 %v4152_v3, %v3341_v34 }
0x16c6   :  { %v3363_v15 = vmul.f32 %v3362_v39, %v3357_v35 }
0x16c7   :  { %v4154_v38 = vpop.eup %4153 }
0x16c8   :  { %v3358_v51 = vmul.f32 %v4154_v38, %v3342_v31  ;;  %v3369_v9 = vadd.f32 %v3368_v16, %v3363_v15 }
0x16ca   :  { %v3364_v18 = vmul.f32 %v3362_v39, %v3358_v51 }
0x16cc   :  { %v3370_v44 = vadd.f32 %v3368_v16, %v3364_v18 }
0x16ce   :  { %v3375_v5 = vpack.c.bf16 %v3370_v44, %v3369_v9 }
0x16d0   :  { %3947 = vmatmul.mubr.msk.bf16.vlgmr.msra.gmra.mxu0 %vm125_vm0, %v3375_v5 }
0x1790   :  { %v3425_v0 = vpop.f32.mrf.mxu0 }
0x1791   :  { %3432 = vst [vmem:[%s5211_s17] sm:$0xff] %v3425_v0 }
0x1792   :  { %v3948_v60 = vpop.f32.mrf.mxu0 }
0x1794   :  { %v3428_v2 = vpop.f32.mrf.mxu0 }
0x1795   :  { %3433 = vst [vmem:[%s5211_s17 + $0x8] sm:$0xff] %v3428_v2 }
0x1796   :  { %v3949_v28 = vpop.f32.mrf.mxu0 }

</bundles_post_ra>
